<compile_context>
chip_gen: v5e
topology: v5e:2x2
jax: 0.10.0
libtpu: 0.0.40
codegen_flags: <defaults>
</compile_context>

<pallas_src>
import functools
import math

import jax
import jax.numpy as jnp
from jax.experimental import pallas as pl
from jax.experimental.pallas import tpu as pltpu

BN_EPS = 0.8          # nn.BatchNorm1d(out_feat, 0.8) -> eps = 0.8 (intentional)
LRELU_SLOPE = 0.2
LANE = 128
HIDDEN = (128, 256, 512, 1024)
MAX_TILE_N = 2048     # max final-layer output-column tile streamed per grid step


def _round_up(x, m):
    return (x + m - 1) // m * m


# ----------------------------------------------------------------------------
# Packed layout for the small f32 operands.  Every chunk size is a multiple of
# 128, so every static slice inside the kernel is lane-aligned (free).
# ----------------------------------------------------------------------------
_PACK_SIZES = dict(b1=128, b2=256, b3=512, b4=1024,
                   g2=256, be2=256, g3=512, be3=512, g4=1024, be4=1024)
_PACK_OFFSETS = {}
_off = 0
for _name, _n in _PACK_SIZES.items():
    _PACK_OFFSETS[_name] = _off
    _off += _n
PACK_TOTAL = _off  # 5504 = 43 * 128


# ----------------------------------------------------------------------------
# Kernel
# ----------------------------------------------------------------------------
def _leaky_relu(x):
    return jnp.where(x > 0, x, LRELU_SLOPE * x)


def _linear(x_f32, w_ref, b):
    # bf16 operands on the MXU (weights stored bf16), f32 accumulation,
    # bias add in f32.
    y = jnp.dot(x_f32.astype(jnp.bfloat16), w_ref[...],
                preferred_element_type=jnp.float32)
    return y + b


def _batchnorm_train(h, g, be):
    # Training-mode BatchNorm1d over the full batch, eps=0.8.
    # One-pass biased variance with a non-negativity guard, all math in f32.
    mu = jnp.mean(h, axis=0, keepdims=True)
    var = jnp.maximum(jnp.mean(h * h, axis=0, keepdims=True) - mu * mu, 0.0)
    return (h - mu) * jax.lax.rsqrt(var + BN_EPS) * g + be


def generator_kernel(z_ref, w1_ref, w2_ref, w3_ref, w4_ref, pk_ref,
                     w5_ref, b5_ref, out_ref):
    def pk(name):
        off = _PACK_OFFSETS[name]
        return pk_ref[:, off:off + _PACK_SIZES[name]]

    x = z_ref[...].astype(jnp.float32)

    # block(latent, 128, normalize=False)
    h = _leaky_relu(_linear(x, w1_ref, pk("b1")))
    # block(128, 256)
    h = _leaky_relu(_batchnorm_train(_linear(h, w2_ref, pk("b2")),
                                     pk("g2"), pk("be2")))
    # block(256, 512)
    h = _leaky_relu(_batchnorm_train(_linear(h, w3_ref, pk("b3")),
                                     pk("g3"), pk("be3")))
    # block(512, 1024)
    h = _leaky_relu(_batchnorm_train(_linear(h, w4_ref, pk("b4")),
                                     pk("g4"), pk("be4")))
    # Linear(1024, tile_n slice of flat_pad) -> Tanh, bf16 store.
    y = _linear(h, w5_ref, b5_ref[...])
    out_ref[...] = jnp.tanh(y).astype(out_ref.dtype)


# ----------------------------------------------------------------------------
# Parameters
# ----------------------------------------------------------------------------
def make_params(key, latent_dim, img_shape):
    """Deterministic parameter init (PyTorch-Linear-style uniform bounds).

    Linear weights are stored (in_features, out_features) in bf16.  The last
    layer's out-features are zero-padded to a multiple of 128 (lane-dense
    output slab; pad sliced off in the wrapper) and the latent dim is padded
    to a multiple of 16 (unmasked bf16 sublane tile for w1).  Biases and BN
    affine params stay f32 and are packed into a single (1, 5504) array.
    """
    flat_out = int(math.prod(img_shape))
    flat_pad = _round_up(flat_out, LANE)
    latent_pad = _round_up(latent_dim, 16)

    dims = [latent_dim, *HIDDEN, flat_out]
    keys = jax.random.split(key, 2 * (len(dims) - 1))

    params = {}
    small = {}
    for i in range(len(dims) - 1):
        fan_in, fan_out = dims[i], dims[i + 1]
        bound = 1.0 / math.sqrt(fan_in)
        w = jax.random.uniform(keys[2 * i], (fan_in, fan_out), jnp.float32,
                               -bound, bound)
        b = jax.random.uniform(keys[2 * i + 1], (1, fan_out), jnp.float32,
                               -bound, bound)
        if i == 0 and latent_pad != latent_dim:
            w = jnp.pad(w, ((0, latent_pad - latent_dim), (0, 0)))
        if i == len(dims) - 2 and flat_pad != flat_out:
            w = jnp.pad(w, ((0, 0), (0, flat_pad - flat_out)))
            b = jnp.pad(b, ((0, 0), (0, flat_pad - flat_out)))
        params[f"w{i+1}"] = w.astype(jnp.bfloat16)
        if i == len(dims) - 2:
            params["b5"] = b
        else:
            small[f"b{i+1}"] = b

    # BatchNorm affine params (PyTorch default: gamma=1, beta=0), layers 2..4.
    for i, feat in zip((2, 3, 4), HIDDEN[1:]):
        small[f"g{i}"] = jnp.ones((1, feat), jnp.float32)
        small[f"be{i}"] = jnp.zeros((1, feat), jnp.float32)

    params["packed"] = jnp.concatenate([small[n] for n in _PACK_SIZES], axis=1)
    assert params["packed"].shape == (1, PACK_TOTAL)
    return params


# ----------------------------------------------------------------------------
# Forward
# ----------------------------------------------------------------------------
@functools.partial(jax.jit, static_argnames=("img_shape",))
def generator_forward(z, params, img_shape):
    batch, latent_dim = z.shape
    flat_out = int(math.prod(img_shape))           # Python int, no tracer
    flat_pad = _round_up(flat_out, LANE)
    latent_pad = params["w1"].shape[0]
    if latent_pad != latent_dim:
        z = jnp.pad(z, ((0, 0), (0, latent_pad - latent_dim)))

    # Final-layer column tile: largest power-of-two multiple of 128 dividing
    # flat_pad, capped at MAX_TILE_N.  Streams w5 through VMEM per grid step.
    tile_n = math.gcd(flat_pad, MAX_TILE_N)
    grid_n = flat_pad // tile_n

    def const(shape):
        return pl.BlockSpec(shape, lambda j: (0, 0))

    in_specs = [
        const((batch, latent_pad)),                       # z
        const((latent_pad, 128)),                         # w1
        const((128, 256)),                                # w2
        const((256, 512)),                                # w3
        const((512, 1024)),                               # w4
        const((1, PACK_TOTAL)),                           # packed biases + BN
        pl.BlockSpec((1024, tile_n), lambda j: (0, j)),   # w5 column tile
        pl.BlockSpec((1, tile_n), lambda j: (0, j)),      # b5 column tile
    ]
    out_specs = pl.BlockSpec((batch, tile_n), lambda j: (0, j))

    # Advisory cost estimate (hidden stack is recomputed per grid step).
    hidden_w = latent_pad * 128 + 128 * 256 + 256 * 512 + 512 * 1024
    hidden_flops = 2 * batch * hidden_w
    last_flops = 2 * batch * 1024 * flat_pad
    weight_bytes = 2 * (hidden_w + 1024 * flat_pad)                 # bf16
    io_bytes = (4 * batch * latent_pad + 4 * (PACK_TOTAL + flat_pad)
                + 2 * batch * flat_pad)                             # z/pk/b5/out
    cost = pl.CostEstimate(
        flops=grid_n * hidden_flops + last_flops,
        transcendentals=batch * flat_pad + grid_n * sum(HIDDEN[1:]),
        bytes_accessed=weight_bytes + io_bytes,
    )

    # VMEM budget: resident small weights + double-buffered streamed tiles
    # + activations, plus headroom.  Stays far below v7x's 64 MiB cap.
    small_w_bytes = 2 * hidden_w
    stream_bytes = 2 * 1024 * tile_n + 4 * tile_n + 2 * batch * tile_n
    act_bytes = 4 * batch * (latent_pad + sum(HIDDEN) + tile_n)
    footprint = 2 * (small_w_bytes + 4 * batch * latent_pad + 4 * PACK_TOTAL
                     + stream_bytes) + act_bytes
    vmem_limit = int(_round_up(footprint + 6 * (1 << 20), 1 << 20))

    flat = pl.pallas_call(
        generator_kernel,
        out_shape=jax.ShapeDtypeStruct((batch, flat_pad), jnp.bfloat16),
        grid=(grid_n,),
        in_specs=in_specs,
        out_specs=out_specs,
        cost_estimate=cost,
        compiler_params=pltpu.CompilerParams(
            dimension_semantics=("parallel",),
            vmem_limit_bytes=vmem_limit,
        ),
    )(z, params["w1"], params["w2"], params["w3"], params["w4"],
      params["packed"], params["w5"], params["b5"])

    # Drop the lane padding, then (B, C*H*W) -> (B, *img_shape) (NCHW view).
    return flat[:, :flat_out].reshape((batch,) + tuple(img_shape))


# ----------------------------------------------------------------------------
# Pure-JAX reference (mirrors the kernel numerics: bf16 matmuls, f32 math).
# NOTE: this validates self-consistency of the bf16 MXU path, not bit-fidelity
# to the original f32 PyTorch module.
# TODO(synk): BatchNorm1d running_mean/running_var buffer updates (training-
# time state) are not reproduced; the forward output does not depend on them.
# ----------------------------------------------------------------------------
def generator_reference(z, params, img_shape):
    flat_out = int(math.prod(img_shape))
    latent_pad = params["w1"].shape[0]
    if latent_pad != z.shape[1]:
        z = jnp.pad(z, ((0, 0), (0, latent_pad - z.shape[1])))

    def pk(name):
        off = _PACK_OFFSETS[name]
        return params["packed"][:, off:off + _PACK_SIZES[name]]

    def lin(x, w, b):
        return jnp.dot(x.astype(jnp.bfloat16), w,
                       preferred_element_type=jnp.float32) + b

    h = lin(z, params["w1"], pk("b1"))
    h = jnp.where(h > 0, h, LRELU_SLOPE * h)
    for i in (2, 3, 4):
        h = lin(h, params[f"w{i}"], pk(f"b{i}"))
        mu = jnp.mean(h, axis=0, keepdims=True)
        var = jnp.maximum(jnp.mean(h * h, axis=0, keepdims=True) - mu * mu, 0.0)
        h = (h - mu) / jnp.sqrt(var + BN_EPS) * pk(f"g{i}") + pk(f"be{i}")
        h = jnp.where(h > 0, h, LRELU_SLOPE * h)
    out = jnp.tanh(lin(h, params["w5"], params["b5"]))
    return out[:, :flat_out].reshape((z.shape[0],) + tuple(img_shape))


if __name__ == "__main__":
    latent_dim = 32
    img_shape = (1, 28, 28)   # prod = 784 -> padded to 896, grid of 7 tiles
    batch = 8                 # multiple of 8 (f32 sublane)

    key = jax.random.PRNGKey(0)
    k_param, k_z = jax.random.split(key)
    params = make_params(k_param, latent_dim, img_shape)
    z = jax.random.normal(k_z, (batch, latent_dim), jnp.float32)

    img = generator_forward(z, params, img_shape)
    jax.block_until_ready(img)

    ref = generator_reference(z, params, img_shape)
    assert img.shape == (batch,) + img_shape, img.shape
    # bf16 matmul path + bf16 output vs f32 reference math on tanh-bounded
    # values -> modest tolerance.
    assert jnp.allclose(img.astype(jnp.float32), ref, atol=2e-2, rtol=2e-2), \
        "mismatch vs reference"

    print("KERNEL_OK")
</pallas_src>

<mosaic_0001>
module attributes {stable_mosaic.version = 11 : i64} {
  func.func @generator_kernel(%arg0: i32, %arg1: memref<8x32xf32, #tpu.memory_space<vmem>>, %arg2: memref<32x128xbf16, #tpu.memory_space<vmem>>, %arg3: memref<128x256xbf16, #tpu.memory_space<vmem>>, %arg4: memref<256x512xbf16, #tpu.memory_space<vmem>>, %arg5: memref<512x1024xbf16, #tpu.memory_space<vmem>>, %arg6: memref<1x5504xf32, #tpu.memory_space<vmem>>, %arg7: memref<1024x128xbf16, #tpu.memory_space<vmem>>, %arg8: memref<1x128xf32, #tpu.memory_space<vmem>>, %arg9: memref<8x128xbf16, #tpu.memory_space<vmem>>) attributes {dimension_semantics = [#tpu.dimension_semantics<parallel>], iteration_bounds = array<i64: 7>, scalar_prefetch = 0 : i64, scratch_operands = 0 : i64, tpu.core_type = #tpu.core_type<tc>, window_params = [{pipeline_mode = #tpu.pipeline_mode<synchronous>, transform_indices = @transform_0, window_bounds = array<i64: 8, 32>}, {pipeline_mode = #tpu.pipeline_mode<synchronous>, transform_indices = @transform_1, window_bounds = array<i64: 32, 128>}, {pipeline_mode = #tpu.pipeline_mode<synchronous>, transform_indices = @transform_2, window_bounds = array<i64: 128, 256>}, {pipeline_mode = #tpu.pipeline_mode<synchronous>, transform_indices = @transform_3, window_bounds = array<i64: 256, 512>}, {pipeline_mode = #tpu.pipeline_mode<synchronous>, transform_indices = @transform_4, window_bounds = array<i64: 512, 1024>}, {pipeline_mode = #tpu.pipeline_mode<synchronous>, transform_indices = @transform_5, window_bounds = array<i64: 1, 5504>}, {transform_indices = @transform_6, window_bounds = array<i64: 1024, 128>}, {transform_indices = @transform_7, window_bounds = array<i64: 1, 128>}, {transform_indices = @transform_8, window_bounds = array<i64: 8, 128>}]} {
    %c0 = arith.constant 0 : index
    %c0_0 = arith.constant 0 : index
    %0 = vector.load %arg1[%c0, %c0_0] : memref<8x32xf32, #tpu.memory_space<vmem>>, vector<8x32xf32>
    %c0_1 = arith.constant 0 : index
    %c0_2 = arith.constant 0 : index
    %1 = vector.load %arg6[%c0_1, %c0_2] : memref<1x5504xf32, #tpu.memory_space<vmem>>, vector<1x128xf32>
    %2 = arith.truncf %0 : vector<8x32xf32> to vector<8x32xbf16>
    %c0_3 = arith.constant 0 : index
    %c0_4 = arith.constant 0 : index
    %3 = vector.load %arg2[%c0_3, %c0_4] : memref<32x128xbf16, #tpu.memory_space<vmem>>, vector<32x128xbf16>
    %cst = arith.constant dense<0.000000e+00> : vector<8x128xf32>
    %4 = tpu.matmul %2, %3, %cst {dimension_numbers = #tpu.dot_dimension_numbers<[1], [0], [0], [1], [0, 0, 1, 1], [], []>} : vector<8x32xbf16>, vector<32x128xbf16>, vector<8x128xf32> -> vector<8x128xf32>
    %5 = vector.broadcast %1 : vector<1x128xf32> to vector<8x128xf32>
    %6 = arith.addf %4, %5 : vector<8x128xf32>
    %cst_5 = arith.constant 0.000000e+00 : f32
    %7 = vector.broadcast %cst_5 : f32 to vector<8x128xf32>
    %8 = arith.cmpf ogt, %6, %7 : vector<8x128xf32>
    %cst_6 = arith.constant 2.000000e-01 : f32
    %9 = vector.broadcast %cst_6 : f32 to vector<8x128xf32>
    %10 = arith.mulf %9, %6 : vector<8x128xf32>
    %11 = arith.select %8, %6, %10 : vector<8x128xi1>, vector<8x128xf32>
    %c0_7 = arith.constant 0 : index
    %c128 = arith.constant 128 : index
    %12 = vector.load %arg6[%c0_7, %c128] : memref<1x5504xf32, #tpu.memory_space<vmem>>, vector<1x256xf32>
    %13 = arith.truncf %11 : vector<8x128xf32> to vector<8x128xbf16>
    %c0_8 = arith.constant 0 : index
    %c0_9 = arith.constant 0 : index
    %14 = vector.load %arg3[%c0_8, %c0_9] : memref<128x256xbf16, #tpu.memory_space<vmem>>, vector<128x256xbf16>
    %cst_10 = arith.constant dense<0.000000e+00> : vector<8x256xf32>
    %15 = tpu.matmul %13, %14, %cst_10 {dimension_numbers = #tpu.dot_dimension_numbers<[1], [0], [0], [1], [0, 0, 1, 1], [], []>} : vector<8x128xbf16>, vector<128x256xbf16>, vector<8x256xf32> -> vector<8x256xf32>
    %16 = vector.broadcast %12 : vector<1x256xf32> to vector<8x256xf32>
    %17 = arith.addf %15, %16 : vector<8x256xf32>
    %c0_11 = arith.constant 0 : index
    %c1920 = arith.constant 1920 : index
    %18 = vector.load %arg6[%c0_11, %c1920] : memref<1x5504xf32, #tpu.memory_space<vmem>>, vector<1x256xf32>
    %c0_12 = arith.constant 0 : index
    %c2176 = arith.constant 2176 : index
    %19 = vector.load %arg6[%c0_12, %c2176] : memref<1x5504xf32, #tpu.memory_space<vmem>>, vector<1x256xf32>
    %cst_13 = arith.constant dense<0.000000e+00> : vector<256xf32>
    %20 = vector.multi_reduction <add>, %17, %cst_13 [0] : vector<8x256xf32> to vector<256xf32>
    %21 = vector.shape_cast %20 : vector<256xf32> to vector<1x256xf32>
    %cst_14 = arith.constant 8.000000e+00 : f32
    %22 = vector.broadcast %cst_14 : f32 to vector<1x256xf32>
    %23 = arith.divf %21, %22 : vector<1x256xf32>
    %24 = arith.mulf %17, %17 : vector<8x256xf32>
    %cst_15 = arith.constant dense<0.000000e+00> : vector<256xf32>
    %25 = vector.multi_reduction <add>, %24, %cst_15 [0] : vector<8x256xf32> to vector<256xf32>
    %26 = vector.shape_cast %25 : vector<256xf32> to vector<1x256xf32>
    %cst_16 = arith.constant 8.000000e+00 : f32
    %27 = vector.broadcast %cst_16 : f32 to vector<1x256xf32>
    %28 = arith.divf %26, %27 : vector<1x256xf32>
    %29 = arith.mulf %23, %23 : vector<1x256xf32>
    %30 = arith.subf %28, %29 : vector<1x256xf32>
    %cst_17 = arith.constant 0.000000e+00 : f32
    %31 = vector.broadcast %cst_17 : f32 to vector<1x256xf32>
    %32 = arith.maximumf %30, %31 : vector<1x256xf32>
    %33 = vector.broadcast %23 : vector<1x256xf32> to vector<8x256xf32>
    %34 = arith.subf %17, %33 : vector<8x256xf32>
    %cst_18 = arith.constant 8.000000e-01 : f32
    %35 = vector.broadcast %cst_18 : f32 to vector<1x256xf32>
    %36 = arith.addf %32, %35 : vector<1x256xf32>
    %37 = math.rsqrt %36 : vector<1x256xf32>
    %38 = vector.broadcast %37 : vector<1x256xf32> to vector<8x256xf32>
    %39 = arith.mulf %34, %38 : vector<8x256xf32>
    %40 = vector.broadcast %18 : vector<1x256xf32> to vector<8x256xf32>
    %41 = arith.mulf %39, %40 : vector<8x256xf32>
    %42 = vector.broadcast %19 : vector<1x256xf32> to vector<8x256xf32>
    %43 = arith.addf %41, %42 : vector<8x256xf32>
    %cst_19 = arith.constant 0.000000e+00 : f32
    %44 = vector.broadcast %cst_19 : f32 to vector<8x256xf32>
    %45 = arith.cmpf ogt, %43, %44 : vector<8x256xf32>
    %cst_20 = arith.constant 2.000000e-01 : f32
    %46 = vector.broadcast %cst_20 : f32 to vector<8x256xf32>
    %47 = arith.mulf %46, %43 : vector<8x256xf32>
    %48 = arith.select %45, %43, %47 : vector<8x256xi1>, vector<8x256xf32>
    %c0_21 = arith.constant 0 : index
    %c384 = arith.constant 384 : index
    %49 = vector.load %arg6[%c0_21, %c384] : memref<1x5504xf32, #tpu.memory_space<vmem>>, vector<1x512xf32>
    %50 = arith.truncf %48 : vector<8x256xf32> to vector<8x256xbf16>
    %c0_22 = arith.constant 0 : index
    %c0_23 = arith.constant 0 : index
    %51 = vector.load %arg4[%c0_22, %c0_23] : memref<256x512xbf16, #tpu.memory_space<vmem>>, vector<256x512xbf16>
    %cst_24 = arith.constant dense<0.000000e+00> : vector<8x512xf32>
    %52 = tpu.matmul %50, %51, %cst_24 {dimension_numbers = #tpu.dot_dimension_numbers<[1], [0], [0], [1], [0, 0, 1, 1], [], []>} : vector<8x256xbf16>, vector<256x512xbf16>, vector<8x512xf32> -> vector<8x512xf32>
    %53 = vector.broadcast %49 : vector<1x512xf32> to vector<8x512xf32>
    %54 = arith.addf %52, %53 : vector<8x512xf32>
    %c0_25 = arith.constant 0 : index
    %c2432 = arith.constant 2432 : index
    %55 = vector.load %arg6[%c0_25, %c2432] : memref<1x5504xf32, #tpu.memory_space<vmem>>, vector<1x512xf32>
    %c0_26 = arith.constant 0 : index
    %c2944 = arith.constant 2944 : index
    %56 = vector.load %arg6[%c0_26, %c2944] : memref<1x5504xf32, #tpu.memory_space<vmem>>, vector<1x512xf32>
    %cst_27 = arith.constant dense<0.000000e+00> : vector<512xf32>
    %57 = vector.multi_reduction <add>, %54, %cst_27 [0] : vector<8x512xf32> to vector<512xf32>
    %58 = vector.shape_cast %57 : vector<512xf32> to vector<1x512xf32>
    %cst_28 = arith.constant 8.000000e+00 : f32
    %59 = vector.broadcast %cst_28 : f32 to vector<1x512xf32>
    %60 = arith.divf %58, %59 : vector<1x512xf32>
    %61 = arith.mulf %54, %54 : vector<8x512xf32>
    %cst_29 = arith.constant dense<0.000000e+00> : vector<512xf32>
    %62 = vector.multi_reduction <add>, %61, %cst_29 [0] : vector<8x512xf32> to vector<512xf32>
    %63 = vector.shape_cast %62 : vector<512xf32> to vector<1x512xf32>
    %cst_30 = arith.constant 8.000000e+00 : f32
    %64 = vector.broadcast %cst_30 : f32 to vector<1x512xf32>
    %65 = arith.divf %63, %64 : vector<1x512xf32>
    %66 = arith.mulf %60, %60 : vector<1x512xf32>
    %67 = arith.subf %65, %66 : vector<1x512xf32>
    %cst_31 = arith.constant 0.000000e+00 : f32
    %68 = vector.broadcast %cst_31 : f32 to vector<1x512xf32>
    %69 = arith.maximumf %67, %68 : vector<1x512xf32>
    %70 = vector.broadcast %60 : vector<1x512xf32> to vector<8x512xf32>
    %71 = arith.subf %54, %70 : vector<8x512xf32>
    %cst_32 = arith.constant 8.000000e-01 : f32
    %72 = vector.broadcast %cst_32 : f32 to vector<1x512xf32>
    %73 = arith.addf %69, %72 : vector<1x512xf32>
    %74 = math.rsqrt %73 : vector<1x512xf32>
    %75 = vector.broadcast %74 : vector<1x512xf32> to vector<8x512xf32>
    %76 = arith.mulf %71, %75 : vector<8x512xf32>
    %77 = vector.broadcast %55 : vector<1x512xf32> to vector<8x512xf32>
    %78 = arith.mulf %76, %77 : vector<8x512xf32>
    %79 = vector.broadcast %56 : vector<1x512xf32> to vector<8x512xf32>
    %80 = arith.addf %78, %79 : vector<8x512xf32>
    %cst_33 = arith.constant 0.000000e+00 : f32
    %81 = vector.broadcast %cst_33 : f32 to vector<8x512xf32>
    %82 = arith.cmpf ogt, %80, %81 : vector<8x512xf32>
    %cst_34 = arith.constant 2.000000e-01 : f32
    %83 = vector.broadcast %cst_34 : f32 to vector<8x512xf32>
    %84 = arith.mulf %83, %80 : vector<8x512xf32>
    %85 = arith.select %82, %80, %84 : vector<8x512xi1>, vector<8x512xf32>
    %c0_35 = arith.constant 0 : index
    %c896 = arith.constant 896 : index
    %86 = vector.load %arg6[%c0_35, %c896] : memref<1x5504xf32, #tpu.memory_space<vmem>>, vector<1x1024xf32>
    %87 = arith.truncf %85 : vector<8x512xf32> to vector<8x512xbf16>
    %c0_36 = arith.constant 0 : index
    %c0_37 = arith.constant 0 : index
    %88 = vector.load %arg5[%c0_36, %c0_37] : memref<512x1024xbf16, #tpu.memory_space<vmem>>, vector<512x1024xbf16>
    %cst_38 = arith.constant dense<0.000000e+00> : vector<8x1024xf32>
    %89 = tpu.matmul %87, %88, %cst_38 {dimension_numbers = #tpu.dot_dimension_numbers<[1], [0], [0], [1], [0, 0, 1, 1], [], []>} : vector<8x512xbf16>, vector<512x1024xbf16>, vector<8x1024xf32> -> vector<8x1024xf32>
    %90 = vector.broadcast %86 : vector<1x1024xf32> to vector<8x1024xf32>
    %91 = arith.addf %89, %90 : vector<8x1024xf32>
    %c0_39 = arith.constant 0 : index
    %c3456 = arith.constant 3456 : index
    %92 = vector.load %arg6[%c0_39, %c3456] : memref<1x5504xf32, #tpu.memory_space<vmem>>, vector<1x1024xf32>
    %c0_40 = arith.constant 0 : index
    %c4480 = arith.constant 4480 : index
    %93 = vector.load %arg6[%c0_40, %c4480] : memref<1x5504xf32, #tpu.memory_space<vmem>>, vector<1x1024xf32>
    %cst_41 = arith.constant dense<0.000000e+00> : vector<1024xf32>
    %94 = vector.multi_reduction <add>, %91, %cst_41 [0] : vector<8x1024xf32> to vector<1024xf32>
    %95 = vector.shape_cast %94 : vector<1024xf32> to vector<1x1024xf32>
    %cst_42 = arith.constant 8.000000e+00 : f32
    %96 = vector.broadcast %cst_42 : f32 to vector<1x1024xf32>
    %97 = arith.divf %95, %96 : vector<1x1024xf32>
    %98 = arith.mulf %91, %91 : vector<8x1024xf32>
    %cst_43 = arith.constant dense<0.000000e+00> : vector<1024xf32>
    %99 = vector.multi_reduction <add>, %98, %cst_43 [0] : vector<8x1024xf32> to vector<1024xf32>
    %100 = vector.shape_cast %99 : vector<1024xf32> to vector<1x1024xf32>
    %cst_44 = arith.constant 8.000000e+00 : f32
    %101 = vector.broadcast %cst_44 : f32 to vector<1x1024xf32>
    %102 = arith.divf %100, %101 : vector<1x1024xf32>
    %103 = arith.mulf %97, %97 : vector<1x1024xf32>
    %104 = arith.subf %102, %103 : vector<1x1024xf32>
    %cst_45 = arith.constant 0.000000e+00 : f32
    %105 = vector.broadcast %cst_45 : f32 to vector<1x1024xf32>
    %106 = arith.maximumf %104, %105 : vector<1x1024xf32>
    %107 = vector.broadcast %97 : vector<1x1024xf32> to vector<8x1024xf32>
    %108 = arith.subf %91, %107 : vector<8x1024xf32>
    %cst_46 = arith.constant 8.000000e-01 : f32
    %109 = vector.broadcast %cst_46 : f32 to vector<1x1024xf32>
    %110 = arith.addf %106, %109 : vector<1x1024xf32>
    %111 = math.rsqrt %110 : vector<1x1024xf32>
    %112 = vector.broadcast %111 : vector<1x1024xf32> to vector<8x1024xf32>
    %113 = arith.mulf %108, %112 : vector<8x1024xf32>
    %114 = vector.broadcast %92 : vector<1x1024xf32> to vector<8x1024xf32>
    %115 = arith.mulf %113, %114 : vector<8x1024xf32>
    %116 = vector.broadcast %93 : vector<1x1024xf32> to vector<8x1024xf32>
    %117 = arith.addf %115, %116 : vector<8x1024xf32>
    %cst_47 = arith.constant 0.000000e+00 : f32
    %118 = vector.broadcast %cst_47 : f32 to vector<8x1024xf32>
    %119 = arith.cmpf ogt, %117, %118 : vector<8x1024xf32>
    %cst_48 = arith.constant 2.000000e-01 : f32
    %120 = vector.broadcast %cst_48 : f32 to vector<8x1024xf32>
    %121 = arith.mulf %120, %117 : vector<8x1024xf32>
    %122 = arith.select %119, %117, %121 : vector<8x1024xi1>, vector<8x1024xf32>
    %c0_49 = arith.constant 0 : index
    %c0_50 = arith.constant 0 : index
    %123 = vector.load %arg8[%c0_49, %c0_50] : memref<1x128xf32, #tpu.memory_space<vmem>>, vector<1x128xf32>
    %124 = arith.truncf %122 : vector<8x1024xf32> to vector<8x1024xbf16>
    %c0_51 = arith.constant 0 : index
    %c0_52 = arith.constant 0 : index
    %125 = vector.load %arg7[%c0_51, %c0_52] : memref<1024x128xbf16, #tpu.memory_space<vmem>>, vector<1024x128xbf16>
    %cst_53 = arith.constant dense<0.000000e+00> : vector<8x128xf32>
    %126 = tpu.matmul %124, %125, %cst_53 {dimension_numbers = #tpu.dot_dimension_numbers<[1], [0], [0], [1], [0, 0, 1, 1], [], []>} : vector<8x1024xbf16>, vector<1024x128xbf16>, vector<8x128xf32> -> vector<8x128xf32>
    %127 = vector.broadcast %123 : vector<1x128xf32> to vector<8x128xf32>
    %128 = arith.addf %126, %127 : vector<8x128xf32>
    %129 = math.tanh %128 : vector<8x128xf32>
    %130 = arith.truncf %129 : vector<8x128xf32> to vector<8x128xbf16>
    %c0_54 = arith.constant 0 : index
    %c0_55 = arith.constant 0 : index
    %131 = vector.load %arg9[%c0_54, %c0_55] : memref<8x128xbf16, #tpu.memory_space<vmem>>, vector<8x128xbf16>
    tpu.vector_store %arg9[%c0_54, %c0_55], %130 {strides = array<i32>} : memref<8x128xbf16, #tpu.memory_space<vmem>>, vector<8x128xbf16>,
    return
  }
  func.func @transform_0(%arg0: i32) -> (i32, i32) {
    %c0_i32 = arith.constant 0 : i32
    %c0_i32_0 = arith.constant 0 : i32
    %c0_i32_1 = arith.constant 0 : i32
    return %c0_i32, %c0_i32_0 : i32, i32
  }
  func.func @transform_1(%arg0: i32) -> (i32, i32) {
    %c0_i32 = arith.constant 0 : i32
    %c0_i32_0 = arith.constant 0 : i32
    %c0_i32_1 = arith.constant 0 : i32
    return %c0_i32, %c0_i32_0 : i32, i32
  }
  func.func @transform_2(%arg0: i32) -> (i32, i32) {
    %c0_i32 = arith.constant 0 : i32
    %c0_i32_0 = arith.constant 0 : i32
    %c0_i32_1 = arith.constant 0 : i32
    return %c0_i32, %c0_i32_0 : i32, i32
  }
  func.func @transform_3(%arg0: i32) -> (i32, i32) {
    %c0_i32 = arith.constant 0 : i32
    %c0_i32_0 = arith.constant 0 : i32
    %c0_i32_1 = arith.constant 0 : i32
    return %c0_i32, %c0_i32_0 : i32, i32
  }
  func.func @transform_4(%arg0: i32) -> (i32, i32) {
    %c0_i32 = arith.constant 0 : i32
    %c0_i32_0 = arith.constant 0 : i32
    %c0_i32_1 = arith.constant 0 : i32
    return %c0_i32, %c0_i32_0 : i32, i32
  }
  func.func @transform_5(%arg0: i32) -> (i32, i32) {
    %c0_i32 = arith.constant 0 : i32
    %c0_i32_0 = arith.constant 0 : i32
    %c0_i32_1 = arith.constant 0 : i32
    return %c0_i32, %c0_i32_0 : i32, i32
  }
  func.func @transform_6(%arg0: i32) -> (i32, i32) {
    %c0_i32 = arith.constant 0 : i32
    %c0_i32_0 = arith.constant 0 : i32
    return %c0_i32, %arg0 : i32, i32
  }
  func.func @transform_7(%arg0: i32) -> (i32, i32) {
    %c0_i32 = arith.constant 0 : i32
    %c0_i32_0 = arith.constant 0 : i32
    return %c0_i32, %arg0 : i32, i32
  }
  func.func @transform_8(%arg0: i32) -> (i32, i32) {
    %c0_i32 = arith.constant 0 : i32
    %c0_i32_0 = arith.constant 0 : i32
    return %c0_i32, %arg0 : i32, i32
  }
}

</mosaic_0001>

<bundles_post_ra>
// kernel: generator_forward.1
= control target key start
LH: loop header
LB: loop body
LE: loop exit
PB: predicated region body
PF: predicated region fallthrough
CT: control target
= control target key end

     0   :  { %s7634_s0 = inlined_call_operand.hbm [shape: f32[8,32], index: 0, kind: input, shape index: {}]   ;;  %s7635_s1 = inlined_call_operand.hbm [shape: bf16[32,128], index: 1, kind: input, shape index: {}]   ;;  %s7636_s2 = inlined_call_operand.hbm [shape: bf16[128,256], index: 2, kind: input, shape index: {}]   ;;  %s7637_s3 = inlined_call_operand.hbm [shape: bf16[256,512], index: 3, kind: input, shape index: {}]   ;;  %s7638_s4 = inlined_call_operand.hbm [shape: bf16[512,1024], index: 4, kind: input, shape index: {}]   ;;  %s7639_s5 = inlined_call_operand.hbm [shape: f32[1,5504], index: 5, kind: input, shape index: {}]   ;;  %s7640_s6 = inlined_call_operand.hbm [shape: bf16[1024,896], index: 6, kind: input, shape index: {}]   ;;  %s7641_s7 = inlined_call_operand.hbm [shape: f32[1,896], index: 7, kind: input, shape index: {}]   ;;  %s7642_s8 = inlined_call_operand.vmem [shape: bf16[8,896], index: 8, kind: output, shape index: {}]  }
   0x1   :  { %7646 = sst [smem:[#allocation19_spill]] %s7634_s0 }
   0x2   :  { %7647 = sst [smem:[#allocation20_spill]] %s7635_s1 }
   0x3   :  { %7648 = sst [smem:[#allocation21_spill]] %s7636_s2 }
   0x4   :  { %7649 = sst [smem:[#allocation22_spill]] %s7637_s3 }
   0x5   :  { %7650 = sst [smem:[#allocation23_spill]] %s7640_s6 }
   0x6   :  { %13 = vsyncpa [#allocation3], 0 }
   0x7   :  { %14 = vsyncpa [#allocation5], 0 }
   0x8   :  { %15 = vsyncpa [#allocation8], 0 }
   0x9   :  { %16 = vsyncpa [#allocation11], 0  ;;  %s6980_s27 = smov 0   ;;  %s6982_s28 = smov 0  }
   0xa   :  { %s6984_s29 = smov 0   ;;  %s6986_s30 = smov 0  }
   0xb LB: > { %s7651_s0 = sld [smem:[#allocation19_spill]]  ;;  %s7004_s12 = sadd.s32 4294967295, %s6917_s30   ;;  %s6917_s30 = sphi %s6986_s30, %s7669_s30   ;;  %s6913_s29 = sphi %s6984_s29, %s7668_s29   ;;  %s6909_s28 = sphi %s6982_s28, %s7667_s28   ;;  %s6905_s27 = sphi %s6980_s27, %s7666_s27  }
   0xc   : > { %p4445_p0 = scmp.ge.s32.totalorder %s6917_s30, 1  ;;  %p169_p1 = scmp.eq.s32.totalorder %s7004_s12, 0 }
   0xd   : > { %p231_p2 = scmp.lt.s32.totalorder %s6917_s30, 8  ;;  %s6919_s14 = smov [#allocation2]  }
   0xe   : > { %s245_s15 = sshll.u32 %s6919_s14, 4  ;;  %s7653_s1 = sld [smem:[#allocation20_spill]]  ;;  %s246_s15 = int_to_ptr.vmem [resolvable:$true] %s245_s15 }
   0xf   : > { %p7009_p3 = pnand %p4445_p0, %p231_p2  ;;  %s6920_s20 = smov [#allocation4]  }
  0x10   : > { %s256_s21 = sshll.u32 %s6920_s20, 4  ;;  %s7643_s22 = smov 64   ;;  %s257_s21 = int_to_ptr.vmem [resolvable:$true] %s256_s21 }
  0x11   : > { %s243_s11 = sshll.u32 %s7651_s0, 4  ;;  %p6505_p4 = pneg %p7009_p3  ;;  %s244_s11 = int_to_ptr.hbm [resolvable:$true] %s243_s11 }
  0x12   : > { %s7644_s23 = smov 4   ;;  %s7655_s3 = sld [smem:[#allocation22_spill]] }
  0x13   : > { %p7020_p5 = pnand %p6505_p4, %p169_p1  ;;  %s6923_s9 = smov [#allocation7]  }
  0x14   : > { %s254_s18 = sshll.u32 %s7653_s1, 4  ;;  %s284_s10 = sshll.u32 %s6923_s9, 4  ;;  %s255_s18 = int_to_ptr.hbm [resolvable:$true] %s254_s18  ;;  %s285_s10 = int_to_ptr.vmem [resolvable:$true] %s284_s10 }
  0x15   : > { %6508 = dma.hbm_to_vmem [thread:$0]  (!%p7020_p5), %s244_s11, 128, %s246_s15, [#allocation3]  }
  0x16   : > { %6511 = dma.hbm_to_vmem [thread:$0]  (!%p7020_p5), %s255_s18, 256, %s257_s21, [#allocation5], %s7643_s22, %s7643_s22, %s7644_s23  }
  0x17   : > { %s6924_s11 = smov 256   ;;  %s6925_s14 = smov 16  }
  0x18   : > { %s282_s26 = sshll.u32 %s7655_s3, 4  ;;  %s7037_s15 = sadd.s32 1, %s6917_s30   ;;  %s283_s26 = int_to_ptr.hbm [resolvable:$true] %s282_s26 }
  0x19   : > { %6517 = dma.hbm_to_vmem [thread:$0]  (!%p7020_p5), %s283_s26, 8192, %s285_s10, [#allocation8], %s6924_s11, %s6924_s11, %s6925_s14  }
  0x1a   : > { %s152_s16 = ssub.s32 %s6917_s30, %s7037_s15  ;;  %s155_s17 = sadd.s32 1, %s6913_s29 }
  0x1b   : > { %p153_p6 = scmp.eq.s32.totalorder %s152_s16, 0  ;;  %p162_p7 = scmp.ne.s32.totalorder %s6913_s29, %s6909_s28 }
  0x1c   : > { %p163_p8 = scmp.eq.s32.totalorder %s6917_s30, 0  ;;  %p168_p9 = scmp.ne.s32.totalorder %s6909_s28, %s6905_s27 }
  0x1d   : > { %s7048_s18 = scalar_select %p153_p6, %s6913_s29, %s155_s17  }
  0x1e   : > { %p7050_p10 = por %p163_p8, %p162_p7  ;;  %p7056_p11 = por %p169_p1, %p168_p9 }
  0x1f   : > { %p6537_p12 = scmp.lt.s32.totalorder %s6917_s30, 7  ;;  %s324_s24 = sand.u32 1, %s6917_s30  }
  0x20   : > { %s7645_s25 = sand.u32 1, %s6913_s29   ;;  %s4454_s9 = sshll.u32 %s6917_s30, 2 }
  0x21   : > { %s4453_s26 = sshll.u32 %s7645_s25, 9  ;;  %s7658_s6 = sld [smem:[#allocation23_spill]] }
  0x22   : > { %s328_s16 = scalar_lea.vmem [#allocation12], %s4453_s26  ;;  %p7071_p13 = pnand %p6537_p12, %p7050_p10 }
  0x23   : > { %s335_s17 = sshll.u32 %s328_s16, 4  ;;  %s7660_s2 = sld [smem:[#allocation21_spill]]  ;;  %s336_s17 = int_to_ptr.vmem [resolvable:$true] %s335_s17 }
  0x24   : > { %s7078_s1 = scalar_lea.sflag [#allocation3], %s324_s24  ;;  %p6721_p2 = pneg %p7071_p13 }
  0x27   : > { %s332_s11 = scalar_lea.hbm %s7658_s6, %s4454_s9  ;;  %s6724_s0 = scalar_lea.hbm %s7658_s6, 3584 }
  0x28   : > { %s333_s14 = sshll.u32 %s332_s11, 4  ;;  %s334_s14 = int_to_ptr.hbm [resolvable:$true] %s333_s14 }
  0x29   : > { %s268_s25 = sshll.u32 %s7660_s2, 4  ;;  %s6717_s9 = sshra.s32 %s334_s14, 4  ;;  %s269_s25 = int_to_ptr.hbm [resolvable:$true] %s268_s25  ;;  %s6718_s9 = int_to_ptr.hbm [resolvable:$true] %s6717_s9 }
  0x2a   : > { %s6719_s26 = scalar_lea.hbm %s6718_s9, 512  ;;  %p6725_p7 = scmp.lt.s32.totalorder %s6718_s9, %s7658_s6 }
  0x2b   : > { %p6720_p0 = scmp.ne.s32.totalorder %s6718_s9, %s6719_s26  ;;  %p6726_p8 = scmp.lt.s32.totalorder %s6724_s0, %s6719_s26 }
  0x2d   : > { %p6722_p4 = pnand %p6721_p2, %p6720_p0  ;;  %p6727_p9 = por %p6726_p8, %p6725_p7 }
  0x2f   : > { %p6723_p6 = pneg %p6722_p4 }
  0x31   : > { %p6728_p10 = pnand %p6727_p9, %p6723_p6 }
  0x33   : > { %6731 = shalt.err (!%p6728_p10)
}
  0x34   : > { %s6926_s24 = smov 448   ;;  %s7661_s11 = smov 4  }
  0x35   : > { %s7662_s16 = smov 64   ;;  %s6927_s2 = smov [#allocation6]  }
  0x36   : > { %6527 = dma.hbm_to_vmem [thread:$0]  (!%p7071_p13), %s334_s14, 8192, %s336_s17, %s7078_s1, %s6926_s24, %s7662_s16, %s7661_s11  }
  0x37   : > { %s270_s20 = sshll.u32 %s6927_s2, 4  ;;  %s6928_s10 = smov 128   ;;  %s271_s20 = int_to_ptr.vmem [resolvable:$true] %s270_s20 }
  0x38   : > { %s6929_s23 = smov 8   ;;  %s296_s0 = sshll.u32 %s7638_s4, 4  ;;  %s297_s0 = int_to_ptr.hbm [resolvable:$true] %s296_s0 }
  0x39   : > { %6514 = dma.hbm_to_vmem [thread:$0]  (!%p7020_p5), %s269_s25, 2048, %s271_s20, [#allocation5], %s6928_s10, %s6928_s10, %s6929_s23  }
  0x3a   : > { %s6930_s27 = smov [#allocation9]   ;;  %s311_s2 = sshll.u32 %s7639_s5, 4  ;;  %s312_s2 = int_to_ptr.hbm [resolvable:$true] %s311_s2 }
  0x3b   : > { %s298_s3 = sshll.u32 %s6930_s27, 4  ;;  %s6931_s17 = smov 512   ;;  %s299_s3 = int_to_ptr.vmem [resolvable:$true] %s298_s3 }
  0x3c   : > { %s6932_s24 = smov 32   ;;  %s6933_s25 = smov [#allocation10]  }
  0x3d   : > { %6520 = dma.hbm_to_vmem [thread:$0]  (!%p7020_p5), %s297_s0, 32768, %s299_s3, [#allocation8], %s6931_s17, %s6931_s17, %s6932_s24  }
  0x3e   : > { %s313_s11 = sshll.u32 %s6933_s25, 4  ;;  %s351_s10 = scalar_lea.hbm %s7641_s7, %s6917_s30  ;;  %s314_s11 = int_to_ptr.vmem [resolvable:$true] %s313_s11 }
  0x3f   : > { %6523 = dma.hbm_to_vmem [thread:$0]  (!%p7020_p5), %s312_s2, 688, %s314_s11, [#allocation11]  }
  0x40   : > { %s353_s23 = sshll.u32 %s351_s10, 4  ;;  %s7663_s9 = sand.u32 1, %s6913_s29   ;;  %s354_s23 = int_to_ptr.hbm [resolvable:$true] %s353_s23 }
  0x41   : > { %s348_s26 = scalar_lea.vmem [#allocation13], %s7663_s9  ;;  %s6837_s27 = sshra.s32 %s354_s23, 4  ;;  %s6838_s27 = int_to_ptr.hbm [resolvable:$true] %s6837_s27 }
  0x42   : > { %s355_s6 = sshll.u32 %s348_s26, 4  ;;  %s6839_s3 = scalar_lea.hbm %s6838_s27, 1  ;;  %s356_s6 = int_to_ptr.vmem [resolvable:$true] %s355_s6 }
  0x43   : > { %p6840_p12 = scmp.ne.s32.totalorder %s6838_s27, %s6839_s3  ;;  %s6844_s30 = scalar_lea.hbm %s7641_s7, 7 }
  0x44   : > { %p6845_p5 = scmp.lt.s32.totalorder %s6838_s27, %s7641_s7  ;;  %p6846_p6 = scmp.lt.s32.totalorder %s6844_s30, %s6839_s3 }
  0x45   : > { %p6842_p0 = pnand %p6840_p12, %p6721_p2 }
  0x46   : > { %p6847_p7 = por %p6846_p6, %p6845_p5 }
  0x47   : > { %p6843_p4 = pneg %p6842_p0 }
  0x49   : > { %p6848_p8 = pnand %p6847_p7, %p6843_p4 }
  0x4b   : > { %6851 = shalt.err (!%p6848_p8)
}
  0x4c   : > { %6530 = dma.hbm_to_vmem [thread:$0]  (!%p7071_p13), %s354_s23, 16, %s356_s6, %s7078_s1  }
  0x4d   : > { %364 = sbr.rel (%p7009_p3) target bundleno = 1144 (0x478), region = 52 }
  0x52   : > { %6884 = dma.done.wait (%p169_p1), [#allocation3], 128  }
  0x53   : > { %6886 = vsyncadd (%p169_p1), [#allocation3], 4294967168 }
  0x54   : > { %6888 = dma.done.wait (%p169_p1), [#allocation5], 2304  }
  0x55   : > { %6890 = vsyncadd (%p169_p1), [#allocation5], 4294964992 }
  0x56   : > { %6892 = dma.done.wait (%p169_p1), [#allocation8], 40960  }
  0x57   : > { %6894 = vsyncadd (%p169_p1), [#allocation8], 4294926336 }
  0x58   : > { %6896 = dma.done.wait (%p169_p1), [#allocation11], 688  }
  0x59   : > { %6898 = vsyncadd (%p169_p1), [#allocation11], 4294966608  ;;  %s396_s1 = sand.u32 1, %s7004_s12   ;;  %s398_s13 = sand.u32 1, %s6909_s28  }
  0x5a   : > { %s4462_s22 = sshll.u32 %s398_s13, 9  ;;  %s397_s17 = scalar_lea.sflag [#allocation3], %s396_s1 }
  0x5b   : > { %s7148_s24 = scalar_lea.vmem [#allocation12], %s4462_s22 }
  0x5c   : > { %6900 = dma.done.wait (%p7056_p11), %s397_s17, 8208  }
  0x5d   : > { %6902 = vsyncadd (%p7056_p11), %s397_s17, 4294959088  ;;  %v6076_v0 = vld [vmem:[#allocation4 + $0x8] sm:$0xff]  ;;  %v6075_v1 = vld [vmem:[#allocation4] sm:$0xff]  ;;  %vm473_vm0 = vcmask 261120   ;;  %s7486_s21 = scalar_lea.vmem [#allocation13], %s398_s13  ;;  %p446_p1 = scmp.lt.s32.totalorder %s7004_s12, 6 }
  0x5e   : > { %v451_v2 = vld [vmem:[#allocation2] sm:$0xff]  ;;  %v4531_v3 = vld [vmem:[#allocation6 + $0x70] sm:$0xf]  ;;  %v6092_v4 = vld [vmem:[#allocation6 + $0x74] sm:$0xf0]  ;;  %483 = vmatpush.bf16.msra.mxu0 %v6076_v0 }
  0x5f   : > { %v6091_v5 = vld [vmem:[#allocation6 + $0x74] sm:$0xf]  ;;  %v4532_v6 = vor.u32 %v6092_v4, %v4531_v3  ;;  %v4533_v7 = vld [vmem:[#allocation6 + $0x78] sm:$0xf0]  ;;  %v4523_v8 = vld [vmem:[#allocation6 + $0x60] sm:$0xf]  ;;  %v453_v14 = vpack.c.bf16 %v451_v2, %v451_v2 }
  0x60   : > { %v6090_v9 = vld [vmem:[#allocation6 + $0x64] sm:$0xf0]  ;;  %v4536_v10 = vor.u32 %v6091_v5, %v4533_v7  ;;  %v6089_v11 = vld [vmem:[#allocation6 + $0x64] sm:$0xf]  ;;  %v4525_v12 = vld [vmem:[#allocation6 + $0x68] sm:$0xf0] }
  0x61   : > { %596 = vmatpush.bf16.msra.mxu1 %v4532_v6  ;;  %v4524_v13 = vor.u32 %v6090_v9, %v4523_v8  ;;  %v4528_v15 = vor.u32 %v6089_v11, %v4525_v12  ;;  %v4515_v16 = vld [vmem:[#allocation6 + $0x50] sm:$0xf]  ;;  %v6088_v17 = vld [vmem:[#allocation6 + $0x54] sm:$0xf0]  ;;  %v6087_v18 = vld [vmem:[#allocation6 + $0x54] sm:$0xf] }
  0x62   : > { %609 = vmatpush.bf16.msra.mxu2 %v4536_v10  ;;  %484 = vmatpush.bf16.msra.mxu0 %v6075_v1  ;;  %v4517_v19 = vld [vmem:[#allocation6 + $0x58] sm:$0xf0]  ;;  %v4516_v20 = vor.u32 %v6088_v17, %v4515_v16  ;;  %v4507_v22 = vld [vmem:[#allocation6 + $0x40] sm:$0xf]  ;;  %v6086_v23 = vld [vmem:[#allocation6 + $0x44] sm:$0xf0] }
  0x63   : > { %v4520_v21 = vor.u32 %v6087_v18, %v4517_v19  ;;  %v6085_v24 = vld [vmem:[#allocation6 + $0x44] sm:$0xf]  ;;  %v4509_v25 = vld [vmem:[#allocation6 + $0x48] sm:$0xf0]  ;;  %v4508_v26 = vor.u32 %v6086_v23, %v4507_v22  ;;  %v4499_v28 = vld [vmem:[#allocation6 + $0x30] sm:$0xf] }
  0x64   : > { %v4512_v27 = vor.u32 %v6085_v24, %v4509_v25  ;;  %v6084_v29 = vld [vmem:[#allocation6 + $0x34] sm:$0xf0]  ;;  %v6083_v30 = vld [vmem:[#allocation6 + $0x34] sm:$0xf]  ;;  %v4501_v31 = vld [vmem:[#allocation6 + $0x38] sm:$0xf0] }
  0x65   : > { %597 = vmatpush.bf16.msra.mxu1 %v4524_v13  ;;  %4472 = vmatmul.msk.bf16.vlgmr.msra.gmra.mxu0 %vm473_vm0, %v453_v14  ;;  %v4500_v32 = vor.u32 %v6084_v29, %v4499_v28  ;;  %v4504_v33 = vor.u32 %v6083_v30, %v4501_v31  ;;  %v4491_v34 = vld [vmem:[#allocation6 + $0x20] sm:$0xf]  ;;  %v6082_v35 = vld [vmem:[#allocation6 + $0x24] sm:$0xf0]  ;;  %v6081_v36 = vld [vmem:[#allocation6 + $0x24] sm:$0xf] }
  0x66   : > { %610 = vmatpush.bf16.msra.mxu2 %v4528_v15  ;;  %v4493_v37 = vld [vmem:[#allocation6 + $0x28] sm:$0xf0]  ;;  %v4492_v38 = vor.u32 %v6082_v35, %v4491_v34  ;;  %v4483_v40 = vld [vmem:[#allocation6 + $0x10] sm:$0xf]  ;;  %v6080_v41 = vld [vmem:[#allocation6 + $0x14] sm:$0xf0] }
  0x67   : > { %v4496_v39 = vor.u32 %v6081_v36, %v4493_v37  ;;  %v6079_v42 = vld [vmem:[#allocation6 + $0x14] sm:$0xf]  ;;  %v4484_v43 = vor.u32 %v6080_v41, %v4483_v40  ;;  %v4485_v44 = vld [vmem:[#allocation6 + $0x18] sm:$0xf0]  ;;  %v4475_v46 = vld [vmem:[#allocation6] sm:$0xf] }
  0x68   : > { %v4488_v45 = vor.u32 %v6079_v42, %v4485_v44  ;;  %v6078_v47 = vld [vmem:[#allocation6 + $0x4] sm:$0xf0]  ;;  %v6077_v48 = vld [vmem:[#allocation6 + $0x4] sm:$0xf]  ;;  %v4477_v50 = vld [vmem:[#allocation6 + $0x8] sm:$0xf0] }
  0x69   : > { %598 = vmatpush.bf16.msra.mxu1 %v4516_v20  ;;  %v4476_v49 = vor.u32 %v6078_v47, %v4475_v46  ;;  %v4480_v51 = vor.u32 %v6077_v48, %v4477_v50  ;;  %v6592_v52 = vld [vmem:[#allocation10] ss:$0 sm:$0xff]  ;;  %v6123_v60 = vld [vmem:[#allocation7 + $0xec] sm:$0xf0]  ;;  %v6121_v62 = vld [vmem:[#allocation7 + $0xe4] sm:$0xf] }
  0x6a   : > { %611 = vmatpush.bf16.msra.mxu2 %v4520_v21  ;;  %v4651_v59 = vld [vmem:[#allocation7 + $0xe0] sm:$0xf]  ;;  %v4653_v63 = vld [vmem:[#allocation7 + $0xf0] sm:$0xf0]  ;;  %v6119_v2 = vld [vmem:[#allocation7 + $0xcc] sm:$0xf0] }
  0x6b   : > { %v4652_v61 = vor.u32 %v6123_v60, %v4651_v59  ;;  %v4656_v0 = vor.u32 %v6121_v62, %v4653_v63  ;;  %v4635_v1 = vld [vmem:[#allocation7 + $0xc0] sm:$0xf]  ;;  %v6117_v3 = vld [vmem:[#allocation7 + $0xc4] sm:$0xf]  ;;  %v4637_v5 = vld [vmem:[#allocation7 + $0xd0] sm:$0xf0] }
  0x6c   : > { %v4636_v4 = vor.u32 %v6119_v2, %v4635_v1  ;;  %v4640_v6 = vor.u32 %v6117_v3, %v4637_v5  ;;  %v4779_v7 = vld [vmem:[#allocation7 + $0x1e0] sm:$0xf]  ;;  %v6155_v8 = vld [vmem:[#allocation7 + $0x1ec] sm:$0xf0]  ;;  %v6153_v9 = vld [vmem:[#allocation7 + $0x1e4] sm:$0xf] }
  0x6d   : > { %599 = vmatpush.bf16.msra.mxu1 %v4508_v26  ;;  %1109 = vmatpush.bf16.msra.mxu3 %v4652_v61  ;;  %v4780_v10 = vor.u32 %v6155_v8, %v4779_v7  ;;  %v4781_v11 = vld [vmem:[#allocation7 + $0x1f0] sm:$0xf0]  ;;  %v4619_v13 = vld [vmem:[#allocation7 + $0xa0] sm:$0xf]  ;;  %v6115_v14 = vld [vmem:[#allocation7 + $0xac] sm:$0xf0] }
  0x6e   : > { %612 = vmatpush.bf16.msra.mxu2 %v4512_v27  ;;  %v4784_v12 = vor.u32 %v6153_v9, %v4781_v11  ;;  %v6113_v15 = vld [vmem:[#allocation7 + $0xa4] sm:$0xf]  ;;  %v4620_v16 = vor.u32 %v6115_v14, %v4619_v13  ;;  %v4621_v17 = vld [vmem:[#allocation7 + $0xb0] sm:$0xf0]  ;;  %v6934_v18 = vmov 8.0   ;;  %s7671_s12 = smov (!%p446_p1, %s7004_s12), 6 }
  0x6f   : > { %1122 = vmatpush.bf16.msrb.mxu0 %v4780_v10  ;;  %6594 = vrcp.f32 %v6934_v18  ;;  %v4624_v19 = vor.u32 %v6113_v15, %v4621_v17  ;;  %v4763_v20 = vld [vmem:[#allocation7 + $0x1c0] sm:$0xf]  ;;  %v6151_v21 = vld [vmem:[#allocation7 + $0x1cc] sm:$0xf0]  ;;  %v6149_v22 = vld [vmem:[#allocation7 + $0x1c4] sm:$0xf] }
  0x70   : > { %v4764_v23 = vor.u32 %v6151_v21, %v4763_v20  ;;  %v4765_v24 = vld [vmem:[#allocation7 + $0x1d0] sm:$0xf0]  ;;  %v4603_v26 = vld [vmem:[#allocation7 + $0x80] sm:$0xf]  ;;  %v6111_v27 = vld [vmem:[#allocation7 + $0x8c] sm:$0xf0] }
  0x71   : > { %600 = vmatpush.bf16.msra.mxu1 %v4500_v32  ;;  %1110 = vmatpush.bf16.msra.mxu3 %v4636_v4  ;;  %v4768_v25 = vor.u32 %v6149_v22, %v4765_v24  ;;  %v6109_v28 = vld [vmem:[#allocation7 + $0x84] sm:$0xf]  ;;  %v4604_v29 = vor.u32 %v6111_v27, %v4603_v26  ;;  %v4605_v30 = vld [vmem:[#allocation7 + $0x90] sm:$0xf0]  ;;  %v4747_v32 = vld [vmem:[#allocation7 + $0x1a0] sm:$0xf] }
  0x72   : > { %613 = vmatpush.bf16.msra.mxu2 %v4504_v33  ;;  %v4608_v31 = vor.u32 %v6109_v28, %v4605_v30  ;;  %v6147_v33 = vld [vmem:[#allocation7 + $0x1ac] sm:$0xf0]  ;;  %v6145_v34 = vld [vmem:[#allocation7 + $0x1a4] sm:$0xf]  ;;  %v4749_v36 = vld [vmem:[#allocation7 + $0x1b0] sm:$0xf0] }
  0x73   : > { %1123 = vmatpush.bf16.msrb.mxu0 %v4764_v23  ;;  %v4748_v35 = vor.u32 %v6147_v33, %v4747_v32  ;;  %v6107_v40 = vld [vmem:[#allocation7 + $0x6c] sm:$0xf0]  ;;  %v6105_v41 = vld [vmem:[#allocation7 + $0x64] sm:$0xf]  ;;  %v7156_v42 = vld [vmem:[#allocation10 + $0x1] sm:$0x3] }
  0x74   : > { %v4589_v44 = vld [vmem:[#allocation7 + $0x70] sm:$0xf0]  ;;  %v4731_v46 = vld [vmem:[#allocation7 + $0x180] sm:$0xf]  ;;  %v6143_v47 = vld [vmem:[#allocation7 + $0x18c] sm:$0xf0] }
  0x75   : > { %601 = vmatpush.bf16.msra.mxu1 %v4492_v38  ;;  %1111 = vmatpush.bf16.msra.mxu3 %v4620_v16  ;;  %v7154_v37 = vpop.eup %6594  ;;  %v4752_v38 = vor.u32 %v6145_v34, %v4749_v36  ;;  %v6141_v48 = vld [vmem:[#allocation7 + $0x184] sm:$0xf]  ;;  %v4732_v50 = vor.u32 %v6143_v47, %v4731_v46  ;;  %v4715_v60 = vld [vmem:[#allocation7 + $0x160] sm:$0xf]  ;;  %v6139_v61 = vld [vmem:[#allocation7 + $0x16c] sm:$0xf0] }
  0x76   : > { %614 = vmatpush.bf16.msra.mxu2 %v4496_v39  ;;  %v4587_v39 = vld [vmem:[#allocation7 + $0x60] sm:$0xf]  ;;  %v6137_v62 = vld [vmem:[#allocation7 + $0x164] sm:$0xf]  ;;  %v4717_v1 = vld [vmem:[#allocation7 + $0x170] sm:$0xf0]  ;;  %vm641_vm2 = vweird.f32 %v7154_v37 }
  0x77   : > { %1124 = vmatpush.bf16.msrb.mxu0 %v4748_v35  ;;  %v4720_v3 = vor.u32 %v6137_v62, %v4717_v1  ;;  %v4555_v4 = vld [vmem:[#allocation7 + $0x20] sm:$0xf]  ;;  %v6099_v5 = vld [vmem:[#allocation7 + $0x2c] sm:$0xf0]  ;;  %v4557_v9 = vld [vmem:[#allocation7 + $0x30] sm:$0xf0] }
  0x78   : > { %v4556_v8 = vor.u32 %v6099_v5, %v4555_v4  ;;  %v4699_v11 = vld [vmem:[#allocation7 + $0x140] sm:$0xf]  ;;  %v6133_v13 = vld [vmem:[#allocation7 + $0x144] sm:$0xf]  ;;  %v513_v16 = vperm.slane %v7156_v42, 1  ;;  %s4463_s25 = sshll.u32 %s7671_s12, 2 }
  0x79   : > { %602 = vmatpush.bf16.msra.mxu1 %v4484_v43  ;;  %1112 = vmatpush.bf16.msra.mxu3 %v4604_v29  ;;  %v4588_v43 = vor.u32 %v6107_v40, %v4587_v39  ;;  %v4701_v18 = vld [vmem:[#allocation7 + $0x150] sm:$0xf0]  ;;  %v4539_v21 = vld [vmem:[#allocation7] sm:$0xf]  ;;  %v6095_v22 = vld [vmem:[#allocation7 + $0xc] sm:$0xf0]  ;;  %s449_s20 = scalar_lea.vmem %s7642_s8, %s4463_s25 }
  0x7a   : > { %615 = vmatpush.bf16.msra.mxu2 %v4488_v45  ;;  %v4592_v45 = vor.u32 %v6105_v41, %v4589_v44  ;;  %v4704_v20 = vor.u32 %v6133_v13, %v4701_v18  ;;  %v6093_v23 = vld [vmem:[#allocation7 + $0x4] sm:$0xf]  ;;  %v4540_v26 = vor.u32 %v6095_v22, %v4539_v21  ;;  %v4541_v27 = vld [vmem:[#allocation7 + $0x10] sm:$0xf0]  ;;  %v4659_v28 = vld [vmem:[#allocation7 + $0xe8] sm:$0xf] }
  0x7b   : > { %1125 = vmatpush.bf16.msrb.mxu0 %v4732_v50  ;;  %v4544_v30 = vor.u32 %v6093_v23, %v4541_v27  ;;  %v6122_v32 = vld [vmem:[#allocation7 + $0xec] sm:$0xf]  ;;  %v4661_v33 = vld [vmem:[#allocation7 + $0xf8] sm:$0xf0]  ;;  %v4683_v39 = vld [vmem:[#allocation7 + $0x120] sm:$0xf] }
  0x7c   : > { %v6131_v40 = vld [vmem:[#allocation7 + $0x12c] sm:$0xf0]  ;;  %v4685_v46 = vld [vmem:[#allocation7 + $0x130] sm:$0xf0]  ;;  %v6125_v62 = vld [vmem:[#allocation7 + $0x104] sm:$0xf] }
  0x7d   : > { %603 = vmatpush.bf16.msra.mxu1 %v4476_v49  ;;  %v637_v49 = vmul.f32 8.0, %v7154_v37  ;;  %1113 = vmatpush.bf16.msra.mxu3 %v4588_v43  ;;  %v4664_v43 = vor.u32 %v6122_v32, %v4661_v33  ;;  %v4684_v44 = vor.u32 %v6131_v40, %v4683_v39  ;;  %v4787_v4 = vld [vmem:[#allocation7 + $0x1e8] sm:$0xf]  ;;  %v6114_v21 = vld [vmem:[#allocation7 + $0xac] sm:$0xf] }
  0x7e   : > { %616 = vmatpush.bf16.msra.mxu2 %v4480_v51  ;;  %v4733_v51 = vld [vmem:[#allocation7 + $0x190] sm:$0xf0]  ;;  %v4629_v22 = vld [vmem:[#allocation7 + $0xb8] sm:$0xf0]  ;;  %v4771_v23 = vld [vmem:[#allocation7 + $0x1c8] sm:$0xf] }
  0x7f   : > { %v638_v63 = vsub.f32 1.0, %v637_v49  ;;  %v6152_v27 = vld [vmem:[#allocation7 + $0x1d4] sm:$0xf0]  ;;  %v4773_v32 = vld [vmem:[#allocation7 + $0x1d8] sm:$0xf0] }
  0x80   : > { %v4611_v33 = vld [vmem:[#allocation7 + $0x88] sm:$0xf]  ;;  %v6112_v39 = vld [vmem:[#allocation7 + $0x94] sm:$0xf0]  ;;  %v6110_v40 = vld [vmem:[#allocation7 + $0x8c] sm:$0xf] }
  0x81   : > { %1135 = vmatpush.bf16.msrb.mxu1 %v4656_v0  ;;  %v4716_v0 = vor.u32 %v6139_v61, %v4715_v60  ;;  %v6127_v61 = vld [vmem:[#allocation7 + $0x10c] sm:$0xf0] }
  0x82   : > { %1148 = vmatpush.bf16.msrb.mxu2 %v4784_v12  ;;  %v6135_v12 = vld [vmem:[#allocation7 + $0x14c] sm:$0xf0] }
  0x83   : > { %1126 = vmatpush.bf16.msrb.mxu0 %v4716_v0  ;;  %v4700_v17 = vor.u32 %v6135_v12, %v4699_v11  ;;  %v6154_v11 = vld [vmem:[#allocation7 + $0x1ec] sm:$0xf] }
  0x85   : > { %1136 = vmatpush.bf16.msrb.mxu1 %v4640_v6  ;;  %v6097_v6 = vld [vmem:[#allocation7 + $0x24] sm:$0xf] }
  0x86   : > { %1149 = vmatpush.bf16.msrb.mxu2 %v4768_v25  ;;  %v4560_v10 = vor.u32 %v6097_v6, %v4557_v9 }
  0x87   : > { %1127 = vmatpush.bf16.msrb.mxu0 %v4700_v17 }
  0x89   : > { %1137 = vmatpush.bf16.msrb.mxu1 %v4624_v19  ;;  %v639_v19 = vmul.f32 %v7154_v37, %v638_v63 }
  0x8a   : > { %1150 = vmatpush.bf16.msrb.mxu2 %v4752_v38 }
  0x8b   : > { %v640_v41 = vadd.f32 %v7154_v37, %v639_v19  ;;  %1128 = vmatpush.bf16.msrb.mxu0 %v4684_v44  ;;  %v4613_v44 = vld [vmem:[#allocation7 + $0x98] sm:$0xf0] }
  0x8d   : > { %1138 = vmatpush.bf16.msrb.mxu1 %v4608_v31  ;;  %v6124_v31 = vld [vmem:[#allocation7 + $0xf4] sm:$0xf0]  ;;  %v7179_v63 = vsel %vm641_vm2, %v7154_v37, %v640_v41  ;;  %v4789_v37 = vld [vmem:[#allocation7 + $0x1f8] sm:$0xf0] }
  0x8e   : > { %v4660_v38 = vor.u32 %v6124_v31, %v4659_v28  ;;  %v6150_v28 = vld [vmem:[#allocation7 + $0x1cc] sm:$0xf] }
  0x91   : > { %1139 = vmatpush.bf16.msrb.mxu1 %v4592_v45  ;;  %v6129_v45 = vld [vmem:[#allocation7 + $0x124] sm:$0xf] }
  0xe2   : > { %v486_v53 = vpop.f32.mrf.mxu0 }
  0xe3   : > { %v487_v54 = vadd.f32 %v6592_v52, %v486_v53  ;;  %v4736_v52 = vor.u32 %v6141_v48, %v4733_v51  ;;  %v4571_v53 = vld [vmem:[#allocation7 + $0x40] sm:$0xf]  ;;  %v4643_v51 = vld [vmem:[#allocation7 + $0xc8] sm:$0xf] }
  0xe5   : > { %v491_v55 = vmul.f32 0.2, %v487_v54  ;;  %vm490_vm1 = vcmp.gt.f32.partialorder %v487_v54, 0.0  ;;  %1151 = vmatpush.bf16.msrb.mxu2 %v4736_v52  ;;  %v6120_v52 = vld [vmem:[#allocation7 + $0xd4] sm:$0xf0] }
  0xe7   : > { %v492_v56 = vsel %vm490_vm1, %v487_v54, %v491_v55  ;;  %v6103_v54 = vld [vmem:[#allocation7 + $0x4c] sm:$0xf0]  ;;  %v6101_v55 = vld [vmem:[#allocation7 + $0x44] sm:$0xf] }
  0xe8   : > { %v494_v57 = vpack.c.bf16 %v492_v56, %v492_v56  ;;  %v512_v56 = vperm.slane %v7156_v42, 0 }
  0xe9   : > { %1152 = vmatpush.bf16.msrb.mxu2 %v4720_v3  ;;  %v4669_v3 = vld [vmem:[#allocation7 + $0x110] sm:$0xf0] }
  0xea   : > { %v488_v58 = vpop.f32.mrf.mxu0  ;;  %604 = vmatmul.bf16.vlgmr.msra.gmra.mxu1 %v494_v57  ;;  %617 = vmatmul.bf16.vlgmr.msra.gmra.mxu2 %v494_v57  ;;  %v4572_v57 = vor.u32 %v6103_v54, %v4571_v53  ;;  %v4688_v53 = vor.u32 %v6129_v45, %v4685_v46  ;;  %v4644_v54 = vor.u32 %v6120_v52, %v4643_v51  ;;  %v4755_v45 = vld [vmem:[#allocation7 + $0x1a8] sm:$0xf]  ;;  %v6148_v46 = vld [vmem:[#allocation7 + $0x1b4] sm:$0xf0]  ;;  %v4757_v51 = vld [vmem:[#allocation7 + $0x1b8] sm:$0xf0] }
  0xeb   : > { %v4573_v58 = vld [vmem:[#allocation7 + $0x50] sm:$0xf0]  ;;  %v4672_v9 = vor.u32 %v6125_v62, %v4669_v3  ;;  %v4597_v62 = vld [vmem:[#allocation7 + $0x78] sm:$0xf0]  ;;  %v6144_v3 = vld [vmem:[#allocation7 + $0x194] sm:$0xf0] }
  0xec   : > { %v4576_v59 = vor.u32 %v6101_v55, %v4573_v58  ;;  %1114 = vmatpush.bf16.msra.mxu3 %v4572_v57  ;;  %v6118_v55 = vld [vmem:[#allocation7 + $0xcc] sm:$0xf]  ;;  %v4667_v57 = vld [vmem:[#allocation7 + $0x100] sm:$0xf] }
  0xed   : > { %1153 = vmatpush.bf16.msrb.mxu2 %v4704_v20  ;;  %v4792_v20 = vor.u32 %v6154_v11, %v4789_v37  ;;  %v6102_v11 = vld [vmem:[#allocation7 + $0x4c] sm:$0xf] }
  0xee   : > { %1140 = vmatpush.bf16.msrb.mxu1 %v4576_v59 }
  0xf0   : > { %1115 = vmatpush.bf16.msra.mxu3 %v4556_v8 }
  0xf1   : > { %1154 = vmatpush.bf16.msrb.mxu2 %v4688_v53 }
  0xf2   : > { %1141 = vmatpush.bf16.msrb.mxu1 %v4560_v10  ;;  %v6156_v10 = vld [vmem:[#allocation7 + $0x1f4] sm:$0xf0] }
  0xf4   : > { %1116 = vmatpush.bf16.msra.mxu3 %v4540_v26  ;;  %v4632_v26 = vor.u32 %v6114_v21, %v4629_v22  ;;  %v4725_v21 = vld [vmem:[#allocation7 + $0x178] sm:$0xf0] }
  0xf5   : > { %1155 = vmatpush.bf16.msrb.mxu2 %v4672_v9  ;;  %v4579_v9 = vld [vmem:[#allocation7 + $0x48] sm:$0xf] }
  0xf6   : > { %1142 = vmatpush.bf16.msrb.mxu1 %v4544_v30 }
  0xf8   : > { %1161 = vmatpush.bf16.msrb.mxu3 %v4660_v38  ;;  %v4776_v38 = vor.u32 %v6150_v28, %v4773_v32  ;;  %v4565_v28 = vld [vmem:[#allocation7 + $0x38] sm:$0xf0]  ;;  %v6136_v32 = vld [vmem:[#allocation7 + $0x154] sm:$0xf0] }
  0xf9   : > { %1200 = vmatpush.bf16.msra.mxu2 %v4792_v20 }
  0xfa   : > { %1187 = vmatpush.bf16.msra.mxu1 %v4664_v43  ;;  %v4612_v43 = vor.u32 %v6112_v39, %v4611_v33  ;;  %v6134_v33 = vld [vmem:[#allocation7 + $0x14c] sm:$0xf]  ;;  %v6096_v39 = vld [vmem:[#allocation7 + $0x14] sm:$0xf0] }
  0xfc   : > { %1162 = vmatpush.bf16.msrb.mxu3 %v4644_v54 }
  0xfd   : > { %1201 = vmatpush.bf16.msra.mxu2 %v4776_v38  ;;  %v4547_v38 = vld [vmem:[#allocation7 + $0x8] sm:$0xf] }
 0x167   : > { %v605_v2 = vpop.f32.mrf.mxu1 }
 0x168   : > { %v7160_v7 = vadd.f32 %v605_v2, %v512_v56  ;;  %v4645_v56 = vld [vmem:[#allocation7 + $0xd8] sm:$0xf0]  ;;  %v4668_v2 = vor.u32 %v6127_v61, %v4667_v57  ;;  %v6108_v57 = vld [vmem:[#allocation7 + $0x74] sm:$0xf0] }
 0x169   : > { %v4648_v1 = vor.u32 %v6118_v55, %v4645_v56  ;;  %v4595_v55 = vld [vmem:[#allocation7 + $0x68] sm:$0xf] }
 0x16a   : > { %v624_v14 = vrot.slane %v7160_v7, 4  ;;  %v645_v15 = vmul.f32 %v7160_v7, %v7160_v7  ;;  %1129 = vmatpush.bf16.msrb.mxu0 %v4668_v2  ;;  %v4596_v61 = vor.u32 %v6108_v57, %v4595_v55 }
 0x16b   : > { %1188 = vmatpush.bf16.msra.mxu1 %v4648_v1 }
 0x16c   : > { %v625_v24 = vadd.f32 %v624_v14, %v7160_v7  ;;  %v647_v25 = vrot.slane %v645_v15, 4  ;;  %v4788_v14 = vor.u32 %v6156_v10, %v4787_v4  ;;  %v6142_v4 = vld [vmem:[#allocation7 + $0x18c] sm:$0xf]  ;;  %v6104_v10 = vld [vmem:[#allocation7 + $0x54] sm:$0xf0] }
 0x16d   : > { %v618_v29 = vpop.f32.mrf.mxu2 }
 0x16e   : > { %v626_v34 = vrot.slane %v625_v24, 2  ;;  %v648_v35 = vadd.f32 %v647_v25, %v645_v15  ;;  %v7168_v36 = vadd.f32 %v618_v29, %v513_v16  ;;  %v4627_v15 = vld [vmem:[#allocation7 + $0xa8] sm:$0xf]  ;;  %v6116_v16 = vld [vmem:[#allocation7 + $0xb4] sm:$0xf0]  ;;  %1174 = vmatpush.bf16.msra.mxu0 %v4788_v14 }
 0x16f   : > { %v607_v42 = vpop.f32.mrf.mxu1  ;;  %v4628_v25 = vor.u32 %v6116_v16, %v4627_v15  ;;  %1189 = vmatpush.bf16.msra.mxu1 %v4632_v26  ;;  %v4581_v14 = vld [vmem:[#allocation7 + $0x58] sm:$0xf0]  ;;  %v4723_v15 = vld [vmem:[#allocation7 + $0x168] sm:$0xf]  ;;  %v6140_v16 = vld [vmem:[#allocation7 + $0x174] sm:$0xf0] }
 0x170   : > { %v627_v47 = vadd.f32 %v626_v34, %v625_v24  ;;  %v649_v48 = vrot.slane %v648_v35, 2  ;;  %v630_v49 = vrot.slane %v7168_v36, 4  ;;  %v646_v50 = vmul.f32 %v7168_v36, %v7168_v36 }
 0x171   : > { %1163 = vmatpush.bf16.msrb.mxu3 %v4628_v25  ;;  %v4584_v37 = vor.u32 %v6102_v11, %v4581_v14  ;;  %v4724_v20 = vor.u32 %v6140_v16, %v4723_v15  ;;  %v6098_v25 = vld [vmem:[#allocation7 + $0x2c] sm:$0xf] }
 0x172   : > { %v628_v58 = vrot.slane %v627_v47, 1  ;;  %v650_v59 = vadd.f32 %v649_v48, %v648_v35  ;;  %v631_v60 = vadd.f32 %v630_v49, %v7168_v36  ;;  %v653_v0 = vrot.slane %v646_v50, 4 }
 0x173   : > { %v4772_v35 = vor.u32 %v6152_v27, %v4771_v23  ;;  %v4616_v48 = vor.u32 %v6110_v40, %v4613_v44  ;;  %v4756_v49 = vor.u32 %v6148_v46, %v4755_v45  ;;  %v4563_v23 = vld [vmem:[#allocation7 + $0x28] sm:$0xf]  ;;  %v6094_v40 = vld [vmem:[#allocation7 + $0xc] sm:$0xf]  ;;  %v4548_v46 = vor.u32 %v6096_v39, %v4547_v38  ;;  %v5243_v38 = vld [vmem:[#allocation9 + $0x380] sm:$0xf] }
 0x174   : > { %v629_v5 = vadd.f32 %v628_v58, %v627_v47  ;;  %v651_v6 = vrot.slane %v650_v59, 1  ;;  %v632_v8 = vrot.slane %v631_v60, 2  ;;  %v654_v12 = vadd.f32 %v653_v0, %v646_v50  ;;  %v6146_v50 = vld [vmem:[#allocation7 + $0x1ac] sm:$0xf]  ;;  %v4739_v0 = vld [vmem:[#allocation7 + $0x188] sm:$0xf] }
 0x175   : > { %v620_v13 = vpop.f32.mrf.mxu2  ;;  %1175 = vmatpush.bf16.msra.mxu0 %v4772_v35  ;;  %v4760_v54 = vor.u32 %v6146_v50, %v4757_v51  ;;  %1164 = vmatpush.bf16.msrb.mxu3 %v4612_v43  ;;  %v6106_v58 = vld [vmem:[#allocation7 + $0x6c] sm:$0xf]  ;;  %v4549_v43 = vld [vmem:[#allocation7 + $0x18] sm:$0xf0]  ;;  %v4691_v44 = vld [vmem:[#allocation7 + $0x128] sm:$0xf] }
 0x176   : > { %v7182_v17 = vmul.f32 %v7179_v63, %v629_v5  ;;  %v652_v18 = vadd.f32 %v651_v6, %v650_v59  ;;  %v633_v19 = vadd.f32 %v632_v8, %v631_v60  ;;  %v655_v24 = vrot.slane %v654_v12, 2  ;;  %1190 = vmatpush.bf16.msra.mxu1 %v4616_v48  ;;  %v4741_v5 = vld [vmem:[#allocation7 + $0x198] sm:$0xf0]  ;;  %v6132_v48 = vld [vmem:[#allocation7 + $0x134] sm:$0xf0] }
 0x177   : > { %v4600_v2 = vor.u32 %v6106_v58, %v4597_v62  ;;  %1202 = vmatpush.bf16.msra.mxu2 %v4760_v54  ;;  %v4740_v6 = vor.u32 %v6144_v3, %v4739_v0  ;;  %v4744_v8 = vor.u32 %v6142_v4, %v4741_v5  ;;  %v4580_v13 = vor.u32 %v6104_v10, %v4579_v9  ;;  %v4693_v50 = vld [vmem:[#allocation7 + $0x138] sm:$0xf0]  ;;  %v622_v54 = vld [vmem:[#allocation10 + $0xf] sm:$0x3]  ;;  %v4675_v58 = vld [vmem:[#allocation7 + $0x108] sm:$0xf] }
 0x178   : > { %v659_v29 = vmul.f32 %v652_v18, %v7179_v63  ;;  %v661_v30 = vmul.f32 %v7182_v17, %v7182_v17  ;;  %v634_v31 = vrot.slane %v633_v19, 1  ;;  %v656_v34 = vadd.f32 %v655_v24, %v654_v12  ;;  %v6138_v18 = vld [vmem:[#allocation7 + $0x16c] sm:$0xf]  ;;  %v6100_v24 = vld [vmem:[#allocation7 + $0x34] sm:$0xf0] }
 0x179   : > { %1176 = vmatpush.bf16.msra.mxu0 %v4756_v49  ;;  %1165 = vmatpush.bf16.msrb.mxu3 %v4596_v61  ;;  %v4728_v22 = vor.u32 %v6138_v18, %v4725_v21  ;;  %v4564_v27 = vor.u32 %v6100_v24, %v4563_v23  ;;  %v6130_v49 = vld [vmem:[#allocation7 + $0x12c] sm:$0xf]  ;;  %v4677_v0 = vld [vmem:[#allocation7 + $0x118] sm:$0xf0]  ;;  %v667_v4 = vsub.f32 %v7160_v7, %v7182_v17  ;;  %v694_v5 = vperm.slane %v622_v54, 0 }
 0x17a   : > { %v663_v41 = vsub.f32 %v659_v29, %v661_v30  ;;  %v635_v42 = vadd.f32 %v634_v31, %v633_v19  ;;  %v657_v47 = vrot.slane %v656_v34, 1  ;;  %1191 = vmatpush.bf16.msra.mxu1 %v4600_v2  ;;  %v4707_v29 = vld [vmem:[#allocation7 + $0x148] sm:$0xf]  ;;  %v4568_v31 = vor.u32 %v6098_v25, %v4565_v28  ;;  %v6126_v62 = vld [vmem:[#allocation7 + $0x10c] sm:$0xf] }
 0x17b   : > { %1203 = vmatpush.bf16.msra.mxu2 %v4744_v8  ;;  %v4696_v55 = vor.u32 %v6130_v49, %v4693_v50  ;;  %v623_v2 = vld [vmem:[#allocation10 + $0x11] sm:$0x3]  ;;  %v4680_v8 = vor.u32 %v6126_v62, %v4677_v0  ;;  %v695_v17 = vperm.slane %v622_v54, 1  ;;  %v4987_v28 = vld [vmem:[#allocation9 + $0x180] sm:$0xf] }
 0x17c   : > { %v665_v52 = vmax.f32 %v663_v41, 0.0  ;;  %v7188_v53 = vmul.f32 %v7179_v63, %v635_v42  ;;  %v658_v56 = vadd.f32 %v657_v47, %v656_v34  ;;  %v4709_v34 = vld [vmem:[#allocation7 + $0x158] sm:$0xf0]  ;;  %v4708_v41 = vor.u32 %v6136_v32, %v4707_v29  ;;  %v6209_v29 = vld [vmem:[#allocation9 + $0x19c] sm:$0xf0] }
 0x17d   : > { %1177 = vmatpush.bf16.msra.mxu0 %v4740_v6  ;;  %1166 = vmatpush.bf16.msrb.mxu3 %v4580_v13  ;;  %v4712_v42 = vor.u32 %v6134_v33, %v4709_v34  ;;  %v4552_v47 = vor.u32 %v6094_v40, %v4549_v43  ;;  %v6281_v32 = vld [vmem:[#allocation9 + $0x3dc] sm:$0xf0] }
 0x17e   : > { %v7190_v59 = vadd.f32 0.8, %v665_v52  ;;  %v662_v60 = vmul.f32 %v7188_v53, %v7188_v53  ;;  %v660_v1 = vmul.f32 %v658_v56, %v7179_v63  ;;  %1192 = vmatpush.bf16.msra.mxu1 %v4584_v37  ;;  %v4692_v52 = vor.u32 %v6132_v48, %v4691_v44  ;;  %v4955_v34 = vld [vmem:[#allocation9 + $0x140] sm:$0xf] }
 0x17f   : > { %1204 = vmatpush.bf16.msra.mxu2 %v4728_v22  ;;  %v668_v7 = vsub.f32 %v7168_v36, %v7188_v53  ;;  %v5019_v36 = vld [vmem:[#allocation9 + $0x1c0] sm:$0xf] }
 0x180   : > { %6596 = vrsqrt.f32 %v7190_v59  ;;  %v664_v12 = vsub.f32 %v660_v1, %v662_v60  ;;  %v6128_v60 = vld [vmem:[#allocation7 + $0x114] sm:$0xf0]  ;;  %vm677_vm4 = vweird.f32 %v7190_v59  ;;  %v6217_v53 = vld [vmem:[#allocation9 + $0x1dc] sm:$0xf0] }
 0x181   : > { %1178 = vmatpush.bf16.msra.mxu0 %v4724_v20  ;;  %1167 = vmatpush.bf16.msrb.mxu3 %v4564_v27  ;;  %v4676_v3 = vor.u32 %v6128_v60, %v4675_v58  ;;  %v5020_v27 = vor.u32 %v6217_v53, %v5019_v36  ;;  %v6273_v40 = vld [vmem:[#allocation9 + $0x39c] sm:$0xf0] }
 0x182   : > { %v666_v19 = vmax.f32 %v664_v12, 0.0  ;;  %1193 = vmatpush.bf16.msra.mxu1 %v4568_v31  ;;  %v701_v12 = vperm.slane %v623_v2, 0  ;;  %v4988_v31 = vor.u32 %v6209_v29, %v4987_v28  ;;  %v6193_v43 = vld [vmem:[#allocation9 + $0x11c] sm:$0xf0]  ;;  %v6213_v29 = vld [vmem:[#allocation9 + $0x1c4] sm:$0xf] }
 0x183   : > { %1205 = vmatpush.bf16.msra.mxu2 %v4712_v42  ;;  %v4923_v42 = vld [vmem:[#allocation9 + $0x100] sm:$0xf] }
 0x184   : > { %v7196_v26 = vadd.f32 0.8, %v666_v19  ;;  %v702_v19 = vperm.slane %v623_v2, 1  ;;  %v5211_v44 = vld [vmem:[#allocation9 + $0x340] sm:$0xf] }
 0x185   : > { %1179 = vmatpush.bf16.msra.mxu0 %v4708_v41  ;;  %1168 = vmatpush.bf16.msrb.mxu3 %v4548_v46  ;;  %v5244_v41 = vor.u32 %v6273_v40, %v5243_v38  ;;  %v6265_v46 = vld [vmem:[#allocation9 + $0x35c] sm:$0xf0] }
 0x186   : > { %v6597_v30 = vpop.eup %6596  ;;  %6598 = vrsqrt.f32 %v7196_v26  ;;  %1194 = vmatpush.bf16.msra.mxu1 %v4552_v47  ;;  %vm687_vm7 = vweird.f32 %v7196_v26  ;;  %v5212_v47 = vor.u32 %v6265_v46, %v5211_v44  ;;  %v4891_v48 = vld [vmem:[#allocation9 + $0xc0] sm:$0xf]  ;;  %v4989_v46 = vld [vmem:[#allocation9 + $0x1a0] sm:$0xf0] }
 0x187   : > { %v672_v35 = vmul.f32 %v6597_v30, %v7190_v59  ;;  %vm678_vm3 = vweird.f32 %v6597_v30  ;;  %1206 = vmatpush.bf16.msra.mxu2 %v4696_v55  ;;  %v6185_v49 = vld [vmem:[#allocation9 + $0xdc] sm:$0xf0] }
 0x188   : > { %vm679_vm5 = vmor %vm677_vm4, %vm678_vm3  ;;  %v5179_v50 = vld [vmem:[#allocation9 + $0x300] sm:$0xf] }
 0x189   : > { %v673_v45 = vmul.f32 %v6597_v30, %v672_v35  ;;  %1180 = vmatpush.bf16.msra.mxu0 %v4692_v52  ;;  %v6201_v35 = vld [vmem:[#allocation9 + $0x15c] sm:$0xf0] }
 0x18a   : > { %v4956_v39 = vor.u32 %v6201_v35, %v4955_v34  ;;  %v6257_v52 = vld [vmem:[#allocation9 + $0x31c] sm:$0xf0] }
 0x18b   : > { %v674_v51 = vmul.f32 0.5, %v673_v45  ;;  %1207 = vmatpush.bf16.msra.mxu2 %v4680_v8  ;;  %v4924_v45 = vor.u32 %v6193_v43, %v4923_v42  ;;  %v5531_v54 = vld [vmem:[#allocation9 + $0x5c0] sm:$0xf] }
 0x18c   : > { %v6599_v56 = vpop.eup %6598  ;;  %v6345_v55 = vld [vmem:[#allocation9 + $0x5dc] sm:$0xf0] }
 0x18d   : > { %v675_v57 = vsub.f32 1.5, %v674_v51  ;;  %v682_v61 = vmul.f32 %v6599_v56, %v7196_v26  ;;  %1181 = vmatpush.bf16.msra.mxu0 %v4676_v3  ;;  %vm688_vm6 = vweird.f32 %v6599_v56  ;;  %v4892_v51 = vor.u32 %v6185_v49, %v4891_v48  ;;  %v4859_v58 = vld [vmem:[#allocation9 + $0x80] sm:$0xf]  ;;  %v5277_v49 = vld [vmem:[#allocation9 + $0x3e0] sm:$0xf0] }
 0x18e   : > { %vm689_vm8 = vmor %vm687_vm7, %vm688_vm6  ;;  %v6177_v60 = vld [vmem:[#allocation9 + $0x9c] sm:$0xf0] }
 0x18f   : > { %v676_v1 = vmul.f32 %v6597_v30, %v675_v57  ;;  %v683_v6 = vmul.f32 %v6599_v56, %v682_v61  ;;  %v5532_v57 = vor.u32 %v6345_v55, %v5531_v54  ;;  %v4860_v61 = vor.u32 %v6177_v60, %v4859_v58  ;;  %v5147_v62 = vld [vmem:[#allocation9 + $0x2c0] sm:$0xf] }
 0x190   : > { %v6249_v0 = vld [vmem:[#allocation9 + $0x2dc] sm:$0xf0] }
 0x191   : > { %v680_v9 = vsel %vm679_vm5, %v6597_v30, %v676_v1  ;;  %v684_v11 = vmul.f32 0.5, %v683_v6  ;;  %v5275_v30 = vld [vmem:[#allocation9 + $0x3c0] sm:$0xf]  ;;  %v5148_v2 = vor.u32 %v6249_v0, %v5147_v62  ;;  %v4957_v62 = vld [vmem:[#allocation9 + $0x160] sm:$0xf0] }
 0x192   : > { %v691_v10 = vmul.f32 %v680_v9, %v667_v4  ;;  %v5276_v33 = vor.u32 %v6281_v32, %v5275_v30  ;;  %v5499_v1 = vld [vmem:[#allocation9 + $0x580] sm:$0xf]  ;;  %v5021_v32 = vld [vmem:[#allocation9 + $0x1e0] sm:$0xf0] }
 0x193   : > { %v685_v14 = vsub.f32 1.5, %v684_v11  ;;  %v6337_v3 = vld [vmem:[#allocation9 + $0x59c] sm:$0xf0] }
 0x194   : > { %v698_v13 = vmul.f32 %v694_v5, %v691_v10  ;;  %v5787_v4 = vld [vmem:[#allocation9 + $0x7c0] sm:$0xf]  ;;  %v5500_v6 = vor.u32 %v6337_v3, %v5499_v1 }
 0x195   : > { %v686_v59 = vmul.f32 %v6599_v56, %v685_v14  ;;  %v6409_v5 = vld [vmem:[#allocation9 + $0x7dc] sm:$0xf0] }
 0x196   : > { %v705_v37 = vadd.f32 %v701_v12, %v698_v13  ;;  %v5788_v8 = vor.u32 %v6409_v5, %v5787_v4  ;;  %v4827_v9 = vld [vmem:[#allocation9 + $0x40] sm:$0xf]  ;;  %v6269_v4 = vld [vmem:[#allocation9 + $0x384] sm:$0xf] }
 0x197   : > { %v690_v15 = vsel %vm689_vm8, %v6599_v56, %v686_v59  ;;  %v5180_v56 = vor.u32 %v6257_v52, %v5179_v50  ;;  %v6169_v10 = vld [vmem:[#allocation9 + $0x5c] sm:$0xf0]  ;;  %v5245_v5 = vld [vmem:[#allocation9 + $0x3a0] sm:$0xf0] }
 0x198   : > { %vm707_vm9 = vcmp.gt.f32.partialorder %v705_v37, 0.0  ;;  %v709_v16 = vmul.f32 0.2, %v705_v37  ;;  %v692_v18 = vmul.f32 %v690_v15, %v668_v7  ;;  %v5115_v11 = vld [vmem:[#allocation9 + $0x280] sm:$0xf]  ;;  %v4828_v12 = vor.u32 %v6169_v10, %v4827_v9 }
 0x199   : > { %v6241_v13 = vld [vmem:[#allocation9 + $0x29c] sm:$0xf0] }
 0x19a   : > { %v711_v20 = vsel %vm707_vm9, %v705_v37, %v709_v16  ;;  %v699_v21 = vmul.f32 %v695_v17, %v692_v18  ;;  %v5467_v14 = vld [vmem:[#allocation9 + $0x540] sm:$0xf]  ;;  %v5116_v37 = vor.u32 %v6241_v13, %v5115_v11 }
 0x19b   : > { %v714_v22 = vpack.c.bf16 %v711_v20, %v711_v20  ;;  %v6329_v59 = vld [vmem:[#allocation9 + $0x55c] sm:$0xf0] }
 0x19c   : > { %v706_v23 = vadd.f32 %v702_v19, %v699_v21  ;;  %v5468_v7 = vor.u32 %v6329_v59, %v5467_v14  ;;  %v5755_v17 = vld [vmem:[#allocation9 + $0x780] sm:$0xf] }
 0x19d   : > { %1117 = vmatmul.bf16.vlgmr.msra.gmra.mxu3 %v714_v22  ;;  %1143 = vmatmul.bf16.vlgmr.msrb.gmra.mxu1 %v714_v22  ;;  %v6401_v15 = vld [vmem:[#allocation9 + $0x79c] sm:$0xf0] }
 0x19e   : > { %vm708_vm10 = vcmp.gt.f32.partialorder %v706_v23, 0.0  ;;  %v710_v24 = vmul.f32 0.2, %v706_v23  ;;  %2935 = vmatpush.bf16.msra.mxu3 %v5020_v27  ;;  %2961 = vmatpush.bf16.msrb.mxu1 %v5532_v57  ;;  %v5756_v16 = vor.u32 %v6401_v15, %v5755_v17  ;;  %v7207_v18 = vld [vmem:[#allocation10 + $0x3] sm:$0xf] }
 0x19f   : > { %v4795_v19 = vld [vmem:[#allocation9] sm:$0xf]  ;;  %v781_v30 = vperm.slane %v7207_v18, 0  ;;  %v782_v0 = vperm.slane %v7207_v18, 1  ;;  %v4925_v15 = vld [vmem:[#allocation9 + $0x120] sm:$0xf0] }
 0x1a0   : > { %v712_v25 = vsel %vm708_vm10, %v706_v23, %v710_v24  ;;  %v6161_v20 = vld [vmem:[#allocation9 + $0x1c] sm:$0xf0] }
 0x1a1   : > { %v715_v26 = vpack.c.bf16 %v712_v25, %v712_v25  ;;  %v5083_v21 = vld [vmem:[#allocation9 + $0x240] sm:$0xf] }
 0x1a2   : > { %2936 = vmatpush.bf16.msra.mxu3 %v4988_v31  ;;  %2962 = vmatpush.bf16.msrb.mxu1 %v5500_v6  ;;  %v6233_v23 = vld [vmem:[#allocation9 + $0x25c] sm:$0xf0] }
 0x1a3   : > { %1130 = vmatmul.bf16.vlgmr.msrb.gmra.mxu0 %v715_v26  ;;  %1156 = vmatmul.bf16.vlgmr.msrb.gmra.mxu2 %v715_v26  ;;  %v5435_v24 = vld [vmem:[#allocation9 + $0x500] sm:$0xf]  ;;  %v5084_v36 = vor.u32 %v6233_v23, %v5083_v21 }
 0x1a4   : > { %2948 = vmatpush.bf16.msrb.mxu0 %v5276_v33  ;;  %2974 = vmatpush.bf16.msrb.mxu2 %v5788_v8  ;;  %v6321_v25 = vld [vmem:[#allocation9 + $0x51c] sm:$0xf0]  ;;  %v5024_v33 = vor.u32 %v6213_v29, %v5021_v32  ;;  %v5248_v8 = vor.u32 %v6269_v4, %v5245_v5 }
 0x1a5   : > { %v5436_v53 = vor.u32 %v6321_v25, %v5435_v24  ;;  %v5723_v27 = vld [vmem:[#allocation9 + $0x740] sm:$0xf] }
 0x1a6   : > { %2937 = vmatpush.bf16.msra.mxu3 %v4956_v39  ;;  %2963 = vmatpush.bf16.msrb.mxu1 %v5468_v7  ;;  %v6393_v28 = vld [vmem:[#allocation9 + $0x75c] sm:$0xf0] }
 0x1a7   : > { %v5724_v31 = vor.u32 %v6393_v28, %v5723_v27  ;;  %v5051_v34 = vld [vmem:[#allocation9 + $0x200] sm:$0xf] }
 0x1a8   : > { %2949 = vmatpush.bf16.msrb.mxu0 %v5244_v41  ;;  %2975 = vmatpush.bf16.msrb.mxu2 %v5756_v16  ;;  %v6225_v35 = vld [vmem:[#allocation9 + $0x21c] sm:$0xf0]  ;;  %v6261_v16 = vld [vmem:[#allocation9 + $0x344] sm:$0xf] }
 0x1a9   : > { %v5403_v38 = vld [vmem:[#allocation9 + $0x4c0] sm:$0xf]  ;;  %v5052_v39 = vor.u32 %v6225_v35, %v5051_v34 }
 0x1aa   : > { %2938 = vmatpush.bf16.msra.mxu3 %v4924_v45  ;;  %2964 = vmatpush.bf16.msrb.mxu1 %v5436_v53  ;;  %v6313_v40 = vld [vmem:[#allocation9 + $0x4dc] sm:$0xf0]  ;;  %v6205_v45 = vld [vmem:[#allocation9 + $0x184] sm:$0xf] }
 0x1ab   : > { %v5691_v41 = vld [vmem:[#allocation9 + $0x700] sm:$0xf]  ;;  %v5404_v43 = vor.u32 %v6313_v40, %v5403_v38  ;;  %v4992_v48 = vor.u32 %v6205_v45, %v4989_v46  ;;  %v4893_v40 = vld [vmem:[#allocation9 + $0xe0] sm:$0xf0] }
 0x1ac   : > { %2950 = vmatpush.bf16.msrb.mxu0 %v5212_v47  ;;  %2976 = vmatpush.bf16.msrb.mxu2 %v5724_v31  ;;  %v6385_v42 = vld [vmem:[#allocation9 + $0x71c] sm:$0xf0]  ;;  %v6277_v47 = vld [vmem:[#allocation9 + $0x3c4] sm:$0xf] }
 0x1ad   : > { %1169 = vmatmul.bf16.vlgmr.msrb.gmra.mxu3 %v714_v22  ;;  %1195 = vmatmul.bf16.vlgmr.msra.gmra.mxu1 %v714_v22  ;;  %v4796_v22 = vor.u32 %v6161_v20, %v4795_v19  ;;  %v5692_v44 = vor.u32 %v6385_v42, %v5691_v41  ;;  %v5371_v52 = vld [vmem:[#allocation9 + $0x480] sm:$0xf]  ;;  %v5213_v19 = vld [vmem:[#allocation9 + $0x360] sm:$0xf0] }
 0x1ae   : > { %2939 = vmatpush.bf16.msra.mxu3 %v4892_v51  ;;  %v5280_v51 = vor.u32 %v6277_v47, %v5277_v49  ;;  %v6305_v54 = vld [vmem:[#allocation9 + $0x49c] sm:$0xf0]  ;;  %2965 = vmatpush.bf16.msrb.mxu1 %v5404_v43  ;;  %v5216_v24 = vor.u32 %v6261_v16, %v5213_v19  ;;  %v6253_v41 = vld [vmem:[#allocation9 + $0x304] sm:$0xf] }
 0x1af   : > { %v5659_v55 = vld [vmem:[#allocation9 + $0x6c0] sm:$0xf]  ;;  %v5372_v58 = vor.u32 %v6305_v54, %v5371_v52  ;;  %v5181_v45 = vld [vmem:[#allocation9 + $0x320] sm:$0xf0] }
 0x1b0   : > { %2951 = vmatpush.bf16.msrb.mxu0 %v5180_v56  ;;  %2977 = vmatpush.bf16.msrb.mxu2 %v5692_v44  ;;  %v6377_v60 = vld [vmem:[#allocation9 + $0x6dc] sm:$0xf0]  ;;  %v6341_v46 = vld [vmem:[#allocation9 + $0x5c4] sm:$0xf]  ;;  %v5184_v49 = vor.u32 %v6253_v41, %v5181_v45 }
 0x1b1   : > { %v5339_v9 = vld [vmem:[#allocation9 + $0x440] sm:$0xf]  ;;  %v6157_v45 = vld [vmem:[#allocation9 + $0x4] sm:$0xf] }
 0x1b2   : > { %2940 = vmatpush.bf16.msra.mxu3 %v4860_v61  ;;  %v6197_v61 = vld [vmem:[#allocation9 + $0x144] sm:$0xf]  ;;  %v6297_v10 = vld [vmem:[#allocation9 + $0x45c] sm:$0xf0]  ;;  %2966 = vmatpush.bf16.msrb.mxu1 %v5372_v58 }
 0x1b3   : > { %1182 = vmatmul.bf16.vlgmr.msra.gmra.mxu0 %v715_v26  ;;  %1208 = vmatmul.bf16.vlgmr.msra.gmra.mxu2 %v715_v26  ;;  %v4960_v3 = vor.u32 %v6197_v61, %v4957_v62  ;;  %v5627_v11 = vld [vmem:[#allocation9 + $0x680] sm:$0xf]  ;;  %v5340_v14 = vor.u32 %v6297_v10, %v5339_v9  ;;  %v6173_v58 = vld [vmem:[#allocation9 + $0x84] sm:$0xf] }
 0x1b4   : > { %2952 = vmatpush.bf16.msrb.mxu0 %v5148_v2  ;;  %v5660_v2 = vor.u32 %v6377_v60, %v5659_v55  ;;  %v6369_v59 = vld [vmem:[#allocation9 + $0x69c] sm:$0xf0]  ;;  %v783_v55 = vperm.slane %v7207_v18, 2  ;;  %v6333_v9 = vld [vmem:[#allocation9 + $0x584] sm:$0xf] }
 0x1b5   : > { %v5628_v17 = vor.u32 %v6369_v59, %v5627_v11  ;;  %v5307_v53 = vld [vmem:[#allocation9 + $0x400] sm:$0xf]  ;;  %v5501_v59 = vld [vmem:[#allocation9 + $0x5a0] sm:$0xf0] }
 0x1b6   : > { %2941 = vmatpush.bf16.msra.mxu3 %v4828_v12  ;;  %2978 = vmatpush.bf16.msrb.mxu2 %v5660_v2  ;;  %v6289_v27 = vld [vmem:[#allocation9 + $0x41c] sm:$0xf0]  ;;  %v5504_v19 = vor.u32 %v6333_v9, %v5501_v59 }
 0x1b7   : > { %v5595_v28 = vld [vmem:[#allocation9 + $0x640] sm:$0xf]  ;;  %2967 = vmatpush.bf16.msrb.mxu1 %v5340_v14  ;;  %v5308_v31 = vor.u32 %v6289_v27, %v5307_v53  ;;  %v6237_v53 = vld [vmem:[#allocation9 + $0x284] sm:$0xf] }
 0x1b8   : > { %2953 = vmatpush.bf16.msrb.mxu0 %v5116_v37  ;;  %v6189_v37 = vld [vmem:[#allocation9 + $0x104] sm:$0xf]  ;;  %v6361_v32 = vld [vmem:[#allocation9 + $0x65c] sm:$0xf0] }
 0x1b9   : > { %v4928_v23 = vor.u32 %v6189_v37, %v4925_v15  ;;  %v6405_v37 = vld [vmem:[#allocation9 + $0x7c4] sm:$0xf] }
 0x1ba   : > { %2942 = vmatpush.bf16.msra.mxu3 %v4796_v22  ;;  %2979 = vmatpush.bf16.msrb.mxu2 %v5628_v17  ;;  %v5117_v27 = vld [vmem:[#allocation9 + $0x2a0] sm:$0xf0] }
 0x1bb   : > { %2968 = vmatpush.bf16.msrb.mxu1 %v5308_v31  ;;  %v5469_v31 = vld [vmem:[#allocation9 + $0x560] sm:$0xf0] }
 0x1bc   : > { %2954 = vmatpush.bf16.msrb.mxu0 %v5084_v36 }
 0x1be   : > { %2987 = vmatpush.bf16.msrb.mxu3 %v5024_v33  ;;  %v6181_v33 = vld [vmem:[#allocation9 + $0xc4] sm:$0xf] }
 0x1bf   : > { %v4896_v44 = vor.u32 %v6181_v33, %v4893_v40  ;;  %v5757_v40 = vld [vmem:[#allocation9 + $0x7a0] sm:$0xf0] }
 0x1c0   : > { %2955 = vmatpush.bf16.msrb.mxu0 %v5052_v39  ;;  %v5596_v39 = vor.u32 %v6361_v32, %v5595_v28  ;;  %v6397_v32 = vld [vmem:[#allocation9 + $0x784] sm:$0xf] }
 0x1c2   : > { %2988 = vmatpush.bf16.msrb.mxu3 %v4992_v48  ;;  %2980 = vmatpush.bf16.msrb.mxu2 %v5596_v39 }
 0x1c4   : > { %3000 = vmatpush.bf16.msra.mxu0 %v5280_v51  ;;  %v5563_v51 = vld [vmem:[#allocation9 + $0x600] sm:$0xf] }
 0x1c6   : > { %2989 = vmatpush.bf16.msrb.mxu3 %v4960_v3 }
 0x1c8   : > { %3001 = vmatpush.bf16.msra.mxu0 %v5248_v8  ;;  %v5149_v8 = vld [vmem:[#allocation9 + $0x2e0] sm:$0xf0] }
 0x1ca   : > { %2990 = vmatpush.bf16.msrb.mxu3 %v4928_v23 }
 0x1cc   : > { %3002 = vmatpush.bf16.msra.mxu0 %v5216_v24 }
 0x1ce   : > { %2991 = vmatpush.bf16.msrb.mxu3 %v4896_v44  ;;  %v5120_v44 = vor.u32 %v6237_v53, %v5117_v27 }
 0x1d0   : > { %3003 = vmatpush.bf16.msra.mxu0 %v5184_v49 }
 0x21a   : > { %v7209_v26 = vpop.f32.mrf.mxu1 }
 0x21b   : > { %v1145_v7 = vadd.f32 %v7209_v26, %v782_v0  ;;  %v4861_v0 = vld [vmem:[#allocation9 + $0xa0] sm:$0xf0] }
 0x21c   : > { %v4864_v5 = vor.u32 %v6173_v58, %v4861_v0  ;;  %v6317_v58 = vld [vmem:[#allocation9 + $0x504] sm:$0xf] }
 0x21e   : > { %2992 = vmatpush.bf16.msrb.mxu3 %v4864_v5 }
 0x220   : > { %v1118_v50 = vpop.f32.mrf.mxu3  ;;  %v1131_v57 = vpop.f32.mrf.mxu0 }
 0x221   : > { %v1119_v56 = vadd.f32 %v1118_v50, %v781_v30  ;;  %v5533_v50 = vld [vmem:[#allocation9 + $0x5e0] sm:$0xf0] }
 0x222   : > { %v1146_v1 = vpop.f32.mrf.mxu1 }
 0x223   : > { %v7213_v6 = vadd.f32 %v1131_v57, %v1119_v56  ;;  %v5536_v56 = vor.u32 %v6341_v46, %v5533_v50  ;;  %v6353_v57 = vld [vmem:[#allocation9 + $0x61c] sm:$0xf0]  ;;  %v6245_v1 = vld [vmem:[#allocation9 + $0x2c4] sm:$0xf]  ;;  %v5760_v50 = vor.u32 %v6397_v32, %v5757_v40 }
 0x224   : > { %v5564_v62 = vor.u32 %v6353_v57, %v5563_v51  ;;  %v5152_v14 = vor.u32 %v6245_v1, %v5149_v8  ;;  %v4797_v46 = vld [vmem:[#allocation9 + $0x20] sm:$0xf0] }
 0x225   : > { %v1215_v12 = vrot.slane %v7213_v6, 4  ;;  %v1243_v13 = vmul.f32 %v7213_v6, %v7213_v6  ;;  %3013 = vmatpush.bf16.msra.mxu1 %v5536_v56  ;;  %v5085_v51 = vld [vmem:[#allocation9 + $0x260] sm:$0xf0]  ;;  %v4800_v57 = vor.u32 %v6157_v45, %v4797_v46 }
 0x226   : > { %v1157_v22 = vpop.f32.mrf.mxu2  ;;  %2981 = vmatpush.bf16.msrb.mxu2 %v5564_v62  ;;  %3004 = vmatpush.bf16.msra.mxu0 %v5152_v14  ;;  %v5373_v45 = vld [vmem:[#allocation9 + $0x4a0] sm:$0xf0] }
 0x227   : > { %v1216_v20 = vadd.f32 %v1215_v12, %v7213_v6  ;;  %v1247_v21 = vrot.slane %v1243_v13, 4  ;;  %v7220_v25 = vadd.f32 %v1157_v22, %v1145_v7  ;;  %v784_v12 = vperm.slane %v7207_v18, 3  ;;  %v4829_v22 = vld [vmem:[#allocation9 + $0x60] sm:$0xf0] }
 0x228   : > { %v1120_v36 = vpop.f32.mrf.mxu3  ;;  %v1133_v30 = vpop.f32.mrf.mxu0 }
 0x229   : > { %v1217_v29 = vrot.slane %v1216_v20, 2  ;;  %v1248_v26 = vadd.f32 %v1247_v21, %v1243_v13  ;;  %v1221_v34 = vrot.slane %v7220_v25, 4  ;;  %v1244_v35 = vmul.f32 %v7220_v25, %v7220_v25  ;;  %v6165_v21 = vld [vmem:[#allocation9 + $0x44] sm:$0xf]  ;;  %3014 = vmatpush.bf16.msra.mxu1 %v5504_v19 }
 0x22a   : > { %v7225_v38 = vpop.f32.mrf.mxu1  ;;  %v6325_v30 = vld [vmem:[#allocation9 + $0x544] sm:$0xf]  ;;  %v4832_v39 = vor.u32 %v6165_v21, %v4829_v22  ;;  %3005 = vmatpush.bf16.msra.mxu0 %v5120_v44 }
 0x22b   : > { %v1218_v42 = vadd.f32 %v1217_v29, %v1216_v20  ;;  %v1249_v43 = vrot.slane %v1248_v26, 2  ;;  %v1222_v47 = vadd.f32 %v1221_v34, %v7220_v25  ;;  %v1253_v48 = vrot.slane %v1244_v35, 4  ;;  %v5789_v20 = vld [vmem:[#allocation9 + $0x7e0] sm:$0xf0] }
 0x22c   : > { %v5792_v18 = vor.u32 %v6405_v37, %v5789_v20  ;;  %2993 = vmatpush.bf16.msrb.mxu3 %v4832_v39  ;;  %v5472_v49 = vor.u32 %v6325_v30, %v5469_v31  ;;  %v6309_v22 = vld [vmem:[#allocation9 + $0x4c4] sm:$0xf] }
 0x22d   : > { %v1219_v52 = vrot.slane %v1218_v42, 1  ;;  %v1250_v54 = vadd.f32 %v1249_v43, %v1248_v26  ;;  %v1223_v60 = vrot.slane %v1222_v47, 2  ;;  %v1254_v61 = vadd.f32 %v1253_v48, %v1244_v35  ;;  %v5693_v30 = vld [vmem:[#allocation9 + $0x720] sm:$0xf0] }
 0x22e   : > { %v1159_v4 = vpop.f32.mrf.mxu2  ;;  %v1197_v35 = vadd.f32 %v7225_v38, %v784_v12  ;;  %3026 = vmatpush.bf16.msra.mxu2 %v5792_v18  ;;  %v6229_v38 = vld [vmem:[#allocation9 + $0x244] sm:$0xf]  ;;  %3015 = vmatpush.bf16.msra.mxu1 %v5472_v49 }
 0x22f   : > { %v1220_v2 = vadd.f32 %v1219_v52, %v1218_v42  ;;  %v1251_v3 = vrot.slane %v1250_v54, 1  ;;  %v1224_v10 = vadd.f32 %v1223_v60, %v1222_v47  ;;  %v1255_v11 = vrot.slane %v1254_v61, 2  ;;  %v5437_v60 = vld [vmem:[#allocation9 + $0x520] sm:$0xf0] }
 0x230   : > { %v1170_v13 = vpop.f32.mrf.mxu3  ;;  %v1183_v16 = vpop.f32.mrf.mxu0  ;;  %v5088_v9 = vor.u32 %v6229_v38, %v5085_v51  ;;  %2994 = vmatpush.bf16.msrb.mxu3 %v4800_v57  ;;  %v5440_v14 = vor.u32 %v6317_v58, %v5437_v60  ;;  %v6381_v18 = vld [vmem:[#allocation9 + $0x704] sm:$0xf] }
 0x231   : > { %v7231_v7 = vmul.f32 %v1220_v2, %v7179_v63  ;;  %v1252_v17 = vadd.f32 %v1251_v3, %v1250_v54  ;;  %v1171_v15 = vadd.f32 %v1170_v13, %v783_v55  ;;  %v1225_v23 = vrot.slane %v1224_v10, 1  ;;  %v6389_v2 = vld [vmem:[#allocation9 + $0x744] sm:$0xf] }
 0x232   : > { %v1256_v24 = vadd.f32 %v1255_v11, %v1254_v61  ;;  %v1198_v36 = vpop.f32.mrf.mxu1  ;;  %3027 = vmatpush.bf16.msra.mxu2 %v5760_v50  ;;  %3006 = vmatpush.bf16.msra.mxu0 %v5088_v9  ;;  %v6301_v44 = vld [vmem:[#allocation9 + $0x484] sm:$0xf] }
 0x233   : > { %v1271_v28 = vmul.f32 %v1252_v17, %v7179_v63  ;;  %v1275_v29 = vmul.f32 %v7231_v7, %v7231_v7  ;;  %v7236_v26 = vadd.f32 %v1183_v16, %v1171_v15  ;;  %v1226_v33 = vadd.f32 %v1225_v23, %v1224_v10  ;;  %v5725_v10 = vld [vmem:[#allocation9 + $0x760] sm:$0xf0]  ;;  %3016 = vmatpush.bf16.msra.mxu1 %v5440_v14 }
 0x234   : > { %v1257_v34 = vrot.slane %v1256_v24, 1  ;;  %v6221_v17 = vld [vmem:[#allocation9 + $0x204] sm:$0xf]  ;;  %v5728_v21 = vor.u32 %v6389_v2, %v5725_v10  ;;  %v5376_v58 = vor.u32 %v6301_v44, %v5373_v45  ;;  %v7275_v10 = vld [vmem:[#allocation10 + $0x13] sm:$0xf] }
 0x235   : > { %v1279_v41 = vsub.f32 %v1271_v28, %v1275_v29  ;;  %v1227_v42 = vrot.slane %v7236_v26, 4  ;;  %v1245_v43 = vmul.f32 %v7236_v26, %v7236_v26  ;;  %v7243_v47 = vmul.f32 %v1226_v33, %v7179_v63  ;;  %v5053_v15 = vld [vmem:[#allocation9 + $0x220] sm:$0xf0] }
 0x236   : > { %v1258_v48 = vadd.f32 %v1257_v34, %v1256_v24  ;;  %v1209_v56 = vpop.f32.mrf.mxu2  ;;  %v5405_v23 = vld [vmem:[#allocation9 + $0x4e0] sm:$0xf0]  ;;  %3028 = vmatpush.bf16.msra.mxu2 %v5728_v21  ;;  %v5056_v29 = vor.u32 %v6221_v17, %v5053_v15  ;;  %v1341_v44 = vperm.slane %v7275_v10, 1 }
 0x237   : > { %v1283_v52 = vmax.f32 %v1279_v41, 0.0  ;;  %v1228_v54 = vadd.f32 %v1227_v42, %v7236_v26  ;;  %v1259_v55 = vrot.slane %v1245_v43, 4  ;;  %v1276_v62 = vmul.f32 %v7243_v47, %v7243_v47  ;;  %v6373_v50 = vld [vmem:[#allocation9 + $0x6c4] sm:$0xf] }
 0x238   : > { %v1272_v61 = vmul.f32 %v1258_v48, %v7179_v63  ;;  %v7249_v0 = vadd.f32 %v1209_v56, %v1197_v35  ;;  %v1172_v1 = vpop.f32.mrf.mxu3  ;;  %v1185_v8 = vpop.f32.mrf.mxu0  ;;  %v5408_v34 = vor.u32 %v6309_v22, %v5405_v23  ;;  %3007 = vmatpush.bf16.msra.mxu0 %v5056_v29  ;;  %v5661_v38 = vld [vmem:[#allocation9 + $0x6e0] sm:$0xf0]  ;;  %v7284_v23 = vld [vmem:[#allocation10 + $0x17] sm:$0xf] }
 0x239   : > { %v7251_v3 = vadd.f32 0.8, %v1283_v52  ;;  %v1229_v4 = vrot.slane %v1228_v54, 2  ;;  %v1260_v5 = vadd.f32 %v1259_v55, %v1245_v43  ;;  %v5696_v43 = vor.u32 %v6381_v18, %v5693_v30  ;;  %v6365_v8 = vld [vmem:[#allocation9 + $0x684] sm:$0xf] }
 0x23a   : > { %v1280_v11 = vsub.f32 %v1272_v61, %v1276_v62  ;;  %v1233_v12 = vrot.slane %v7249_v0, 4  ;;  %v1246_v13 = vmul.f32 %v7249_v0, %v7249_v0  ;;  %3017 = vmatpush.bf16.msra.mxu1 %v5408_v34  ;;  %v5664_v60 = vor.u32 %v6373_v50, %v5661_v38  ;;  %v6293_v61 = vld [vmem:[#allocation9 + $0x444] sm:$0xf] }
 0x23b   : > { %6600 = vrsqrt.f32 %v7251_v3  ;;  %v1230_v59 = vadd.f32 %v1229_v4, %v1228_v54  ;;  %v1261_v37 = vrot.slane %v1260_v5, 2  ;;  %3029 = vmatpush.bf16.msra.mxu2 %v5696_v43  ;;  %v5341_v62 = vld [vmem:[#allocation9 + $0x460] sm:$0xf0]  ;;  %vm1301_vm12 = vweird.f32 %v7251_v3 }
 0x23c   : > { %v1284_v16 = vmax.f32 %v1280_v11, 0.0  ;;  %v1234_v19 = vadd.f32 %v1233_v12, %v7249_v0  ;;  %v1265_v20 = vrot.slane %v1246_v13, 4  ;;  %v5629_v9 = vld [vmem:[#allocation9 + $0x6a0] sm:$0xf0]  ;;  %v1354_v50 = vperm.slane %v7284_v23, 1 }
 0x23d   : > { %v1231_v24 = vrot.slane %v1230_v59, 1  ;;  %v1262_v36 = vadd.f32 %v1261_v37, %v1260_v5  ;;  %v6285_v37 = vld [vmem:[#allocation9 + $0x404] sm:$0xf] }
 0x23e   : > { %v7258_v53 = vadd.f32 0.8, %v1284_v16  ;;  %v1235_v27 = vrot.slane %v1234_v19, 2  ;;  %v1266_v28 = vadd.f32 %v1265_v20, %v1246_v13  ;;  %v1211_v33 = vpop.f32.mrf.mxu2  ;;  %3018 = vmatpush.bf16.msra.mxu1 %v5376_v58  ;;  %v5309_v17 = vld [vmem:[#allocation9 + $0x420] sm:$0xf0]  ;;  %v5632_v20 = vor.u32 %v6365_v8, %v5629_v9 }
 0x23f   : > { %v1232_v31 = vadd.f32 %v1231_v24, %v1230_v59  ;;  %v1263_v32 = vrot.slane %v1262_v36, 1  ;;  %3030 = vmatpush.bf16.msra.mxu2 %v5664_v60  ;;  %v6357_v21 = vld [vmem:[#allocation9 + $0x644] sm:$0xf]  ;;  %v5312_v29 = vor.u32 %v6285_v37, %v5309_v17  ;;  %v4963_v37 = vld [vmem:[#allocation9 + $0x148] sm:$0xf] }
 0x240   : > { %6602 = vrsqrt.f32 %v7258_v53  ;;  %v1236_v35 = vadd.f32 %v1235_v27, %v1234_v19  ;;  %v1267_v39 = vrot.slane %v1266_v28, 2  ;;  %v5344_v19 = vor.u32 %v6293_v61, %v5341_v62  ;;  %v5597_v22 = vld [vmem:[#allocation9 + $0x660] sm:$0xf0]  ;;  %v4995_v61 = vld [vmem:[#allocation9 + $0x188] sm:$0xf] }
 0x241   : > { %v7261_v40 = vpop.eup %6600  ;;  %v7264_v41 = vmul.f32 %v1232_v31, %v7179_v63  ;;  %v1264_v42 = vadd.f32 %v1263_v32, %v1262_v36  ;;  %v1340_v36 = vperm.slane %v7275_v10, 0  ;;  %v1287_v27 = vsub.f32 %v7213_v6, %v7231_v7  ;;  %v5565_v33 = vld [vmem:[#allocation9 + $0x620] sm:$0xf0]  ;;  %v6210_v62 = vld [vmem:[#allocation9 + $0x1a4] sm:$0xf0] }
 0x242   : > { %v1296_v46 = vmul.f32 %v7261_v40, %v7251_v3  ;;  %v1237_v48 = vrot.slane %v1236_v35, 1  ;;  %v1268_v49 = vadd.f32 %v1267_v39, %v1266_v28  ;;  %vm1302_vm11 = vweird.f32 %v7261_v40  ;;  %3019 = vmatpush.bf16.msra.mxu1 %v5344_v19  ;;  %v6349_v3 = vld [vmem:[#allocation9 + $0x604] sm:$0xf]  ;;  %v6202_v17 = vld [vmem:[#allocation9 + $0x164] sm:$0xf0] }
 0x243   : > { %v1273_v51 = vmul.f32 %v1264_v42, %v7179_v63  ;;  %v1277_v52 = vmul.f32 %v7264_v41, %v7264_v41  ;;  %vm1303_vm13 = vmor %vm1301_vm12, %vm1302_vm11  ;;  %3031 = vmatpush.bf16.msra.mxu2 %v5632_v20  ;;  %v5600_v32 = vor.u32 %v6357_v21, %v5597_v22  ;;  %vm1311_vm15 = vweird.f32 %v7258_v53  ;;  %v5251_v22 = vld [vmem:[#allocation9 + $0x388] sm:$0xf] }
 0x244   : > { %v1297_v54 = vmul.f32 %v7261_v40, %v1296_v46  ;;  %v1238_v55 = vadd.f32 %v1237_v48, %v1236_v35  ;;  %v1269_v56 = vrot.slane %v1268_v49, 1  ;;  %v1353_v35 = vperm.slane %v7284_v23, 0 }
 0x245   : > { %v1281_v57 = vsub.f32 %v1273_v51, %v1277_v52  ;;  %v5568_v43 = vor.u32 %v6349_v3, %v5565_v33  ;;  %v6218_v51 = vld [vmem:[#allocation9 + $0x1e4] sm:$0xf0]  ;;  %v1289_v19 = vsub.f32 %v7236_v26, %v7264_v41  ;;  %v1342_v20 = vperm.slane %v7275_v10, 2 }
 0x246   : > { %v6603_v1 = vpop.eup %6602  ;;  %v1298_v2 = vmul.f32 0.5, %v1297_v54  ;;  %v7273_v4 = vmul.f32 %v1238_v55, %v7179_v63  ;;  %v1270_v5 = vadd.f32 %v1269_v56, %v1268_v49  ;;  %3020 = vmatpush.bf16.msra.mxu1 %v5312_v29  ;;  %v6194_v26 = vld [vmem:[#allocation9 + $0x124] sm:$0xf0] }
 0x247   : > { %v1306_v11 = vmul.f32 %v6603_v1, %v7258_v53  ;;  %v1285_v12 = vmax.f32 %v1281_v57, 0.0  ;;  %vm1312_vm14 = vweird.f32 %v6603_v1  ;;  %3032 = vmatpush.bf16.msra.mxu2 %v5600_v32  ;;  %v5027_v53 = vld [vmem:[#allocation9 + $0x1c8] sm:$0xf] }
 0x248   : > { %v1299_v13 = vsub.f32 1.5, %v1298_v2  ;;  %v1274_v14 = vmul.f32 %v1270_v5, %v7179_v63  ;;  %v1278_v59 = vmul.f32 %v7273_v4, %v7273_v4  ;;  %vm1313_vm0 = vmor %vm1311_vm15, %vm1312_vm14  ;;  %v5028_v55 = vor.u32 %v6218_v51, %v5027_v53  ;;  %v5283_v2 = vld [vmem:[#allocation9 + $0x3c8] sm:$0xf] }
 0x249   : > { %v1307_v15 = vmul.f32 %v6603_v1, %v1306_v11  ;;  %v7282_v16 = vadd.f32 0.8, %v1285_v12  ;;  %v6282_v5 = vld [vmem:[#allocation9 + $0x3e4] sm:$0xf0]  ;;  %v4996_v12 = vor.u32 %v6210_v62, %v4995_v61  ;;  %v1290_v33 = vsub.f32 %v7249_v0, %v7273_v4 }
 0x24a   : > { %v1300_v24 = vmul.f32 %v7261_v40, %v1299_v13  ;;  %v1282_v18 = vsub.f32 %v1274_v14, %v1278_v59  ;;  %v5284_v59 = vor.u32 %v6282_v5, %v5283_v2  ;;  %v5219_v32 = vld [vmem:[#allocation9 + $0x348] sm:$0xf] }
 0x24b   : > { %v1308_v28 = vmul.f32 0.5, %v1307_v15  ;;  %6604 = vrsqrt.f32 %v7282_v16  ;;  %3033 = vmatpush.bf16.msra.mxu2 %v5568_v43  ;;  %vm1321_vm4 = vweird.f32 %v7282_v16  ;;  %v6266_v3 = vld [vmem:[#allocation9 + $0x364] sm:$0xf0] }
 0x24c   : > { %v1304_v30 = vsel %vm1303_vm13, %v7261_v40, %v1300_v24  ;;  %v1286_v31 = vmax.f32 %v1282_v18, 0.0  ;;  %v1288_v40 = vsub.f32 %v7220_v25, %v7243_v47  ;;  %v6274_v24 = vld [vmem:[#allocation9 + $0x3a4] sm:$0xf0]  ;;  %v1355_v18 = vperm.slane %v7284_v23, 2 }
 0x24d   : > { %v1335_v34 = vmul.f32 %v1304_v30, %v1287_v27  ;;  %v1309_v39 = vsub.f32 1.5, %v1308_v28  ;;  %v5252_v29 = vor.u32 %v6274_v24, %v5251_v22  ;;  %v4931_v30 = vld [vmem:[#allocation9 + $0x108] sm:$0xf] }
 0x24e   : > { %v7296_v6 = vadd.f32 0.8, %v1286_v31  ;;  %v4899_v43 = vld [vmem:[#allocation9 + $0xc8] sm:$0xf] }
 0x24f   : > { %v1348_v7 = vmul.f32 %v1340_v36, %v1335_v34  ;;  %v1310_v42 = vmul.f32 %v6603_v1, %v1309_v39  ;;  %v1343_v34 = vperm.slane %v7275_v10, 3  ;;  %v6258_v0 = vld [vmem:[#allocation9 + $0x324] sm:$0xf0] }
 0x250   : > { %6606 = vrsqrt.f32 %v7296_v6  ;;  %vm1331_vm7 = vweird.f32 %v7296_v6  ;;  %v4867_v53 = vld [vmem:[#allocation9 + $0x88] sm:$0xf] }
 0x251   : > { %v6605_v45 = vpop.eup %6604  ;;  %v1361_v46 = vadd.f32 %v1353_v35, %v1348_v7  ;;  %v1314_v48 = vsel %vm1313_vm0, %v6603_v1, %v1310_v42  ;;  %v1356_v7 = vperm.slane %v7284_v23, 3  ;;  %v4932_v42 = vor.u32 %v6194_v26, %v4931_v30  ;;  %v6410_v61 = vld [vmem:[#allocation9 + $0x7e4] sm:$0xf0] }
 0x252   : > { %v1336_v49 = vmul.f32 %v1314_v48, %v1288_v40  ;;  %v1316_v38 = vmul.f32 %v6605_v45, %v7282_v16  ;;  %vm1322_vm3 = vweird.f32 %v6605_v45  ;;  %v4964_v16 = vor.u32 %v6202_v17, %v4963_v37  ;;  %v6186_v40 = vld [vmem:[#allocation9 + $0xe4] sm:$0xf0] }
 0x253   : > { %vm1365_vm1 = vcmp.gt.f32.partialorder %v1361_v46, 0.0  ;;  %v1369_v52 = vmul.f32 0.2, %v1361_v46  ;;  %vm1323_vm5 = vmor %vm1321_vm4, %vm1322_vm3  ;;  %v6346_v48 = vld [vmem:[#allocation9 + $0x5e4] sm:$0xf0]  ;;  %v4900_v10 = vor.u32 %v6186_v40, %v4899_v43 }
 0x254   : > { %v1349_v54 = vmul.f32 %v1341_v44, %v1336_v49  ;;  %v1317_v25 = vmul.f32 %v6605_v45, %v1316_v38  ;;  %v4835_v5 = vld [vmem:[#allocation9 + $0x48] sm:$0xf] }
 0x255   : > { %v1373_v47 = vsel %vm1365_vm1, %v1361_v46, %v1369_v52  ;;  %v5539_v46 = vld [vmem:[#allocation9 + $0x5c8] sm:$0xf] }
 0x256   : > { %v6607_v56 = vpop.eup %6606  ;;  %v7305_v57 = vpack.c.bf16 %v1373_v47, %v1373_v47  ;;  %v1362_v58 = vadd.f32 %v1354_v50, %v1349_v54  ;;  %v1318_v60 = vmul.f32 0.5, %v1317_v25  ;;  %v5540_v38 = vor.u32 %v6346_v48, %v5539_v46  ;;  %v6178_v54 = vld [vmem:[#allocation9 + $0xa4] sm:$0xf0]  ;;  %v6278_v46 = vld [vmem:[#allocation9 + $0x3cc] sm:$0xf] }
 0x257   : > { %v1326_v1 = vmul.f32 %v6607_v56, %v7296_v6  ;;  %vm1332_vm6 = vweird.f32 %v6607_v56  ;;  %v5187_v6 = vld [vmem:[#allocation9 + $0x308] sm:$0xf]  ;;  %v5285_v48 = vld [vmem:[#allocation9 + $0x3e8] sm:$0xf0] }
 0x258   : > { %vm1366_vm2 = vcmp.gt.f32.partialorder %v1362_v58, 0.0  ;;  %v1370_v8 = vmul.f32 0.2, %v1362_v58  ;;  %v1319_v9 = vsub.f32 1.5, %v1318_v60  ;;  %2943 = vmatmul.bf16.vlgmr.msra.gmra.mxu3 %v7305_v57  ;;  %vm1333_vm8 = vmor %vm1331_vm7, %vm1332_vm6  ;;  %v5188_v52 = vor.u32 %v6258_v0, %v5187_v6  ;;  %v5155_v25 = vld [vmem:[#allocation9 + $0x2c8] sm:$0xf] }
 0x259   : > { %v1327_v11 = vmul.f32 %v6607_v56, %v1326_v1  ;;  %3039 = vmatpush.bf16.msra.mxu3 %v5028_v55  ;;  %v6250_v47 = vld [vmem:[#allocation9 + $0x2e4] sm:$0xf0]  ;;  %v4868_v1 = vor.u32 %v6178_v54, %v4867_v53  ;;  %v4997_v6 = vld [vmem:[#allocation9 + $0x1a8] sm:$0xf0]  ;;  %v5288_v53 = vor.u32 %v6278_v46, %v5285_v48 }
 0x25a   : > { %v1374_v13 = vsel %vm1366_vm2, %v1362_v58, %v1370_v8  ;;  %v1320_v14 = vmul.f32 %v6605_v45, %v1319_v9  ;;  %v5507_v55 = vld [vmem:[#allocation9 + $0x588] sm:$0xf]  ;;  %v5156_v2 = vor.u32 %v6250_v47, %v5155_v25  ;;  %v6198_v54 = vld [vmem:[#allocation9 + $0x14c] sm:$0xf] }
 0x25b   : > { %v7310_v15 = vpack.c.bf16 %v1374_v13, %v1374_v13  ;;  %v1328_v21 = vmul.f32 0.5, %v1327_v11  ;;  %v5795_v58 = vld [vmem:[#allocation9 + $0x7c8] sm:$0xf]  ;;  %v4965_v25 = vld [vmem:[#allocation9 + $0x168] sm:$0xf0] }
 0x25c   : > { %v1324_v36 = vsel %vm1323_vm5, %v6605_v45, %v1320_v14  ;;  %v5220_v45 = vor.u32 %v6266_v3, %v5219_v32  ;;  %v6170_v8 = vld [vmem:[#allocation9 + $0x64] sm:$0xf0]  ;;  %v6270_v47 = vld [vmem:[#allocation9 + $0x38c] sm:$0xf] }
 0x25d   : > { %v1337_v27 = vmul.f32 %v1324_v36, %v1289_v19  ;;  %v1329_v28 = vsub.f32 1.5, %v1328_v21  ;;  %2956 = vmatmul.bf16.vlgmr.msrb.gmra.mxu0 %v7310_v15  ;;  %3040 = vmatpush.bf16.msra.mxu3 %v4996_v12  ;;  %v5796_v12 = vor.u32 %v6410_v61, %v5795_v58  ;;  %v5123_v13 = vld [vmem:[#allocation9 + $0x288] sm:$0xf]  ;;  %v6166_v46 = vld [vmem:[#allocation9 + $0x4c] sm:$0xf] }
 0x25e   : > { %3052 = vmatpush.bf16.msrb.mxu0 %v5284_v59  ;;  %v6242_v14 = vld [vmem:[#allocation9 + $0x2a4] sm:$0xf0]  ;;  %v4837_v48 = vld [vmem:[#allocation9 + $0x68] sm:$0xf0] }
 0x25f   : > { %v1350_v41 = vmul.f32 %v1342_v20, %v1337_v27  ;;  %v1330_v31 = vmul.f32 %v6607_v56, %v1329_v28  ;;  %v5475_v59 = vld [vmem:[#allocation9 + $0x548] sm:$0xf]  ;;  %v4836_v20 = vor.u32 %v6170_v8, %v4835_v5  ;;  %v5124_v21 = vor.u32 %v6242_v14, %v5123_v13  ;;  %v6190_v8 = vld [vmem:[#allocation9 + $0x10c] sm:$0xf] }
 0x260   : > { %v6330_v37 = vld [vmem:[#allocation9 + $0x564] sm:$0xf0]  ;;  %v5221_v13 = vld [vmem:[#allocation9 + $0x368] sm:$0xf0] }
 0x261   : > { %v1363_v35 = vadd.f32 %v1355_v18, %v1350_v41  ;;  %v1334_v39 = vsel %vm1333_vm8, %v6607_v56, %v1330_v31  ;;  %3041 = vmatpush.bf16.msra.mxu3 %v4964_v16  ;;  %v6338_v56 = vld [vmem:[#allocation9 + $0x5a4] sm:$0xf0]  ;;  %v5476_v36 = vor.u32 %v6330_v37, %v5475_v59  ;;  %v6214_v41 = vld [vmem:[#allocation9 + $0x1cc] sm:$0xf] }
 0x262   : > { %v1338_v44 = vmul.f32 %v1334_v39, %v1290_v33  ;;  %3053 = vmatpush.bf16.msrb.mxu0 %v5252_v29  ;;  %v5508_v11 = vor.u32 %v6338_v56, %v5507_v55  ;;  %v5763_v17 = vld [vmem:[#allocation9 + $0x788] sm:$0xf]  ;;  %v5029_v31 = vld [vmem:[#allocation9 + $0x1e8] sm:$0xf0] }
 0x263   : > { %vm1367_vm9 = vcmp.gt.f32.partialorder %v1363_v35, 0.0  ;;  %v1371_v49 = vmul.f32 0.2, %v1363_v35  ;;  %v6402_v19 = vld [vmem:[#allocation9 + $0x7a4] sm:$0xf0]  ;;  %v5032_v43 = vor.u32 %v6214_v41, %v5029_v31 }
 0x264   : > { %v1351_v4 = vmul.f32 %v1343_v34, %v1338_v44  ;;  %v4803_v22 = vld [vmem:[#allocation9 + $0x8] sm:$0xf]  ;;  %v5764_v18 = vor.u32 %v6402_v19, %v5763_v17  ;;  %v5253_v55 = vld [vmem:[#allocation9 + $0x3a8] sm:$0xf0] }
 0x265   : > { %v1375_v50 = vsel %vm1367_vm9, %v1363_v35, %v1371_v49  ;;  %3042 = vmatpush.bf16.msra.mxu3 %v4932_v42  ;;  %v6162_v24 = vld [vmem:[#allocation9 + $0x24] sm:$0xf0] }
 0x266   : > { %v7322_v23 = vpack.c.bf16 %v1375_v50, %v1375_v50  ;;  %v1364_v51 = vadd.f32 %v1356_v7, %v1351_v4  ;;  %3054 = vmatpush.bf16.msrb.mxu0 %v5220_v45  ;;  %v5091_v27 = vld [vmem:[#allocation9 + $0x248] sm:$0xf]  ;;  %v4804_v32 = vor.u32 %v6162_v24, %v4803_v22  ;;  %v6206_v45 = vld [vmem:[#allocation9 + $0x18c] sm:$0xf] }
 0x267   : > { %v6234_v28 = vld [vmem:[#allocation9 + $0x264] sm:$0xf0]  ;;  %v6182_v24 = vld [vmem:[#allocation9 + $0xcc] sm:$0xf] }
 0x268   : > { %vm1368_vm10 = vcmp.gt.f32.partialorder %v1364_v51, 0.0  ;;  %v1372_v60 = vmul.f32 0.2, %v1364_v51  ;;  %2969 = vmatmul.bf16.vlgmr.msrb.gmra.mxu1 %v7322_v23  ;;  %2995 = vmatmul.bf16.vlgmr.msrb.gmra.mxu3 %v7305_v57  ;;  %v5443_v16 = vld [vmem:[#allocation9 + $0x508] sm:$0xf]  ;;  %v5092_v3 = vor.u32 %v6234_v28, %v5091_v27 }
 0x269   : > { %3043 = vmatpush.bf16.msra.mxu3 %v4900_v10  ;;  %3065 = vmatpush.bf16.msrb.mxu1 %v5540_v38  ;;  %v6322_v29 = vld [vmem:[#allocation9 + $0x524] sm:$0xf0]  ;;  %v5000_v38 = vor.u32 %v6206_v45, %v4997_v6  ;;  %v5189_v27 = vld [vmem:[#allocation9 + $0x328] sm:$0xf0] }
 0x26a   : > { %v1376_v62 = vsel %vm1368_vm10, %v1364_v51, %v1372_v60  ;;  %3055 = vmatpush.bf16.msrb.mxu0 %v5188_v52  ;;  %v5731_v30 = vld [vmem:[#allocation9 + $0x748] sm:$0xf]  ;;  %v5444_v34 = vor.u32 %v6322_v29, %v5443_v16  ;;  %v6342_v28 = vld [vmem:[#allocation9 + $0x5cc] sm:$0xf] }
 0x26b   : > { %v7326_v9 = vpack.c.bf16 %v1376_v62, %v1376_v62  ;;  %v6394_v26 = vld [vmem:[#allocation9 + $0x764] sm:$0xf0]  ;;  %v4968_v62 = vor.u32 %v6198_v54, %v4965_v25  ;;  %v5541_v16 = vld [vmem:[#allocation9 + $0x5e8] sm:$0xf0] }
 0x26c   : > { %v5059_v33 = vld [vmem:[#allocation9 + $0x208] sm:$0xf]  ;;  %v5732_v35 = vor.u32 %v6394_v26, %v5731_v30  ;;  %v6158_v25 = vld [vmem:[#allocation9 + $0xc] sm:$0xf] }
 0x26d   : > { %2982 = vmatmul.bf16.vlgmr.msrb.gmra.mxu2 %v7326_v9  ;;  %3008 = vmatmul.bf16.vlgmr.msra.gmra.mxu0 %v7310_v15  ;;  %v6226_v39 = vld [vmem:[#allocation9 + $0x224] sm:$0xf0] }
 0x26e   : > { %3044 = vmatpush.bf16.msra.mxu3 %v4868_v1  ;;  %3056 = vmatpush.bf16.msrb.mxu0 %v5156_v2  ;;  %v5411_v7 = vld [vmem:[#allocation9 + $0x4c8] sm:$0xf]  ;;  %v5060_v49 = vor.u32 %v6226_v39, %v5059_v33  ;;  %v5256_v1 = vor.u32 %v6270_v47, %v5253_v55  ;;  %v4869_v33 = vld [vmem:[#allocation9 + $0xa8] sm:$0xf0] }
 0x26f   : > { %3066 = vmatpush.bf16.msrb.mxu1 %v5508_v11  ;;  %3078 = vmatpush.bf16.msrb.mxu2 %v5796_v12  ;;  %v6314_v42 = vld [vmem:[#allocation9 + $0x4e4] sm:$0xf0]  ;;  %v4933_v11 = vld [vmem:[#allocation9 + $0x128] sm:$0xf0] }
 0x270   : > { %v5699_v40 = vld [vmem:[#allocation9 + $0x708] sm:$0xf]  ;;  %v5412_v0 = vor.u32 %v6314_v42, %v5411_v7  ;;  %v6262_v12 = vld [vmem:[#allocation9 + $0x34c] sm:$0xf]  ;;  %v4936_v19 = vor.u32 %v6190_v8, %v4933_v11  ;;  %v6219_v8 = vld [vmem:[#allocation9 + $0x1ec] sm:$0xf0] }
 0x271   : > { %v6386_v44 = vld [vmem:[#allocation9 + $0x724] sm:$0xf0]  ;;  %v5157_v39 = vld [vmem:[#allocation9 + $0x2e8] sm:$0xf0] }
 0x272   : > { %3045 = vmatpush.bf16.msra.mxu3 %v4836_v20  ;;  %3057 = vmatpush.bf16.msrb.mxu0 %v5124_v21  ;;  %v5700_v4 = vor.u32 %v6386_v44, %v5699_v40  ;;  %v5379_v50 = vld [vmem:[#allocation9 + $0x488] sm:$0xf]  ;;  %v5224_v20 = vor.u32 %v6262_v12, %v5221_v13  ;;  %v6334_v7 = vld [vmem:[#allocation9 + $0x58c] sm:$0xf] }
 0x273   : > { %3067 = vmatpush.bf16.msrb.mxu1 %v5476_v36  ;;  %3079 = vmatpush.bf16.msrb.mxu2 %v5764_v18  ;;  %v6306_v10 = vld [vmem:[#allocation9 + $0x4a4] sm:$0xf0]  ;;  %v4901_v36 = vld [vmem:[#allocation9 + $0xe8] sm:$0xf0] }
 0x274   : > { %v5667_v51 = vld [vmem:[#allocation9 + $0x6c8] sm:$0xf]  ;;  %v5380_v56 = vor.u32 %v6306_v10, %v5379_v50  ;;  %v6254_v18 = vld [vmem:[#allocation9 + $0x30c] sm:$0xf]  ;;  %v4904_v41 = vor.u32 %v6182_v24, %v4901_v36  ;;  %v5003_v24 = vld [vmem:[#allocation9 + $0x190] sm:$0xf] }
 0x275   : > { %v6378_v52 = vld [vmem:[#allocation9 + $0x6e4] sm:$0xf0]  ;;  %v5192_v31 = vor.u32 %v6254_v18, %v5189_v27  ;;  %v5509_v42 = vld [vmem:[#allocation9 + $0x5a8] sm:$0xf0]  ;;  %v6211_v36 = vld [vmem:[#allocation9 + $0x1ac] sm:$0xf0] }
 0x276   : > { %3046 = vmatpush.bf16.msra.mxu3 %v4804_v32  ;;  %3058 = vmatpush.bf16.msrb.mxu0 %v5092_v3  ;;  %v5668_v58 = vor.u32 %v6378_v52, %v5667_v51  ;;  %v5347_v60 = vld [vmem:[#allocation9 + $0x448] sm:$0xf]  ;;  %v6174_v3 = vld [vmem:[#allocation9 + $0x8c] sm:$0xf]  ;;  %v4840_v52 = vor.u32 %v6166_v46, %v4837_v48  ;;  %v5291_v18 = vld [vmem:[#allocation9 + $0x3d0] sm:$0xf] }
 0x277   : > { %3068 = vmatpush.bf16.msrb.mxu1 %v5444_v34  ;;  %3080 = vmatpush.bf16.msrb.mxu2 %v5732_v35  ;;  %v6298_v61 = vld [vmem:[#allocation9 + $0x464] sm:$0xf0]  ;;  %v5544_v34 = vor.u32 %v6342_v28, %v5541_v16  ;;  %v6246_v35 = vld [vmem:[#allocation9 + $0x2cc] sm:$0xf]  ;;  %v4872_v45 = vor.u32 %v6174_v3, %v4869_v33  ;;  %v6283_v27 = vld [vmem:[#allocation9 + $0x3ec] sm:$0xf0] }
 0x278   : > { %3021 = vmatmul.bf16.vlgmr.msra.gmra.mxu1 %v7322_v23  ;;  %v5635_v2 = vld [vmem:[#allocation9 + $0x688] sm:$0xf]  ;;  %v5348_v14 = vor.u32 %v6298_v61, %v5347_v60  ;;  %v5797_v40 = vld [vmem:[#allocation9 + $0x7e8] sm:$0xf0]  ;;  %v5160_v6 = vor.u32 %v6246_v35, %v5157_v39  ;;  %v4971_v33 = vld [vmem:[#allocation9 + $0x150] sm:$0xf] }
 0x279   : > { %3047 = vmatmul.bf16.vlgmr.msra.gmra.mxu3 %v7305_v57  ;;  %v6370_v5 = vld [vmem:[#allocation9 + $0x6a4] sm:$0xf0]  ;;  %v5125_v50 = vld [vmem:[#allocation9 + $0x2a8] sm:$0xf0]  ;;  %v5259_v35 = vld [vmem:[#allocation9 + $0x390] sm:$0xf] }
 0x27a   : > { %3091 = vmatpush.bf16.msrb.mxu3 %v5032_v43  ;;  %3059 = vmatpush.bf16.msrb.mxu0 %v5060_v49  ;;  %v5636_v59 = vor.u32 %v6370_v5, %v5635_v2  ;;  %v5315_v37 = vld [vmem:[#allocation9 + $0x408] sm:$0xf]  ;;  %v6406_v43 = vld [vmem:[#allocation9 + $0x7cc] sm:$0xf]  ;;  %v5512_v49 = vor.u32 %v6334_v7, %v5509_v42  ;;  %v5035_v5 = vld [vmem:[#allocation9 + $0x1d0] sm:$0xf] }
 0x27b   : > { %3069 = vmatpush.bf16.msrb.mxu1 %v5412_v0  ;;  %3081 = vmatpush.bf16.msrb.mxu2 %v5700_v4  ;;  %v6290_v17 = vld [vmem:[#allocation9 + $0x424] sm:$0xf0]  ;;  %v5800_v0 = vor.u32 %v6406_v43, %v5797_v40  ;;  %v6238_v4 = vld [vmem:[#allocation9 + $0x28c] sm:$0xf]  ;;  %v6275_v39 = vld [vmem:[#allocation9 + $0x3ac] sm:$0xf0] }
 0x27c   : > { %v5603_v21 = vld [vmem:[#allocation9 + $0x648] sm:$0xf]  ;;  %v5316_v29 = vor.u32 %v6290_v17, %v5315_v37  ;;  %v6326_v10 = vld [vmem:[#allocation9 + $0x54c] sm:$0xf]  ;;  %v5128_v54 = vor.u32 %v6238_v4, %v5125_v50  ;;  %v4939_v48 = vld [vmem:[#allocation9 + $0x110] sm:$0xf] }
 0x27d   : > { %3034 = vmatmul.bf16.vlgmr.msra.gmra.mxu2 %v7326_v9  ;;  %3060 = vmatmul.bf16.vlgmr.msrb.gmra.mxu0 %v7310_v15  ;;  %v6362_v22 = vld [vmem:[#allocation9 + $0x664] sm:$0xf0]  ;;  %v5765_v51 = vld [vmem:[#allocation9 + $0x7a8] sm:$0xf0]  ;;  %v6267_v4 = vld [vmem:[#allocation9 + $0x36c] sm:$0xf0] }
 0x27e   : > { %3092 = vmatpush.bf16.msrb.mxu3 %v5000_v38  ;;  %3104 = vmatpush.bf16.msra.mxu0 %v5288_v53  ;;  %v5604_v30 = vor.u32 %v6362_v22, %v5603_v21  ;;  %v5571_v26 = vld [vmem:[#allocation9 + $0x608] sm:$0xf]  ;;  %v5477_v38 = vld [vmem:[#allocation9 + $0x568] sm:$0xf0] }
 0x27f   : > { %3070 = vmatpush.bf16.msrb.mxu1 %v5380_v56  ;;  %3082 = vmatpush.bf16.msrb.mxu2 %v5668_v58  ;;  %v6354_v32 = vld [vmem:[#allocation9 + $0x624] sm:$0xf0]  ;;  %v6398_v53 = vld [vmem:[#allocation9 + $0x78c] sm:$0xf]  ;;  %v5480_v55 = vor.u32 %v6326_v10, %v5477_v38 }
 0x280   : > { %v5572_v44 = vor.u32 %v6354_v32, %v5571_v26  ;;  %v4805_v47 = vld [vmem:[#allocation9 + $0x28] sm:$0xf0]  ;;  %v5768_v56 = vor.u32 %v6398_v53, %v5765_v51 }
 0x281   : > { %v6230_v58 = vld [vmem:[#allocation9 + $0x24c] sm:$0xf]  ;;  %v4808_v11 = vor.u32 %v6158_v25, %v4805_v47  ;;  %v4907_v47 = vld [vmem:[#allocation9 + $0xd0] sm:$0xf] }
 0x282   : > { %3093 = vmatpush.bf16.msrb.mxu3 %v4968_v62  ;;  %3105 = vmatpush.bf16.msra.mxu0 %v5256_v1  ;;  %v5093_v60 = vld [vmem:[#allocation9 + $0x268] sm:$0xf0] }
 0x283   : > { %3071 = vmatpush.bf16.msrb.mxu1 %v5348_v14  ;;  %3083 = vmatpush.bf16.msrb.mxu2 %v5636_v59  ;;  %v6318_v61 = vld [vmem:[#allocation9 + $0x50c] sm:$0xf]  ;;  %v5096_v12 = vor.u32 %v6230_v58, %v5093_v60  ;;  %v6259_v58 = vld [vmem:[#allocation9 + $0x32c] sm:$0xf0] }
 0x284   : > { %v5445_v62 = vld [vmem:[#allocation9 + $0x528] sm:$0xf0]  ;;  %v5547_v60 = vld [vmem:[#allocation9 + $0x5d0] sm:$0xf] }
 0x285   : > { %v6390_v1 = vld [vmem:[#allocation9 + $0x74c] sm:$0xf]  ;;  %v5448_v14 = vor.u32 %v6318_v61, %v5445_v62  ;;  %v6347_v61 = vld [vmem:[#allocation9 + $0x5ec] sm:$0xf0] }
 0x286   : > { %3094 = vmatpush.bf16.msrb.mxu3 %v4936_v19  ;;  %3106 = vmatpush.bf16.msra.mxu0 %v5224_v20  ;;  %v5733_v2 = vld [vmem:[#allocation9 + $0x768] sm:$0xf0]  ;;  %v5036_v20 = vor.u32 %v6219_v8, %v5035_v5 }
 0x287   : > { %3072 = vmatpush.bf16.msrb.mxu1 %v5316_v29  ;;  %3084 = vmatpush.bf16.msrb.mxu2 %v5604_v30  ;;  %v6222_v13 = vld [vmem:[#allocation9 + $0x20c] sm:$0xf]  ;;  %v5736_v59 = vor.u32 %v6390_v1, %v5733_v2 }
 0x288   : > { %v5061_v37 = vld [vmem:[#allocation9 + $0x228] sm:$0xf0] }
 0x289   : > { %v6310_v17 = vld [vmem:[#allocation9 + $0x4cc] sm:$0xf]  ;;  %v5064_v28 = vor.u32 %v6222_v13, %v5061_v37  ;;  %v6179_v13 = vld [vmem:[#allocation9 + $0xac] sm:$0xf0] }
 0x28a   : > { %3095 = vmatpush.bf16.msrb.mxu3 %v4904_v41  ;;  %3107 = vmatpush.bf16.msra.mxu0 %v5192_v31  ;;  %v5413_v19 = vld [vmem:[#allocation9 + $0x4e8] sm:$0xf0]  ;;  %v5004_v41 = vor.u32 %v6211_v36, %v5003_v24  ;;  %v5292_v31 = vor.u32 %v6283_v27, %v5291_v18  ;;  %v6251_v37 = vld [vmem:[#allocation9 + $0x2ec] sm:$0xf0] }
 0x28b   : > { %3117 = vmatpush.bf16.msra.mxu1 %v5544_v34  ;;  %3085 = vmatpush.bf16.msrb.mxu2 %v5572_v44  ;;  %v6382_v21 = vld [vmem:[#allocation9 + $0x70c] sm:$0xf]  ;;  %v5416_v16 = vor.u32 %v6310_v17, %v5413_v19  ;;  %v6203_v34 = vld [vmem:[#allocation9 + $0x16c] sm:$0xf0] }
 0x28c   : > { %3073 = vmatmul.bf16.vlgmr.msrb.gmra.mxu1 %v7322_v23  ;;  %v5701_v22 = vld [vmem:[#allocation9 + $0x728] sm:$0xf0]  ;;  %v4972_v44 = vor.u32 %v6203_v34, %v4971_v33  ;;  %v5515_v17 = vld [vmem:[#allocation9 + $0x590] sm:$0xf] }
 0x28d   : > { %v5704_v29 = vor.u32 %v6382_v21, %v5701_v22  ;;  %v6302_v30 = vld [vmem:[#allocation9 + $0x48c] sm:$0xf]  ;;  %v6339_v19 = vld [vmem:[#allocation9 + $0x5ac] sm:$0xf0] }
 0x28e   : > { %3096 = vmatpush.bf16.msrb.mxu3 %v4872_v45  ;;  %3108 = vmatpush.bf16.msra.mxu0 %v5160_v6  ;;  %v5381_v26 = vld [vmem:[#allocation9 + $0x4a8] sm:$0xf0]  ;;  %v5260_v45 = vor.u32 %v6275_v39, %v5259_v35  ;;  %v6411_v21 = vld [vmem:[#allocation9 + $0x7ec] sm:$0xf0] }
 0x28f   : > { %3118 = vmatpush.bf16.msra.mxu1 %v5512_v49  ;;  %3130 = vmatpush.bf16.msra.mxu2 %v5800_v0  ;;  %v6374_v32 = vld [vmem:[#allocation9 + $0x6cc] sm:$0xf]  ;;  %v5384_v7 = vor.u32 %v6302_v30, %v5381_v26  ;;  %v6195_v49 = vld [vmem:[#allocation9 + $0x12c] sm:$0xf0] }
 0x290   : > { %3086 = vmatmul.bf16.vlgmr.msrb.gmra.mxu2 %v7326_v9  ;;  %v5669_v3 = vld [vmem:[#allocation9 + $0x6e8] sm:$0xf0]  ;;  %v5227_v0 = vld [vmem:[#allocation9 + $0x350] sm:$0xf]  ;;  %v4940_v51 = vor.u32 %v6195_v49, %v4939_v48  ;;  %v5037_v48 = vld [vmem:[#allocation9 + $0x1f0] sm:$0xf0] }
 0x291   : > { %v5672_v42 = vor.u32 %v6374_v32, %v5669_v3  ;;  %v6294_v43 = vld [vmem:[#allocation9 + $0x44c] sm:$0xf]  ;;  %v4843_v18 = vld [vmem:[#allocation9 + $0x50] sm:$0xf] }
 0x292   : > { %3097 = vmatpush.bf16.msrb.mxu3 %v4840_v52  ;;  %3109 = vmatpush.bf16.msra.mxu0 %v5128_v54  ;;  %v5349_v40 = vld [vmem:[#allocation9 + $0x468] sm:$0xf0]  ;;  %v5228_v52 = vor.u32 %v6267_v4, %v5227_v0  ;;  %v6171_v27 = vld [vmem:[#allocation9 + $0x6c] sm:$0xf0] }
 0x293   : > { %3119 = vmatpush.bf16.msra.mxu1 %v5480_v55  ;;  %3131 = vmatpush.bf16.msra.mxu2 %v5768_v56  ;;  %v6366_v6 = vld [vmem:[#allocation9 + $0x68c] sm:$0xf]  ;;  %v5352_v50 = vor.u32 %v6294_v43, %v5349_v40  ;;  %v6187_v55 = vld [vmem:[#allocation9 + $0xec] sm:$0xf0]  ;;  %v4844_v3 = vor.u32 %v6171_v27, %v4843_v18  ;;  %v6191_v27 = vld [vmem:[#allocation9 + $0x114] sm:$0xf] }
 0x294   : > { %v5637_v46 = vld [vmem:[#allocation9 + $0x6a8] sm:$0xf0]  ;;  %v5195_v56 = vld [vmem:[#allocation9 + $0x310] sm:$0xf]  ;;  %v4908_v5 = vor.u32 %v6187_v55, %v4907_v47  ;;  %v6207_v47 = vld [vmem:[#allocation9 + $0x194] sm:$0xf] }
 0x295   : > { %v5640_v10 = vor.u32 %v6366_v6, %v5637_v46  ;;  %v6286_v38 = vld [vmem:[#allocation9 + $0x40c] sm:$0xf]  ;;  %v5196_v8 = vor.u32 %v6259_v58, %v5195_v56  ;;  %v6243_v30 = vld [vmem:[#allocation9 + $0x2ac] sm:$0xf0]  ;;  %v6215_v46 = vld [vmem:[#allocation9 + $0x1d4] sm:$0xf] }
 0x296   : > { %3098 = vmatpush.bf16.msrb.mxu3 %v4808_v11  ;;  %3110 = vmatpush.bf16.msra.mxu0 %v5096_v12  ;;  %v5317_v53 = vld [vmem:[#allocation9 + $0x428] sm:$0xf0]  ;;  %v4875_v12 = vld [vmem:[#allocation9 + $0x90] sm:$0xf]  ;;  %v5005_v55 = vld [vmem:[#allocation9 + $0x1b0] sm:$0xf0] }
 0x297   : > { %3120 = vmatpush.bf16.msra.mxu1 %v5448_v14  ;;  %3132 = vmatpush.bf16.msra.mxu2 %v5736_v59  ;;  %v6358_v54 = vld [vmem:[#allocation9 + $0x64c] sm:$0xf]  ;;  %v5320_v62 = vor.u32 %v6286_v38, %v5317_v53  ;;  %v5548_v14 = vor.u32 %v6347_v61, %v5547_v60  ;;  %v5163_v59 = vld [vmem:[#allocation9 + $0x2d0] sm:$0xf]  ;;  %v4876_v24 = vor.u32 %v6179_v13, %v4875_v12  ;;  %v6279_v56 = vld [vmem:[#allocation9 + $0x3d4] sm:$0xf] }
 0x298   : > { %v5605_v25 = vld [vmem:[#allocation9 + $0x668] sm:$0xf0]  ;;  %v5164_v36 = vor.u32 %v6251_v37, %v5163_v59  ;;  %v5483_v26 = vld [vmem:[#allocation9 + $0x550] sm:$0xf]  ;;  %v5293_v58 = vld [vmem:[#allocation9 + $0x3f0] sm:$0xf0] }
 0x299   : > { %3099 = vmatmul.bf16.vlgmr.msrb.gmra.mxu3 %v7305_v57  ;;  %v5608_v1 = vor.u32 %v6358_v54, %v5605_v25  ;;  %v6350_v2 = vld [vmem:[#allocation9 + $0x60c] sm:$0xf]  ;;  %v6403_v32 = vld [vmem:[#allocation9 + $0x7ac] sm:$0xf0]  ;;  %v6199_v13 = vld [vmem:[#allocation9 + $0x154] sm:$0xf] }
 0x29a   : > { %3143 = vmatpush.bf16.msra.mxu3 %v5036_v20  ;;  %3111 = vmatpush.bf16.msra.mxu0 %v5064_v28  ;;  %v5573_v11 = vld [vmem:[#allocation9 + $0x628] sm:$0xf0]  ;;  %v5803_v20 = vld [vmem:[#allocation9 + $0x7d0] sm:$0xf]  ;;  %v5516_v28 = vor.u32 %v6339_v19, %v5515_v17  ;;  %v6271_v59 = vld [vmem:[#allocation9 + $0x394] sm:$0xf] }
 0x29b   : > { %3121 = vmatpush.bf16.msra.mxu1 %v5416_v16  ;;  %3133 = vmatpush.bf16.msra.mxu2 %v5704_v29  ;;  %v5576_v22 = vor.u32 %v6350_v2, %v5573_v11  ;;  %v5804_v16 = vor.u32 %v6411_v21, %v5803_v20  ;;  %v5131_v29 = vld [vmem:[#allocation9 + $0x290] sm:$0xf]  ;;  %v5261_v37 = vld [vmem:[#allocation9 + $0x3b0] sm:$0xf0] }
 0x29c   : > { %v5132_v33 = vor.u32 %v6243_v30, %v5131_v29  ;;  %v4811_v34 = vld [vmem:[#allocation9 + $0x10] sm:$0xf]  ;;  %v5229_v29 = vld [vmem:[#allocation9 + $0x370] sm:$0xf0] }
 0x29d   : > { %3112 = vmatmul.bf16.vlgmr.msra.gmra.mxu0 %v7310_v15  ;;  %v6163_v35 = vld [vmem:[#allocation9 + $0x2c] sm:$0xf0] }
 0x29e   : > { %3144 = vmatpush.bf16.msra.mxu3 %v5004_v41  ;;  %3156 = vmatpush.bf16.msrb.mxu0 %v5292_v31  ;;  %v6331_v41 = vld [vmem:[#allocation9 + $0x56c] sm:$0xf0]  ;;  %v4812_v49 = vor.u32 %v6163_v35, %v4811_v34  ;;  %v6183_v35 = vld [vmem:[#allocation9 + $0xd4] sm:$0xf] }
 0x29f   : > { %3122 = vmatpush.bf16.msra.mxu1 %v5384_v7  ;;  %3134 = vmatpush.bf16.msra.mxu2 %v5672_v42  ;;  %v5771_v31 = vld [vmem:[#allocation9 + $0x790] sm:$0xf]  ;;  %v5484_v39 = vor.u32 %v6331_v41, %v5483_v26 }
 0x2a0   : > { %v5772_v7 = vor.u32 %v6403_v32, %v5771_v31  ;;  %v5099_v42 = vld [vmem:[#allocation9 + $0x250] sm:$0xf] }
 0x2a1   : > { %v6235_v43 = vld [vmem:[#allocation9 + $0x26c] sm:$0xf0] }
 0x2a2   : > { %3145 = vmatpush.bf16.msra.mxu3 %v4972_v44  ;;  %3157 = vmatpush.bf16.msrb.mxu0 %v5260_v45  ;;  %v5451_v40 = vld [vmem:[#allocation9 + $0x510] sm:$0xf]  ;;  %v5100_v0 = vor.u32 %v6235_v43, %v5099_v42  ;;  %v5197_v42 = vld [vmem:[#allocation9 + $0x330] sm:$0xf0] }
 0x2a3   : > { %3123 = vmatpush.bf16.msra.mxu1 %v5352_v50  ;;  %3135 = vmatpush.bf16.msra.mxu2 %v5640_v10  ;;  %v6323_v44 = vld [vmem:[#allocation9 + $0x52c] sm:$0xf0]  ;;  %v6343_v43 = vld [vmem:[#allocation9 + $0x5d4] sm:$0xf] }
 0x2a4   : > { %v5739_v45 = vld [vmem:[#allocation9 + $0x750] sm:$0xf]  ;;  %v5452_v50 = vor.u32 %v6323_v44, %v5451_v40  ;;  %v5549_v40 = vld [vmem:[#allocation9 + $0x5f0] sm:$0xf0] }
 0x2a5   : > { %v6395_v6 = vld [vmem:[#allocation9 + $0x76c] sm:$0xf0] }
 0x2a6   : > { %3146 = vmatpush.bf16.msra.mxu3 %v4940_v51  ;;  %3158 = vmatpush.bf16.msrb.mxu0 %v5228_v52  ;;  %v5067_v4 = vld [vmem:[#allocation9 + $0x210] sm:$0xf]  ;;  %v5740_v10 = vor.u32 %v6395_v6, %v5739_v45  ;;  %v5040_v52 = vor.u32 %v6215_v46, %v5037_v48 }
 0x2a7   : > { %3124 = vmatpush.bf16.msra.mxu1 %v5320_v62  ;;  %3136 = vmatpush.bf16.msra.mxu2 %v5608_v1  ;;  %v6227_v38 = vld [vmem:[#allocation9 + $0x22c] sm:$0xf0] }
 0x2a8   : > { %v5419_v53 = vld [vmem:[#allocation9 + $0x4d0] sm:$0xf]  ;;  %v5068_v60 = vor.u32 %v6227_v38, %v5067_v4  ;;  %v4877_v4 = vld [vmem:[#allocation9 + $0xb0] sm:$0xf0] }
 0x2a9   : > { %v6315_v51 = vld [vmem:[#allocation9 + $0x4ec] sm:$0xf0]  ;;  %v5165_v38 = vld [vmem:[#allocation9 + $0x2f0] sm:$0xf0] }
 0x2aa   : > { %3147 = vmatpush.bf16.msra.mxu3 %v4908_v5  ;;  %3159 = vmatpush.bf16.msrb.mxu0 %v5196_v8  ;;  %v5707_v54 = vld [vmem:[#allocation9 + $0x710] sm:$0xf]  ;;  %v5420_v61 = vor.u32 %v6315_v51, %v5419_v53  ;;  %v5008_v5 = vor.u32 %v6207_v47, %v5005_v55  ;;  %v5296_v8 = vor.u32 %v6279_v56, %v5293_v58  ;;  %v6335_v53 = vld [vmem:[#allocation9 + $0x594] sm:$0xf] }
 0x2ab   : > { %3169 = vmatpush.bf16.msrb.mxu1 %v5548_v14  ;;  %3137 = vmatpush.bf16.msra.mxu2 %v5576_v22  ;;  %v6387_v25 = vld [vmem:[#allocation9 + $0x72c] sm:$0xf0]  ;;  %v4973_v14 = vld [vmem:[#allocation9 + $0x170] sm:$0xf0] }
 0x2ac   : > { %3125 = vmatmul.bf16.vlgmr.msra.gmra.mxu1 %v7322_v23  ;;  %v5708_v62 = vor.u32 %v6387_v25, %v5707_v54  ;;  %v5387_v1 = vld [vmem:[#allocation9 + $0x490] sm:$0xf]  ;;  %v4976_v22 = vor.u32 %v6199_v13, %v4973_v14  ;;  %v5517_v51 = vld [vmem:[#allocation9 + $0x5b0] sm:$0xf0] }
 0x2ad   : > { %v6307_v2 = vld [vmem:[#allocation9 + $0x4ac] sm:$0xf0]  ;;  %v5805_v54 = vld [vmem:[#allocation9 + $0x7f0] sm:$0xf0] }
 0x2ae   : > { %3148 = vmatpush.bf16.msra.mxu3 %v4876_v24  ;;  %3160 = vmatpush.bf16.msrb.mxu0 %v5164_v36  ;;  %v5675_v11 = vld [vmem:[#allocation9 + $0x6d0] sm:$0xf]  ;;  %v5388_v17 = vor.u32 %v6307_v2, %v5387_v1  ;;  %v5264_v24 = vor.u32 %v6271_v59, %v5261_v37  ;;  %v6167_v56 = vld [vmem:[#allocation9 + $0x54] sm:$0xf] }
 0x2af   : > { %3170 = vmatpush.bf16.msrb.mxu1 %v5516_v28  ;;  %3182 = vmatpush.bf16.msrb.mxu2 %v5804_v16  ;;  %v6379_v12 = vld [vmem:[#allocation9 + $0x6ec] sm:$0xf0]  ;;  %v4941_v28 = vld [vmem:[#allocation9 + $0x130] sm:$0xf0] }
 0x2b0   : > { %3138 = vmatmul.bf16.vlgmr.msra.gmra.mxu2 %v7326_v9  ;;  %v5676_v19 = vor.u32 %v6379_v12, %v5675_v11  ;;  %v5355_v20 = vld [vmem:[#allocation9 + $0x450] sm:$0xf]  ;;  %v6263_v16 = vld [vmem:[#allocation9 + $0x354] sm:$0xf]  ;;  %v4944_v32 = vor.u32 %v6191_v27, %v4941_v28  ;;  %v6220_v27 = vld [vmem:[#allocation9 + $0x1f4] sm:$0xf0] }
 0x2b1   : > { %v6299_v21 = vld [vmem:[#allocation9 + $0x46c] sm:$0xf0]  ;;  %v4845_v58 = vld [vmem:[#allocation9 + $0x70] sm:$0xf0] }
 0x2b2   : > { %3149 = vmatpush.bf16.msra.mxu3 %v4844_v3  ;;  %3161 = vmatpush.bf16.msrb.mxu0 %v5132_v33  ;;  %v5643_v36 = vld [vmem:[#allocation9 + $0x690] sm:$0xf]  ;;  %v5356_v30 = vor.u32 %v6299_v21, %v5355_v20  ;;  %v5232_v3 = vor.u32 %v6263_v16, %v5229_v29  ;;  %v5133_v1 = vld [vmem:[#allocation9 + $0x2b0] sm:$0xf0]  ;;  %v4848_v12 = vor.u32 %v6167_v56, %v4845_v58  ;;  %v4947_v58 = vld [vmem:[#allocation9 + $0x118] sm:$0xf] }
 0x2b3   : > { %3171 = vmatpush.bf16.msrb.mxu1 %v5484_v39  ;;  %3183 = vmatpush.bf16.msrb.mxu2 %v5772_v7  ;;  %v6371_v18 = vld [vmem:[#allocation9 + $0x6ac] sm:$0xf0]  ;;  %v4909_v39 = vld [vmem:[#allocation9 + $0xf0] sm:$0xf0] }
 0x2b4   : > { %v5644_v26 = vor.u32 %v6371_v18, %v5643_v36  ;;  %v5323_v41 = vld [vmem:[#allocation9 + $0x410] sm:$0xf]  ;;  %v6255_v7 = vld [vmem:[#allocation9 + $0x314] sm:$0xf]  ;;  %v4912_v46 = vor.u32 %v6183_v35, %v4909_v39  ;;  %v5043_v18 = vld [vmem:[#allocation9 + $0x1d8] sm:$0xf] }
 0x2b5   : > { %v6291_v31 = vld [vmem:[#allocation9 + $0x42c] sm:$0xf0]  ;;  %v5200_v48 = vor.u32 %v6255_v7, %v5197_v42  ;;  %v6327_v2 = vld [vmem:[#allocation9 + $0x554] sm:$0xf]  ;;  %v5011_v35 = vld [vmem:[#allocation9 + $0x198] sm:$0xf] }
 0x2b6   : > { %3150 = vmatpush.bf16.msra.mxu3 %v4812_v49  ;;  %3162 = vmatpush.bf16.msrb.mxu0 %v5100_v0  ;;  %v5611_v33 = vld [vmem:[#allocation9 + $0x650] sm:$0xf]  ;;  %v5324_v44 = vor.u32 %v6291_v31, %v5323_v41  ;;  %v6175_v0 = vld [vmem:[#allocation9 + $0x94] sm:$0xf]  ;;  %v6212_v39 = vld [vmem:[#allocation9 + $0x1b4] sm:$0xf0] }
 0x2b7   : > { %3172 = vmatpush.bf16.msrb.mxu1 %v5452_v50  ;;  %3184 = vmatpush.bf16.msrb.mxu2 %v5740_v10  ;;  %v6363_v34 = vld [vmem:[#allocation9 + $0x66c] sm:$0xf0]  ;;  %v5552_v50 = vor.u32 %v6343_v43, %v5549_v40  ;;  %v6247_v10 = vld [vmem:[#allocation9 + $0x2d4] sm:$0xf]  ;;  %v4880_v47 = vor.u32 %v6175_v0, %v4877_v4  ;;  %v5299_v7 = vld [vmem:[#allocation9 + $0x3d8] sm:$0xf] }
 0x2b8   : > { %v5612_v45 = vor.u32 %v6363_v34, %v5611_v33  ;;  %v5579_v6 = vld [vmem:[#allocation9 + $0x610] sm:$0xf]  ;;  %v5168_v55 = vor.u32 %v6247_v10, %v5165_v38  ;;  %v5773_v11 = vld [vmem:[#allocation9 + $0x7b0] sm:$0xf0]  ;;  %v6284_v42 = vld [vmem:[#allocation9 + $0x3f4] sm:$0xf0] }
 0x2b9   : > { %3151 = vmatmul.bf16.vlgmr.msra.gmra.mxu3 %v7305_v57  ;;  %v6355_v49 = vld [vmem:[#allocation9 + $0x62c] sm:$0xf0]  ;;  %v6159_v14 = vld [vmem:[#allocation9 + $0x14] sm:$0xf]  ;;  %v4979_v4 = vld [vmem:[#allocation9 + $0x158] sm:$0xf] }
 0x2ba   : > { %3195 = vmatpush.bf16.msrb.mxu3 %v5040_v52  ;;  %3163 = vmatpush.bf16.msrb.mxu0 %v5068_v60  ;;  %v6407_v52 = vld [vmem:[#allocation9 + $0x7d4] sm:$0xf]  ;;  %v5580_v25 = vor.u32 %v6355_v49, %v5579_v6  ;;  %v5520_v60 = vor.u32 %v6335_v53, %v5517_v51  ;;  %v5267_v10 = vld [vmem:[#allocation9 + $0x398] sm:$0xf] }
 0x2bb   : > { %3173 = vmatpush.bf16.msrb.mxu1 %v5420_v61  ;;  %3185 = vmatpush.bf16.msrb.mxu2 %v5708_v62  ;;  %v5808_v61 = vor.u32 %v6407_v52, %v5805_v54  ;;  %v6239_v62 = vld [vmem:[#allocation9 + $0x294] sm:$0xf]  ;;  %v6276_v38 = vld [vmem:[#allocation9 + $0x3b4] sm:$0xf0] }
 0x2bc   : > { %v5136_v13 = vor.u32 %v6239_v62, %v5133_v1  ;;  %v4813_v59 = vld [vmem:[#allocation9 + $0x30] sm:$0xf0]  ;;  %v6268_v62 = vld [vmem:[#allocation9 + $0x374] sm:$0xf0] }
 0x2bd   : > { %3164 = vmatmul.bf16.vlgmr.msrb.gmra.mxu0 %v7310_v15  ;;  %v5101_v20 = vld [vmem:[#allocation9 + $0x270] sm:$0xf0]  ;;  %v4816_v28 = vor.u32 %v6159_v14, %v4813_v59 }
 0x2be   : > { %3196 = vmatpush.bf16.msrb.mxu3 %v5008_v5  ;;  %3208 = vmatpush.bf16.msra.mxu0 %v5296_v8  ;;  %v5485_v5 = vld [vmem:[#allocation9 + $0x570] sm:$0xf0] }
 0x2bf   : > { %3174 = vmatpush.bf16.msrb.mxu1 %v5388_v17  ;;  %3186 = vmatpush.bf16.msrb.mxu2 %v5676_v19  ;;  %v6399_v8 = vld [vmem:[#allocation9 + $0x794] sm:$0xf]  ;;  %v5488_v37 = vor.u32 %v6327_v2, %v5485_v5 }
 0x2c0   : > { %v5776_v17 = vor.u32 %v6399_v8, %v5773_v11  ;;  %v6231_v19 = vld [vmem:[#allocation9 + $0x254] sm:$0xf] }
 0x2c1   : > { %v6319_v21 = vld [vmem:[#allocation9 + $0x514] sm:$0xf]  ;;  %v5104_v16 = vor.u32 %v6231_v19, %v5101_v20  ;;  %v6188_v19 = vld [vmem:[#allocation9 + $0xf4] sm:$0xf0] }
 0x2c2   : > { %3197 = vmatpush.bf16.msrb.mxu3 %v4976_v22  ;;  %3209 = vmatpush.bf16.msra.mxu0 %v5264_v24  ;;  %v5453_v22 = vld [vmem:[#allocation9 + $0x530] sm:$0xf0]  ;;  %v5203_v20 = vld [vmem:[#allocation9 + $0x318] sm:$0xf] }
 0x2c3   : > { %3175 = vmatpush.bf16.msrb.mxu1 %v5356_v30  ;;  %3187 = vmatpush.bf16.msrb.mxu2 %v5644_v26  ;;  %v6391_v24 = vld [vmem:[#allocation9 + $0x754] sm:$0xf]  ;;  %v5456_v30 = vor.u32 %v6319_v21, %v5453_v22  ;;  %v6260_v21 = vld [vmem:[#allocation9 + $0x334] sm:$0xf0] }
 0x2c4   : > { %v5741_v36 = vld [vmem:[#allocation9 + $0x770] sm:$0xf0]  ;;  %v5555_v22 = vld [vmem:[#allocation9 + $0x5d8] sm:$0xf] }
 0x2c5   : > { %v6223_v29 = vld [vmem:[#allocation9 + $0x214] sm:$0xf]  ;;  %v5744_v26 = vor.u32 %v6391_v24, %v5741_v36  ;;  %v6348_v24 = vld [vmem:[#allocation9 + $0x5f4] sm:$0xf0] }
 0x2c6   : > { %3198 = vmatpush.bf16.msrb.mxu3 %v4944_v32  ;;  %3210 = vmatpush.bf16.msra.mxu0 %v5232_v3  ;;  %v5069_v41 = vld [vmem:[#allocation9 + $0x230] sm:$0xf0]  ;;  %v5044_v3 = vor.u32 %v6220_v27, %v5043_v18 }
 0x2c7   : > { %3176 = vmatpush.bf16.msrb.mxu1 %v5324_v44  ;;  %3188 = vmatpush.bf16.msrb.mxu2 %v5612_v45  ;;  %v6311_v31 = vld [vmem:[#allocation9 + $0x4d4] sm:$0xf]  ;;  %v5072_v43 = vor.u32 %v6223_v29, %v5069_v41  ;;  %v5556_v41 = vor.u32 %v6348_v24, %v5555_v22  ;;  %v6228_v22 = vld [vmem:[#allocation9 + $0x234] sm:$0xf0] }
 0x2c8   : > { %v5421_v32 = vld [vmem:[#allocation9 + $0x4f0] sm:$0xf0]  ;;  %v5427_v24 = vld [vmem:[#allocation9 + $0x4d8] sm:$0xf] }
 0x2c9   : > { %v6383_v33 = vld [vmem:[#allocation9 + $0x714] sm:$0xf]  ;;  %v5424_v40 = vor.u32 %v6311_v31, %v5421_v32  ;;  %v5171_v31 = vld [vmem:[#allocation9 + $0x2d8] sm:$0xf] }
 0x2ca   : > { %3199 = vmatpush.bf16.msrb.mxu3 %v4912_v46  ;;  %3211 = vmatpush.bf16.msra.mxu0 %v5200_v48  ;;  %v5709_v34 = vld [vmem:[#allocation9 + $0x730] sm:$0xf0]  ;;  %v5012_v46 = vor.u32 %v6212_v39, %v5011_v35  ;;  %v5300_v48 = vor.u32 %v6284_v42, %v5299_v7  ;;  %v6252_v32 = vld [vmem:[#allocation9 + $0x2f4] sm:$0xf0]  ;;  %v7350_v7 = vld [vmem:[#allocation10 + $0x7] sm:$0xff] }
 0x2cb   : > { %3221 = vmatpush.bf16.msra.mxu1 %v5552_v50  ;;  %3189 = vmatpush.bf16.msrb.mxu2 %v5580_v25  ;;  %v5712_v44 = vor.u32 %v6383_v33, %v5709_v34  ;;  %v6303_v45 = vld [vmem:[#allocation9 + $0x494] sm:$0xf]  ;;  %v6204_v50 = vld [vmem:[#allocation9 + $0x174] sm:$0xf0] }
 0x2cc   : > { %3177 = vmatmul.bf16.vlgmr.msrb.gmra.mxu1 %v7322_v23  ;;  %v5389_v6 = vld [vmem:[#allocation9 + $0x4b0] sm:$0xf0]  ;;  %v4980_v25 = vor.u32 %v6204_v50, %v4979_v4  ;;  %v6340_v33 = vld [vmem:[#allocation9 + $0x5b4] sm:$0xf0] }
 0x2cd   : > { %v6375_v49 = vld [vmem:[#allocation9 + $0x6d4] sm:$0xf]  ;;  %v5392_v53 = vor.u32 %v6303_v45, %v5389_v6  ;;  %v5811_v34 = vld [vmem:[#allocation9 + $0x7d8] sm:$0xf] }
 0x2ce   : > { %3200 = vmatpush.bf16.msrb.mxu3 %v4880_v47  ;;  %3212 = vmatpush.bf16.msra.mxu0 %v5168_v55  ;;  %v5677_v0 = vld [vmem:[#allocation9 + $0x6f0] sm:$0xf0]  ;;  %v5268_v47 = vor.u32 %v6276_v38, %v5267_v10  ;;  %v6412_v35 = vld [vmem:[#allocation9 + $0x7f4] sm:$0xf0] }
 0x2cf   : > { %3222 = vmatpush.bf16.msra.mxu1 %v5520_v60  ;;  %3234 = vmatpush.bf16.msra.mxu2 %v5808_v61  ;;  %v5680_v51 = vor.u32 %v6375_v49, %v5677_v0  ;;  %v6295_v52 = vld [vmem:[#allocation9 + $0x454] sm:$0xf]  ;;  %v6196_v60 = vld [vmem:[#allocation9 + $0x134] sm:$0xf0] }
 0x2d0   : > { %3190 = vmatmul.bf16.vlgmr.msrb.gmra.mxu2 %v7326_v9  ;;  %v5357_v54 = vld [vmem:[#allocation9 + $0x470] sm:$0xf0]  ;;  %v5235_v61 = vld [vmem:[#allocation9 + $0x358] sm:$0xf]  ;;  %v4948_v11 = vor.u32 %v6196_v60, %v4947_v58 }
 0x2d1   : > { %v6367_v55 = vld [vmem:[#allocation9 + $0x694] sm:$0xf]  ;;  %v5360_v1 = vor.u32 %v6295_v52, %v5357_v54  ;;  %v6172_v45 = vld [vmem:[#allocation9 + $0x74] sm:$0xf0] }
 0x2d2   : > { %3201 = vmatpush.bf16.msrb.mxu3 %v4848_v12  ;;  %3213 = vmatpush.bf16.msra.mxu0 %v5136_v13  ;;  %v5645_v56 = vld [vmem:[#allocation9 + $0x6b0] sm:$0xf0]  ;;  %v5236_v12 = vor.u32 %v6268_v62, %v5235_v61  ;;  %v5139_v49 = vld [vmem:[#allocation9 + $0x298] sm:$0xf] }
 0x2d3   : > { %3223 = vmatpush.bf16.msra.mxu1 %v5488_v37  ;;  %3235 = vmatpush.bf16.msra.mxu2 %v5776_v17  ;;  %v5648_v2 = vor.u32 %v6367_v55, %v5645_v56  ;;  %v6287_v5 = vld [vmem:[#allocation9 + $0x414] sm:$0xf]  ;;  %v4915_v37 = vld [vmem:[#allocation9 + $0xd8] sm:$0xf] }
 0x2d4   : > { %v5325_v8 = vld [vmem:[#allocation9 + $0x430] sm:$0xf0]  ;;  %v6244_v0 = vld [vmem:[#allocation9 + $0x2b4] sm:$0xf0] }
 0x2d5   : > { %v6359_v14 = vld [vmem:[#allocation9 + $0x654] sm:$0xf]  ;;  %v5328_v36 = vor.u32 %v6287_v5, %v5325_v8  ;;  %v5491_v4 = vld [vmem:[#allocation9 + $0x558] sm:$0xf]  ;;  %v5140_v54 = vor.u32 %v6244_v0, %v5139_v49  ;;  %v6216_v8 = vld [vmem:[#allocation9 + $0x1dc] sm:$0xf] }
 0x2d6   : > { %3202 = vmatpush.bf16.msrb.mxu3 %v4816_v28  ;;  %3214 = vmatpush.bf16.msra.mxu0 %v5104_v16  ;;  %v5613_v59 = vld [vmem:[#allocation9 + $0x670] sm:$0xf0]  ;;  %v4916_v28 = vor.u32 %v6188_v19, %v4915_v37  ;;  %v5204_v16 = vor.u32 %v6260_v21, %v5203_v20  ;;  %v6332_v50 = vld [vmem:[#allocation9 + $0x574] sm:$0xf0] }
 0x2d7   : > { %3224 = vmatpush.bf16.msra.mxu1 %v5456_v30  ;;  %3236 = vmatpush.bf16.msra.mxu2 %v5744_v26  ;;  %v5616_v18 = vor.u32 %v6359_v14, %v5613_v59  ;;  %v6351_v27 = vld [vmem:[#allocation9 + $0x614] sm:$0xf]  ;;  %v4883_v30 = vld [vmem:[#allocation9 + $0x98] sm:$0xf]  ;;  %v5492_v55 = vor.u32 %v6332_v50, %v5491_v4 }
 0x2d8   : > { %v5581_v29 = vld [vmem:[#allocation9 + $0x630] sm:$0xf0]  ;;  %v6180_v26 = vld [vmem:[#allocation9 + $0xb4] sm:$0xf0] }
 0x2d9   : > { %3203 = vmatmul.bf16.vlgmr.msrb.gmra.mxu3 %v7305_v57  ;;  %v5584_v39 = vor.u32 %v6351_v27, %v5581_v29  ;;  %v4884_v42 = vor.u32 %v6180_v26, %v4883_v30  ;;  %v5779_v10 = vld [vmem:[#allocation9 + $0x798] sm:$0xf]  ;;  %v5013_v30 = vld [vmem:[#allocation9 + $0x1b8] sm:$0xf0] }
 0x2da   : > { %3247 = vmatpush.bf16.msra.mxu3 %v5044_v3  ;;  %3215 = vmatpush.bf16.msra.mxu0 %v5072_v43  ;;  %v7346_v13 = vpop.f32.mrf.mxu0  ;;  %v5523_v3 = vld [vmem:[#allocation9 + $0x598] sm:$0xf]  ;;  %v5172_v43 = vor.u32 %v6252_v32, %v5171_v31  ;;  %v6280_v26 = vld [vmem:[#allocation9 + $0x3dc] sm:$0xf] }
 0x2db   : > { %3225 = vmatpush.bf16.msra.mxu1 %v5424_v40  ;;  %3237 = vmatpush.bf16.msra.mxu2 %v5712_v44  ;;  %v7348_v17 = vpop.f32.mrf.mxu3  ;;  %v4851_v44 = vld [vmem:[#allocation9 + $0x58] sm:$0xf]  ;;  %v5524_v6 = vor.u32 %v6340_v33, %v5523_v3 }
 0x2dc   : > { %v6404_v38 = vld [vmem:[#allocation9 + $0x7b4] sm:$0xf0]  ;;  %v4852_v52 = vor.u32 %v6172_v45, %v4851_v44  ;;  %v6200_v44 = vld [vmem:[#allocation9 + $0x15c] sm:$0xf] }
 0x2dd   : > { %3216 = vmatmul.bf16.vlgmr.msra.gmra.mxu0 %v7310_v15  ;;  %v5780_v56 = vor.u32 %v6404_v38, %v5779_v10  ;;  %v5107_v58 = vld [vmem:[#allocation9 + $0x258] sm:$0xf] }
 0x2de   : > { %3248 = vmatpush.bf16.msra.mxu3 %v5012_v46  ;;  %3260 = vmatpush.bf16.msrb.mxu0 %v5300_v48  ;;  %v5812_v46 = vor.u32 %v6412_v35, %v5811_v34  ;;  %v6236_v60 = vld [vmem:[#allocation9 + $0x274] sm:$0xf0] }
 0x2df   : > { %3226 = vmatpush.bf16.msra.mxu1 %v5392_v53  ;;  %3238 = vmatpush.bf16.msra.mxu2 %v5680_v51  ;;  %v1639_v53 = vperm.slane %v7350_v7, 0  ;;  %v5459_v61 = vld [vmem:[#allocation9 + $0x518] sm:$0xf]  ;;  %v5108_v14 = vor.u32 %v6236_v60, %v5107_v58  ;;  %v1640_v58 = vperm.slane %v7350_v7, 1 }
 0x2e0   : > { %v6324_v62 = vld [vmem:[#allocation9 + $0x534] sm:$0xf0] }
 0x2e1   : > { %v2945_v5 = vadd.f32 %v7348_v17, %v1639_v53  ;;  %v5075_v37 = vld [vmem:[#allocation9 + $0x218] sm:$0xf]  ;;  %v5460_v19 = vor.u32 %v6324_v62, %v5459_v61 }
 0x2e2   : > { %3249 = vmatpush.bf16.msra.mxu3 %v4980_v25  ;;  %3261 = vmatpush.bf16.msrb.mxu0 %v5268_v47  ;;  %v2959_v40 = vpop.f32.mrf.mxu0  ;;  %v4819_v25 = vld [vmem:[#allocation9 + $0x18] sm:$0xf]  ;;  %v5076_v31 = vor.u32 %v6228_v22, %v5075_v37 }
 0x2e3   : > { %3227 = vmatpush.bf16.msra.mxu1 %v5360_v1  ;;  %3239 = vmatpush.bf16.msra.mxu2 %v5648_v2  ;;  %v2946_v48 = vpop.f32.mrf.mxu3  ;;  %v6164_v47 = vld [vmem:[#allocation9 + $0x34] sm:$0xf0] }
 0x2e4   : > { %v5747_v1 = vld [vmem:[#allocation9 + $0x758] sm:$0xf]  ;;  %v5269_v48 = vld [vmem:[#allocation9 + $0x3b8] sm:$0xf0] }
 0x2e5   : > { %v2970_v51 = vpop.f32.mrf.mxu1  ;;  %v6396_v2 = vld [vmem:[#allocation9 + $0x774] sm:$0xf0] }
 0x2e6   : > { %3250 = vmatpush.bf16.msra.mxu3 %v4948_v11  ;;  %3262 = vmatpush.bf16.msrb.mxu0 %v5236_v12  ;;  %v5045_v11 = vld [vmem:[#allocation9 + $0x1f8] sm:$0xf0]  ;;  %v4820_v12 = vor.u32 %v6164_v47, %v4819_v25  ;;  %v5748_v20 = vor.u32 %v6396_v2, %v5747_v1  ;;  %v5715_v17 = vld [vmem:[#allocation9 + $0x718] sm:$0xf] }
 0x2e7   : > { %3228 = vmatpush.bf16.msra.mxu1 %v5328_v36  ;;  %3240 = vmatpush.bf16.msra.mxu2 %v5616_v18  ;;  %v6316_v36 = vld [vmem:[#allocation9 + $0x4f4] sm:$0xf0]  ;;  %v5048_v18 = vor.u32 %v6216_v8, %v5045_v11  ;;  %v6264_v1 = vld [vmem:[#allocation9 + $0x35c] sm:$0xf] }
 0x2e8   : > { %v6388_v27 = vld [vmem:[#allocation9 + $0x734] sm:$0xf0]  ;;  %v5428_v3 = vor.u32 %v6316_v36, %v5427_v24  ;;  %v5237_v2 = vld [vmem:[#allocation9 + $0x378] sm:$0xf0] }
 0x2e9   : > { %v5716_v33 = vor.u32 %v6388_v27, %v5715_v17  ;;  %v5395_v34 = vld [vmem:[#allocation9 + $0x498] sm:$0xf]  ;;  %v5240_v22 = vor.u32 %v6264_v1, %v5237_v2  ;;  %v4917_v17 = vld [vmem:[#allocation9 + $0xf8] sm:$0xf0] }
 0x2ea   : > { %3251 = vmatpush.bf16.msra.mxu3 %v4916_v28  ;;  %3263 = vmatpush.bf16.msrb.mxu0 %v5204_v16  ;;  %v7356_v59 = vpop.f32.mrf.mxu0  ;;  %v6208_v28 = vld [vmem:[#allocation9 + $0x19c] sm:$0xf]  ;;  %v2958_v16 = vadd.f32 %v7346_v13, %v2945_v5  ;;  %v6308_v35 = vld [vmem:[#allocation9 + $0x4b4] sm:$0xf0] }
 0x2eb   : > { %3273 = vmatpush.bf16.msrb.mxu1 %v5556_v41  ;;  %3241 = vmatpush.bf16.msra.mxu2 %v5584_v39  ;;  %v7358_v21 = vpop.f32.mrf.mxu3  ;;  %v5301_v41 = vld [vmem:[#allocation9 + $0x3f8] sm:$0xf0]  ;;  %v5016_v39 = vor.u32 %v6208_v28, %v5013_v30  ;;  %v5683_v40 = vld [vmem:[#allocation9 + $0x6d8] sm:$0xf]  ;;  %v5396_v10 = vor.u32 %v6308_v35, %v5395_v34 }
 0x2ec   : > { %3229 = vmatmul.bf16.vlgmr.msra.gmra.mxu1 %v7322_v23  ;;  %v2971_v32 = vadd.f32 %v2970_v51, %v2958_v16  ;;  %v6380_v13 = vld [vmem:[#allocation9 + $0x6f4] sm:$0xf0]  ;;  %v2997_v27 = vadd.f32 %v7358_v21, %v1640_v58  ;;  %v5205_v30 = vld [vmem:[#allocation9 + $0x338] sm:$0xf0] }
 0x2ed   : > { %v2972_v29 = vpop.f32.mrf.mxu1  ;;  %v5363_v0 = vld [vmem:[#allocation9 + $0x458] sm:$0xf]  ;;  %v5684_v38 = vor.u32 %v6380_v13, %v5683_v40  ;;  %v4885_v13 = vld [vmem:[#allocation9 + $0xb8] sm:$0xf0] }
 0x2ee   : > { %3252 = vmatpush.bf16.msra.mxu3 %v4884_v42  ;;  %3264 = vmatpush.bf16.msrb.mxu0 %v5172_v43  ;;  %v5304_v42 = vor.u32 %v6280_v26, %v5301_v41  ;;  %v6300_v51 = vld [vmem:[#allocation9 + $0x474] sm:$0xf0]  ;;  %v6256_v29 = vld [vmem:[#allocation9 + $0x31c] sm:$0xf] }
 0x2ef   : > { %3274 = vmatpush.bf16.msrb.mxu1 %v5524_v6  ;;  %3286 = vmatpush.bf16.msrb.mxu2 %v5812_v46  ;;  %v4981_v6 = vld [vmem:[#allocation9 + $0x178] sm:$0xf0]  ;;  %v6372_v47 = vld [vmem:[#allocation9 + $0x6b4] sm:$0xf0] }
 0x2f0   : > { %3242 = vmatmul.bf16.vlgmr.msra.gmra.mxu2 %v7326_v9  ;;  %v2983_v43 = vpop.f32.mrf.mxu2  ;;  %v6272_v46 = vld [vmem:[#allocation9 + $0x39c] sm:$0xf]  ;;  %v5331_v5 = vld [vmem:[#allocation9 + $0x418] sm:$0xf] }
 0x2f1   : > { %v7362_v45 = vadd.f32 %v2983_v43, %v2971_v32  ;;  %v5272_v25 = vor.u32 %v6272_v46, %v5269_v48  ;;  %v6292_v37 = vld [vmem:[#allocation9 + $0x434] sm:$0xf0]  ;;  %v6344_v41 = vld [vmem:[#allocation9 + $0x5dc] sm:$0xf]  ;;  %v5208_v43 = vor.u32 %v6256_v29, %v5205_v30 }
 0x2f2   : > { %3253 = vmatpush.bf16.msra.mxu3 %v4852_v52  ;;  %3265 = vmatpush.bf16.msrb.mxu0 %v5140_v54  ;;  %v3011_v49 = vpop.f32.mrf.mxu0  ;;  %v5651_v52 = vld [vmem:[#allocation9 + $0x698] sm:$0xf]  ;;  %v4984_v54 = vor.u32 %v6200_v44, %v4981_v6  ;;  %v5332_v34 = vor.u32 %v6292_v37, %v5331_v5  ;;  %v6248_v44 = vld [vmem:[#allocation9 + $0x2dc] sm:$0xf] }
 0x2f3   : > { %3275 = vmatpush.bf16.msrb.mxu1 %v5492_v55  ;;  %3287 = vmatpush.bf16.msrb.mxu2 %v5780_v56  ;;  %v3353_v4 = vrot.slane %v7362_v45, 4  ;;  %v3409_v50 = vmul.f32 %v7362_v45, %v7362_v45  ;;  %v2998_v53 = vpop.f32.mrf.mxu3  ;;  %v6192_v55 = vld [vmem:[#allocation9 + $0x11c] sm:$0xf]  ;;  %v6364_v36 = vld [vmem:[#allocation9 + $0x674] sm:$0xf0]  ;;  %v3010_v49 = vadd.f32 %v7356_v59, %v2997_v27 }
 0x2f4   : > { %v4949_v56 = vld [vmem:[#allocation9 + $0x138] sm:$0xf0]  ;;  %v5587_v32 = vld [vmem:[#allocation9 + $0x618] sm:$0xf] }
 0x2f5   : > { %v3354_v60 = vadd.f32 %v3353_v4, %v7362_v45  ;;  %v3417_v61 = vrot.slane %v3409_v50, 4  ;;  %v3022_v62 = vpop.f32.mrf.mxu1  ;;  %v5173_v6 = vld [vmem:[#allocation9 + $0x2f8] sm:$0xf0] }
 0x2f6   : > { %3254 = vmatpush.bf16.msra.mxu3 %v4820_v12  ;;  %3266 = vmatpush.bf16.msrb.mxu0 %v5108_v14  ;;  %v5364_v12 = vor.u32 %v6300_v51, %v5363_v0  ;;  %v5652_v14 = vor.u32 %v6372_v47, %v5651_v52  ;;  %v6408_v53 = vld [vmem:[#allocation9 + $0x7dc] sm:$0xf] }
 0x2f7   : > { %3276 = vmatpush.bf16.msrb.mxu1 %v5460_v19  ;;  %3288 = vmatpush.bf16.msrb.mxu2 %v5748_v20  ;;  %v3355_v8 = vrot.slane %v3354_v60, 2  ;;  %v3418_v11 = vadd.f32 %v3417_v61, %v3409_v50  ;;  %v5619_v19 = vld [vmem:[#allocation9 + $0x658] sm:$0xf]  ;;  %v4952_v20 = vor.u32 %v6192_v55, %v4949_v56  ;;  %v6336_v50 = vld [vmem:[#allocation9 + $0x59c] sm:$0xf]  ;;  %v5176_v55 = vor.u32 %v6248_v44, %v5173_v6 }
 0x2f8   : > { %v2985_v24 = vpop.f32.mrf.mxu2  ;;  %v5620_v35 = vor.u32 %v6364_v36, %v5619_v19  ;;  %v5813_v51 = vld [vmem:[#allocation9 + $0x7f8] sm:$0xf0] }
 0x2f9   : > { %3255 = vmatmul.bf16.vlgmr.msra.gmra.mxu3 %v7305_v57  ;;  %v3356_v28 = vadd.f32 %v3355_v8, %v3354_v60  ;;  %v3419_v16 = vrot.slane %v3418_v11, 2  ;;  %v6168_v58 = vld [vmem:[#allocation9 + $0x5c] sm:$0xf]  ;;  %v5816_v5 = vor.u32 %v6408_v53, %v5813_v51 }
 0x2fa   : > { %3299 = vmatpush.bf16.msrb.mxu3 %v5048_v18  ;;  %3267 = vmatpush.bf16.msrb.mxu0 %v5076_v31  ;;  %v6184_v18 = vld [vmem:[#allocation9 + $0xdc] sm:$0xf]  ;;  %v7371_v26 = vpop.f32.mrf.mxu0 }
 0x2fb   : > { %3277 = vmatpush.bf16.msrb.mxu1 %v5428_v3  ;;  %3289 = vmatpush.bf16.msrb.mxu2 %v5716_v33  ;;  %v5557_v31 = vld [vmem:[#allocation9 + $0x5f8] sm:$0xf0]  ;;  %v3357_v3 = vrot.slane %v3356_v28, 1  ;;  %v3420_v33 = vadd.f32 %v3419_v16, %v3418_v11  ;;  %v4920_v21 = vor.u32 %v6184_v18, %v4917_v17 }
 0x2fc   : > { %v7373_v40 = vpop.f32.mrf.mxu3  ;;  %v5560_v0 = vor.u32 %v6344_v41, %v5557_v31  ;;  %v4853_v60 = vld [vmem:[#allocation9 + $0x78] sm:$0xf0] }
 0x2fd   : > { %3268 = vmatmul.bf16.vlgmr.msrb.gmra.mxu0 %v7310_v15  ;;  %v3358_v46 = vadd.f32 %v3357_v3, %v3356_v28  ;;  %v3421_v48 = vrot.slane %v3420_v33, 1  ;;  %v3024_v4 = vpop.f32.mrf.mxu1  ;;  %v6240_v61 = vld [vmem:[#allocation9 + $0x29c] sm:$0xf]  ;;  %v4856_v18 = vor.u32 %v6168_v58, %v4853_v60 }
 0x2fe   : > { %3300 = vmatpush.bf16.msrb.mxu3 %v5016_v39  ;;  %3312 = vmatpush.bf16.msra.mxu0 %v5304_v42  ;;  %v6356_v39 = vld [vmem:[#allocation9 + $0x634] sm:$0xf0]  ;;  %v6176_v42 = vld [vmem:[#allocation9 + $0x9c] sm:$0xf] }
 0x2ff   : > { %3278 = vmatpush.bf16.msrb.mxu1 %v5396_v10  ;;  %3290 = vmatpush.bf16.msrb.mxu2 %v5684_v38  ;;  %v5525_v10 = vld [vmem:[#allocation9 + $0x5b8] sm:$0xf0]  ;;  %v5588_v38 = vor.u32 %v6356_v39, %v5587_v32  ;;  %v7377_v52 = vmul.f32 %v3358_v46, %v7179_v63  ;;  %v4888_v47 = vor.u32 %v6176_v42, %v4885_v13 }
 0x300   : > { %v5528_v56 = vor.u32 %v6336_v50, %v5525_v10  ;;  %v3035_v59 = vpop.f32.mrf.mxu2  ;;  %v6328_v11 = vld [vmem:[#allocation9 + $0x55c] sm:$0xf] }
 0x301   : > { %v3473_v2 = vmul.f32 %v7377_v52, %v7377_v52  ;;  %v6400_v37 = vld [vmem:[#allocation9 + $0x79c] sm:$0xf] }
 0x302   : > { %3301 = vmatpush.bf16.msrb.mxu3 %v4984_v54  ;;  %3313 = vmatpush.bf16.msra.mxu0 %v5272_v25  ;;  %v3422_v54 = vadd.f32 %v3421_v48, %v3420_v33  ;;  %v3023_v25 = vadd.f32 %v3022_v62, %v3010_v49  ;;  %v5141_v62 = vld [vmem:[#allocation9 + $0x2b8] sm:$0xf0] }
 0x303   : > { %3279 = vmatpush.bf16.msrb.mxu1 %v5364_v12  ;;  %3291 = vmatpush.bf16.msrb.mxu2 %v5652_v14  ;;  %v5493_v12 = vld [vmem:[#allocation9 + $0x578] sm:$0xf0]  ;;  %v3063_v14 = vpop.f32.mrf.mxu0  ;;  %v5144_v17 = vor.u32 %v6240_v61, %v5141_v62 }
 0x304   : > { %v3465_v1 = vmul.f32 %v3422_v54, %v7179_v63  ;;  %v7382_v8 = vadd.f32 %v3035_v59, %v3023_v25  ;;  %v5781_v19 = vld [vmem:[#allocation9 + $0x7b8] sm:$0xf0]  ;;  %v5496_v27 = vor.u32 %v6328_v11, %v5493_v12  ;;  %v3050_v28 = vpop.f32.mrf.mxu3 }
 0x305   : > { %v6160_v36 = vld [vmem:[#allocation9 + $0x1c] sm:$0xf]  ;;  %v5784_v3 = vor.u32 %v6400_v37, %v5781_v19  ;;  %v6428_v37 = vld [vmem:[%s7148_s24 + $0x78] sm:$0xff] }
 0x306   : > { %3302 = vmatpush.bf16.msrb.mxu3 %v4952_v20  ;;  %3314 = vmatpush.bf16.msra.mxu0 %v5240_v22  ;;  %v3481_v20 = vsub.f32 %v3465_v1, %v3473_v2  ;;  %v3359_v22 = vrot.slane %v7382_v8, 4  ;;  %v3410_v24 = vmul.f32 %v7382_v8, %v7382_v8  ;;  %v4821_v16 = vld [vmem:[#allocation9 + $0x38] sm:$0xf0] }
 0x307   : > { %3280 = vmatpush.bf16.msrb.mxu1 %v5332_v34  ;;  %3292 = vmatpush.bf16.msrb.mxu2 %v5620_v35  ;;  %v6232_v29 = vld [vmem:[#allocation9 + $0x25c] sm:$0xf]  ;;  %v1641_v35 = vperm.slane %v7350_v7, 2  ;;  %v4824_v6 = vor.u32 %v6160_v36, %v4821_v16  ;;  %v6418_v16 = vld [vmem:[%s7148_s24 + $0x28] sm:$0xff] }
 0x308   : > { %v5109_v30 = vld [vmem:[#allocation9 + $0x278] sm:$0xf0]  ;;  %v3489_v41 = vmax.f32 %v3481_v20, 0.0  ;;  %v3360_v31 = vadd.f32 %v3359_v22, %v7382_v8  ;;  %v3423_v32 = vrot.slane %v3410_v24, 4  ;;  %v3037_v49 = vpop.f32.mrf.mxu2 }
 0x309   : > { %v6320_v33 = vld [vmem:[#allocation9 + $0x51c] sm:$0xf]  ;;  %v3074_v44 = vpop.f32.mrf.mxu1  ;;  %v5112_v46 = vor.u32 %v6232_v29, %v5109_v30  ;;  %v3049_v54 = vadd.f32 %v7373_v40, %v1641_v35 }
 0x30a   : > { %3303 = vmatpush.bf16.msrb.mxu3 %v4920_v21  ;;  %3315 = vmatpush.bf16.msra.mxu0 %v5208_v43  ;;  %v5461_v34 = vld [vmem:[#allocation9 + $0x538] sm:$0xf0]  ;;  %v7391_v21 = vadd.f32 0.8, %v3489_v41  ;;  %v3361_v43 = vrot.slane %v3360_v31, 2  ;;  %v3424_v13 = vadd.f32 %v3423_v32, %v3410_v24 }
 0x30b   : > { %3325 = vmatpush.bf16.msra.mxu1 %v5560_v0  ;;  %3293 = vmatpush.bf16.msrb.mxu2 %v5588_v38  ;;  %v6392_v39 = vld [vmem:[#allocation9 + $0x75c] sm:$0xf]  ;;  %v5464_v48 = vor.u32 %v6320_v33, %v5461_v34  ;;  %v6420_v38 = vld [vmem:[%s7148_s24 + $0x38] sm:$0xff]  ;;  %v3062_v40 = vadd.f32 %v7371_v26, %v3049_v54 }
 0x30c   : > { %3281 = vmatmul.bf16.vlgmr.msrb.gmra.mxu1 %v7322_v23  ;;  %v5749_v42 = vld [vmem:[#allocation9 + $0x778] sm:$0xf0]  ;;  %6608 = vrsqrt.f32 %v7391_v21  ;;  %v3362_v4 = vadd.f32 %v3361_v43, %v3360_v31  ;;  %v3425_v50 = vrot.slane %v3424_v13, 2  ;;  %vm3519_vm12 = vweird.f32 %v7391_v21 }
 0x30d   : > { %v6224_v0 = vld [vmem:[#allocation9 + $0x21c] sm:$0xf]  ;;  %v5752_v10 = vor.u32 %v6392_v39, %v5749_v42 }
 0x30e   : > { %3304 = vmatpush.bf16.msrb.mxu3 %v4888_v47  ;;  %3316 = vmatpush.bf16.msra.mxu0 %v5176_v55  ;;  %v5077_v53 = vld [vmem:[#allocation9 + $0x238] sm:$0xf0]  ;;  %v3426_v59 = vadd.f32 %v3425_v50, %v3424_v13  ;;  %v6417_v50 = vld [vmem:[%s7148_s24 + $0x20] sm:$0xff] }
 0x30f   : > { %3326 = vmatpush.bf16.msra.mxu1 %v5528_v56  ;;  %3338 = vmatpush.bf16.msra.mxu2 %v5816_v5  ;;  %v6312_v51 = vld [vmem:[#allocation9 + $0x4dc] sm:$0xf]  ;;  %v3363_v56 = vrot.slane %v3362_v4, 1  ;;  %v5080_v58 = vor.u32 %v6224_v0, %v5077_v53 }
 0x310   : > { %3294 = vmatmul.bf16.vlgmr.msrb.gmra.mxu2 %v7326_v9  ;;  %v5429_v25 = vld [vmem:[#allocation9 + $0x4f8] sm:$0xf0]  ;;  %v3427_v61 = vrot.slane %v3426_v59, 1 }
 0x311   : > { %v6384_v47 = vld [vmem:[#allocation9 + $0x71c] sm:$0xf]  ;;  %v3364_v60 = vadd.f32 %v3363_v56, %v3362_v4  ;;  %v5432_v1 = vor.u32 %v6312_v51, %v5429_v25  ;;  %v3076_v24 = vpop.f32.mrf.mxu1  ;;  %v7432_v56 = vld [vmem:[#allocation10 + $0x23] sm:$0xff] }
 0x312   : > { %3305 = vmatpush.bf16.msrb.mxu3 %v4856_v18  ;;  %3317 = vmatpush.bf16.msra.mxu0 %v5144_v17  ;;  %v5717_v55 = vld [vmem:[#allocation9 + $0x738] sm:$0xf0]  ;;  %v7399_v19 = vpop.eup %6608  ;;  %v3428_v22 = vadd.f32 %v3427_v61, %v3426_v59  ;;  %v3075_v18 = vadd.f32 %v3074_v44, %v3062_v40  ;;  %v3497_v59 = vsub.f32 %v7362_v45, %v7377_v52  ;;  %v6416_v61 = vld [vmem:[%s7148_s24 + $0x18] sm:$0xff]  ;;  %v6425_v40 = vld [vmem:[%s7148_s24 + $0x60] sm:$0xff] }
 0x313   : > { %3327 = vmatpush.bf16.msra.mxu1 %v5496_v27  ;;  %3339 = vmatpush.bf16.msra.mxu2 %v5784_v3  ;;  %v5720_v2 = vor.u32 %v6384_v47, %v5717_v55  ;;  %v6419_v5 = vld [vmem:[%s7148_s24 + $0x30] sm:$0xff]  ;;  %v7402_v20 = vmul.f32 %v3364_v60, %v7179_v63  ;;  %v3514_v36 = vmul.f32 %v7399_v19, %v7391_v21  ;;  %v3087_v29 = vpop.f32.mrf.mxu2  ;;  %vm3520_vm11 = vweird.f32 %v7399_v19 }
 0x314   : > { %v6304_v62 = vld [vmem:[#allocation9 + $0x49c] sm:$0xf]  ;;  %v3466_v17 = vmul.f32 %v3428_v22, %v7179_v63  ;;  %v7412_v31 = vadd.f32 %v3087_v29, %v3075_v18  ;;  %vm7438_vm13 = vmor %vm3519_vm12, %vm3520_vm11 }
 0x315   : > { %v5397_v11 = vld [vmem:[#allocation9 + $0x4b8] sm:$0xf0]  ;;  %v3474_v27 = vmul.f32 %v7402_v20, %v7402_v20  ;;  %v3515_v41 = vmul.f32 %v7399_v19, %v3514_v36 }
 0x316   : > { %3306 = vmatpush.bf16.msrb.mxu3 %v4824_v6  ;;  %3318 = vmatpush.bf16.msra.mxu0 %v5112_v46  ;;  %v6376_v12 = vld [vmem:[#allocation9 + $0x6dc] sm:$0xf]  ;;  %v5400_v26 = vor.u32 %v6304_v62, %v5397_v11  ;;  %v3365_v42 = vrot.slane %v7412_v31, 4  ;;  %v3411_v43 = vmul.f32 %v7412_v31, %v7412_v31 }
 0x317   : > { %3328 = vmatpush.bf16.msra.mxu1 %v5464_v48  ;;  %3340 = vmatpush.bf16.msra.mxu2 %v5752_v10  ;;  %v5685_v14 = vld [vmem:[#allocation9 + $0x6f8] sm:$0xf0]  ;;  %v3482_v34 = vsub.f32 %v3466_v17, %v3474_v27  ;;  %v3516_v39 = vmul.f32 0.5, %v3515_v41 }
 0x318   : > { %v5688_v28 = vor.u32 %v6376_v12, %v5685_v14  ;;  %v6296_v30 = vld [vmem:[#allocation9 + $0x45c] sm:$0xf]  ;;  %v3429_v4 = vrot.slane %v3411_v43, 4  ;;  %v3627_v14 = vperm.slane %v7432_v56, 0 }
 0x319   : > { %3307 = vmatmul.bf16.vlgmr.msrb.gmra.mxu3 %v7305_v57  ;;  %v5365_v57 = vld [vmem:[#allocation9 + $0x478] sm:$0xf0]  ;;  %v3490_v44 = vmax.f32 %v3482_v34, 0.0  ;;  %v3517_v0 = vsub.f32 1.5, %v3516_v39  ;;  %v6414_v39 = vld [vmem:[%s7148_s24 + $0x8] sm:$0xff] }
 0x31a   : > { %4199 = vmatpush.bf16.msra.mxu3 %v6420_v38  ;;  %3319 = vmatpush.bf16.msra.mxu0 %v5080_v58  ;;  %v6368_v32 = vld [vmem:[#allocation9 + $0x69c] sm:$0xf]  ;;  %v5368_v6 = vor.u32 %v6296_v30, %v5365_v57  ;;  %v6426_v38 = vld [vmem:[%s7148_s24 + $0x68] sm:$0xff]  ;;  %v3430_v47 = vadd.f32 %v3429_v4, %v3411_v43  ;;  %v7430_v55 = vpop.f32.mrf.mxu0 }
 0x31b   : > { %3329 = vmatpush.bf16.msra.mxu1 %v5432_v1  ;;  %3341 = vmatpush.bf16.msra.mxu2 %v5720_v2  ;;  %v5653_v3 = vld [vmem:[#allocation9 + $0x6b8] sm:$0xf0]  ;;  %v7426_v51 = vadd.f32 0.8, %v3490_v44  ;;  %v3518_v54 = vmul.f32 %v7399_v19, %v3517_v0  ;;  %v3089_v1 = vpop.f32.mrf.mxu2 }
 0x31c   : > { %v6427_v33 = vld [vmem:[%s7148_s24 + $0x70] sm:$0xff]  ;;  %v5656_v46 = vor.u32 %v6368_v32, %v5653_v3  ;;  %v3431_v2 = vrot.slane %v3430_v47, 2 }
 0x31d   : > { %3320 = vmatmul.bf16.vlgmr.msra.gmra.mxu0 %v7310_v15  ;;  %v7416_v35 = vld [vmem:[#allocation10 + $0x1b] sm:$0xff]  ;;  %v3366_v15 = vadd.f32 %v3365_v42, %v7412_v31  ;;  %6610 = vrsqrt.f32 %v7426_v51  ;;  %v3522_v45 = vsel %vm7438_vm13, %v7399_v19, %v3518_v54  ;;  %vm3529_vm0 = vweird.f32 %v7426_v51  ;;  %v6444_v54 = vld [vmem:[%s7148_s24 + $0xf8] sm:$0xff] }
 0x31e   : > { %4200 = vmatpush.bf16.msra.mxu3 %v6419_v5  ;;  %4212 = vmatpush.bf16.msrb.mxu0 %v6428_v37  ;;  %v6288_v13 = vld [vmem:[#allocation9 + $0x41c] sm:$0xf]  ;;  %v3602_v53 = vperm.slane %v7416_v35, 0  ;;  %v3100_v5 = vpop.f32.mrf.mxu3  ;;  %v3593_v12 = vmul.f32 %v3522_v45, %v3497_v59  ;;  %v6436_v37 = vld [vmem:[%s7148_s24 + $0xb8] sm:$0xff]  ;;  %v3432_v24 = vadd.f32 %v3431_v2, %v3430_v47  ;;  %v3603_v47 = vperm.slane %v7416_v35, 1 }
 0x31f   : > { %3330 = vmatpush.bf16.msra.mxu1 %v5400_v26  ;;  %3342 = vmatpush.bf16.msra.mxu2 %v5688_v28  ;;  %v5333_v48 = vld [vmem:[#allocation9 + $0x438] sm:$0xf0]  ;;  %v3367_v25 = vrot.slane %v3366_v15, 2 }
 0x320   : > { %v6360_v49 = vld [vmem:[#allocation9 + $0x65c] sm:$0xf]  ;;  %v5336_v21 = vor.u32 %v6288_v13, %v5333_v48  ;;  %v3618_v36 = vmul.f32 %v3602_v53, %v3593_v12  ;;  %v3433_v26 = vrot.slane %v3432_v24, 1 }
 0x321   : > { %v5621_v10 = vld [vmem:[#allocation9 + $0x678] sm:$0xf0]  ;;  %v3368_v52 = vadd.f32 %v3367_v25, %v3366_v15  ;;  %v6413_v15 = vld [vmem:[%s7148_s24] sm:$0xff]  ;;  %v3498_v25 = vsub.f32 %v7382_v8, %v7402_v20 }
 0x322   : > { %4201 = vmatpush.bf16.msra.mxu3 %v6418_v16  ;;  %4213 = vmatpush.bf16.msrb.mxu0 %v6427_v33  ;;  %v5624_v60 = vor.u32 %v6360_v49, %v5621_v10  ;;  %v6352_v62 = vld [vmem:[#allocation9 + $0x61c] sm:$0xf]  ;;  %v3643_v28 = vadd.f32 %v3627_v14, %v3618_v36  ;;  %v6424_v16 = vld [vmem:[%s7148_s24 + $0x58] sm:$0xff]  ;;  %v3434_v41 = vadd.f32 %v3433_v26, %v3432_v24  ;;  %v3115_v32 = vpop.f32.mrf.mxu0  ;;  %v6433_v10 = vld [vmem:[%s7148_s24 + $0xa0] sm:$0xff] }
 0x323   : > { %3331 = vmatpush.bf16.msra.mxu1 %v5368_v6  ;;  %3343 = vmatpush.bf16.msra.mxu2 %v5656_v46  ;;  %v5589_v11 = vld [vmem:[#allocation9 + $0x638] sm:$0xf0]  ;;  %v3369_v22 = vrot.slane %v3368_v52, 1  ;;  %v6611_v27 = vpop.eup %6610  ;;  %v1642_v46 = vperm.slane %v7350_v7, 3 }
 0x324   : > { %v5592_v19 = vor.u32 %v6352_v62, %v5589_v11  ;;  %v6415_v17 = vld [vmem:[%s7148_s24 + $0x10] sm:$0xff]  ;;  %v3524_v30 = vmul.f32 %v6611_v27, %v7426_v51  ;;  %v3467_v33 = vmul.f32 %v3434_v41, %v7179_v63  ;;  %v3659_v43 = vmul.f32 0.2, %v3643_v28 }
 0x325   : > { %v3370_v18 = vadd.f32 %v3369_v22, %v3368_v52  ;;  %v6435_v29 = vld [vmem:[%s7148_s24 + $0xb0] sm:$0xff]  ;;  %vm3651_vm14 = vcmp.gt.f32.partialorder %v3643_v28, 0.0  ;;  %vm3530_vm15 = vweird.f32 %v6611_v27 }
 0x326   : > { %4202 = vmatpush.bf16.msra.mxu3 %v6417_v50  ;;  %4214 = vmatpush.bf16.msrb.mxu0 %v6426_v38  ;;  %v3525_v3 = vmul.f32 %v6611_v27, %v3524_v30  ;;  %v3102_v42 = vpop.f32.mrf.mxu3  ;;  %v6423_v13 = vld [vmem:[%s7148_s24 + $0x50] sm:$0xff]  ;;  %v3667_v4 = vsel %vm3651_vm14, %v3643_v28, %v3659_v43  ;;  %v6422_v50 = vld [vmem:[%s7148_s24 + $0x48] sm:$0xff]  ;;  %vm3531_vm1 = vmor %vm3529_vm0, %vm3530_vm15 }
 0x327   : > { %3332 = vmatpush.bf16.msra.mxu1 %v5336_v21  ;;  %3344 = vmatpush.bf16.msra.mxu2 %v5624_v60  ;;  %v7455_v57 = vmul.f32 %v3370_v18, %v7179_v63  ;;  %v3676_v59 = vpack.c.bf16 %v3667_v4, %v3667_v4  ;;  %v6421_v21 = vld [vmem:[%s7148_s24 + $0x40] sm:$0xff]  ;;  %v3628_v60 = vperm.slane %v7432_v56, 1  ;;  %v6443_v20 = vld [vmem:[%s7148_s24 + $0xf0] sm:$0xff]  ;;  %v6440_v42 = vld [vmem:[%s7148_s24 + $0xd8] sm:$0xff] }
 0x328   : > { %v3526_v44 = vmul.f32 0.5, %v3525_v3  ;;  %v6431_v62 = vld [vmem:[%s7148_s24 + $0x90] sm:$0xff]  ;;  %v6429_v3 = vld [vmem:[%s7148_s24 + $0x80] sm:$0xff] }
 0x329   : > { %v3475_v34 = vmul.f32 %v7455_v57, %v7455_v57  ;;  %v3126_v48 = vpop.f32.mrf.mxu1  ;;  %v6439_v4 = vld [vmem:[%s7148_s24 + $0xd0] sm:$0xff] }
 0x32a   : > { %4203 = vmatpush.bf16.msra.mxu3 %v6416_v61  ;;  %4215 = vmatpush.bf16.msrb.mxu0 %v6425_v40  ;;  %v3527_v49 = vsub.f32 1.5, %v3526_v44  ;;  %v6432_v61 = vld [vmem:[%s7148_s24 + $0x98] sm:$0xff] }
 0x32b   : > { %4225 = vmatpush.bf16.msrb.mxu1 %v6436_v37  ;;  %3345 = vmatpush.bf16.msra.mxu2 %v5592_v19  ;;  %v3483_v6 = vsub.f32 %v3467_v33, %v3475_v34  ;;  %v6430_v19 = vld [vmem:[%s7148_s24 + $0x88] sm:$0xff] }
 0x32c   : > { %3333 = vmatmul.bf16.vlgmr.msra.gmra.mxu1 %v7322_v23  ;;  %v6434_v23 = vld [vmem:[%s7148_s24 + $0xa8] sm:$0xff]  ;;  %v3528_v38 = vmul.f32 %v6611_v27, %v3527_v49 }
 0x32d   : > { %v3491_v0 = vmax.f32 %v3483_v6, 0.0 }
 0x32e   : > { %4204 = vmatpush.bf16.msra.mxu3 %v6415_v17  ;;  %4216 = vmatpush.bf16.msrb.mxu0 %v6424_v16  ;;  %v3532_v58 = vsel %vm3531_vm1, %v6611_v27, %v3528_v38  ;;  %v6441_v27 = vld [vmem:[%s7148_s24 + $0xe0] sm:$0xff] }
 0x32f   : > { %4226 = vmatpush.bf16.msrb.mxu1 %v6435_v29  ;;  %3346 = vmatmul.bf16.vlgmr.msra.gmra.mxu2 %v7326_v9  ;;  %v7470_v53 = vadd.f32 0.8, %v3491_v0  ;;  %v3101_v9 = vadd.f32 %v3100_v5, %v1642_v46  ;;  %v3594_v51 = vmul.f32 %v3532_v58, %v3498_v25  ;;  %v6438_v25 = vld [vmem:[%s7148_s24 + $0xc8] sm:$0xff] }
 0x330   : > { %4238 = vmatpush.bf16.msrb.mxu2 %v6444_v54 }
 0x331   : > { %6612 = vrsqrt.f32 %v7470_v53  ;;  %v3114_v8 = vadd.f32 %v7430_v55, %v3101_v9  ;;  %v3619_v1 = vmul.f32 %v3603_v47, %v3594_v51  ;;  %v3128_v45 = vpop.f32.mrf.mxu1  ;;  %v6442_v55 = vld [vmem:[%s7148_s24 + $0xe8] sm:$0xff]  ;;  %vm3539_vm4 = vweird.f32 %v7470_v53 }
 0x332   : > { %4205 = vmatpush.bf16.msra.mxu3 %v6414_v39  ;;  %4217 = vmatpush.bf16.msrb.mxu0 %v6423_v13  ;;  %v3499_v13 = vsub.f32 %v7412_v31, %v7455_v57 }
 0x333   : > { %4227 = vmatpush.bf16.msrb.mxu1 %v6434_v23  ;;  %v3127_v52 = vadd.f32 %v3126_v48, %v3114_v8  ;;  %v3139_v2 = vpop.f32.mrf.mxu2  ;;  %v3644_v5 = vadd.f32 %v3628_v60, %v3619_v1  ;;  %v3604_v23 = vperm.slane %v7416_v35, 2 }
 0x334   : > { %4239 = vmatpush.bf16.msrb.mxu2 %v6443_v20  ;;  %v6452_v20 = vld [vmem:[%s7148_s24 + $0x138] sm:$0xff] }
 0x335   : > { %v7488_v40 = vadd.f32 %v3139_v2, %v3127_v52  ;;  %vm3652_vm2 = vcmp.gt.f32.partialorder %v3644_v5, 0.0  ;;  %v3660_v14 = vmul.f32 0.2, %v3644_v5  ;;  %v6451_v52 = vld [vmem:[%s7148_s24 + $0x130] sm:$0xff] }
 0x336   : > { %4206 = vmatpush.bf16.msra.mxu3 %v6413_v15  ;;  %4218 = vmatpush.bf16.msrb.mxu0 %v6422_v50  ;;  %v3629_v15 = vperm.slane %v7432_v56, 2 }
 0x337   : > { %4228 = vmatpush.bf16.msrb.mxu1 %v6433_v10  ;;  %v6613_v11 = vpop.eup %6612  ;;  %v3371_v37 = vrot.slane %v7488_v40, 4  ;;  %v3412_v22 = vmul.f32 %v7488_v40, %v7488_v40  ;;  %v3668_v36 = vsel %vm3652_vm2, %v3644_v5, %v3660_v14 }
 0x338   : > { %v3534_v12 = vmul.f32 %v6613_v11, %v7470_v53  ;;  %4240 = vmatpush.bf16.msrb.mxu2 %v6442_v55  ;;  %v3677_v17 = vpack.c.bf16 %v3668_v36, %v3668_v36  ;;  %vm3540_vm3 = vweird.f32 %v6613_v11  ;;  %v6449_v36 = vld [vmem:[%s7148_s24 + $0x120] sm:$0xff] }
 0x339   : > { %4207 = vmatmul.bf16.vlgmr.msra.gmra.mxu3 %v3676_v59  ;;  %v3372_v18 = vadd.f32 %v3371_v37, %v7488_v40  ;;  %v3435_v26 = vrot.slane %v3412_v22, 4  ;;  %vm3541_vm5 = vmor %vm3539_vm4, %vm3540_vm3  ;;  %v1643_v59 = vperm.slane %v7350_v7, 4 }
 0x33a   : > { %4219 = vmatpush.bf16.msrb.mxu0 %v6421_v21  ;;  %v3535_v24 = vmul.f32 %v6613_v11, %v3534_v12  ;;  %v3165_v30 = vpop.f32.mrf.mxu0  ;;  %4251 = vmatpush.bf16.msrb.mxu3 %v6452_v20 }
 0x33b   : > { %4229 = vmatpush.bf16.msrb.mxu1 %v6432_v61  ;;  %v3373_v16 = vrot.slane %v3372_v18, 2  ;;  %v3436_v29 = vadd.f32 %v3435_v26, %v3412_v22  ;;  %v3141_v32 = vpop.f32.mrf.mxu2  ;;  %v6437_v61 = vld [vmem:[%s7148_s24 + $0xc0] sm:$0xff] }
 0x33c   : > { %v3536_v28 = vmul.f32 0.5, %v3535_v24  ;;  %4241 = vmatpush.bf16.msrb.mxu2 %v6441_v27  ;;  %v3152_v39 = vpop.f32.mrf.mxu3 }
 0x33d   : > { %4220 = vmatmul.bf16.vlgmr.msrb.gmra.mxu0 %v3677_v17  ;;  %v3374_v33 = vadd.f32 %v3373_v16, %v3372_v18  ;;  %v3437_v34 = vrot.slane %v3436_v29, 2  ;;  %v3153_v45 = vadd.f32 %v3152_v39, %v1643_v59  ;;  %v3605_v39 = vperm.slane %v7416_v35, 3 }
 0x33e   : > { %v3537_v41 = vsub.f32 1.5, %v3536_v28  ;;  %4252 = vmatpush.bf16.msrb.mxu3 %v6451_v52  ;;  %v6458_v52 = vld [vmem:[%s7148_s24 + $0x168] sm:$0xff] }
 0x33f   : > { %4230 = vmatpush.bf16.msrb.mxu1 %v6431_v62  ;;  %v3375_v44 = vrot.slane %v3374_v33, 1  ;;  %v3438_v6 = vadd.f32 %v3437_v34, %v3436_v29  ;;  %v3166_v7 = vadd.f32 %v3165_v30, %v3153_v45  ;;  %v6448_v30 = vld [vmem:[%s7148_s24 + $0x118] sm:$0xff] }
 0x340   : > { %v3538_v43 = vmul.f32 %v6613_v11, %v3537_v41  ;;  %4242 = vmatpush.bf16.msrb.mxu2 %v6440_v42 }
 0x341   : > { %v3376_v49 = vadd.f32 %v3375_v44, %v3374_v33  ;;  %v3439_v0 = vrot.slane %v3438_v6, 1 }
 0x342   : > { %v3542_v46 = vsel %vm3541_vm5, %v6613_v11, %v3538_v43  ;;  %v3167_v57 = vpop.f32.mrf.mxu0  ;;  %v6450_v11 = vld [vmem:[%s7148_s24 + $0x128] sm:$0xff] }
 0x343   : > { %4231 = vmatpush.bf16.msrb.mxu1 %v6430_v19  ;;  %v3595_v48 = vmul.f32 %v3542_v46, %v3499_v13  ;;  %v7507_v10 = vmul.f32 %v3376_v49, %v7179_v63  ;;  %v3440_v31 = vadd.f32 %v3439_v0, %v3438_v6  ;;  %4253 = vmatpush.bf16.msrb.mxu3 %v6450_v11 }
 0x344   : > { %4243 = vmatpush.bf16.msrb.mxu2 %v6439_v4  ;;  %v3154_v9 = vpop.f32.mrf.mxu3  ;;  %v6446_v4 = vld [vmem:[%s7148_s24 + $0x108] sm:$0xff] }
 0x345   : > { %v3620_v50 = vmul.f32 %v3604_v23, %v3595_v48  ;;  %v3468_v38 = vmul.f32 %v3440_v31, %v7179_v63  ;;  %v3476_v53 = vmul.f32 %v7507_v10, %v7507_v10  ;;  %v3500_v34 = vsub.f32 %v7488_v40, %v7507_v10  ;;  %v6447_v23 = vld [vmem:[%s7148_s24 + $0x110] sm:$0xff] }
 0x346   : > { %v3630_v48 = vperm.slane %v7432_v56, 3 }
 0x347   : > { %4232 = vmatpush.bf16.msrb.mxu1 %v6429_v3  ;;  %v3645_v54 = vadd.f32 %v3629_v15, %v3620_v50  ;;  %v3484_v47 = vsub.f32 %v3468_v38, %v3476_v53  ;;  %4254 = vmatpush.bf16.msrb.mxu3 %v6449_v36  ;;  %v7538_v53 = vld [vmem:[#allocation10 + $0x7] sm:$0xff] }
 0x348   : > { %4244 = vmatpush.bf16.msrb.mxu2 %v6438_v25  ;;  %v1644_v9 = vperm.slane %v7538_v53, 5 }
 0x349   : > { %vm3653_vm6 = vcmp.gt.f32.partialorder %v3645_v54, 0.0  ;;  %v3661_v58 = vmul.f32 0.2, %v3645_v54  ;;  %v3178_v51 = vpop.f32.mrf.mxu1  ;;  %v3492_v21 = vmax.f32 %v3484_v47, 0.0  ;;  %v6445_v47 = vld [vmem:[%s7148_s24 + $0x100] sm:$0xff] }
 0x34a   : > { %v3179_v5 = vadd.f32 %v3178_v51, %v3166_v7  ;;  %v6460_v51 = vld [vmem:[%s7148_s24 + $0x178] sm:$0xff] }
 0x34b   : > { %v3669_v60 = vsel %vm3653_vm6, %v3645_v54, %v3661_v58  ;;  %v3508_v1 = vadd.f32 0.8, %v3492_v21  ;;  %4255 = vmatpush.bf16.msrb.mxu3 %v6448_v30  ;;  %4264 = vmatpush.bf16.msra.mxu0 %v6460_v51  ;;  %v6467_v51 = vld [vmem:[%s7148_s24 + $0x1b0] sm:$0xff] }
 0x34c   : > { %v3678_v8 = vpack.c.bf16 %v3669_v60, %v3669_v60  ;;  %4245 = vmatpush.bf16.msrb.mxu2 %v6437_v61 }
 0x34d   : > { %6614 = vrsqrt.f32 %v3508_v1  ;;  %vm3549_vm8 = vweird.f32 %v3508_v1 }
 0x34e   : > { %4233 = vmatmul.bf16.vlgmr.msrb.gmra.mxu1 %v3678_v8  ;;  %v6459_v8 = vld [vmem:[%s7148_s24 + $0x170] sm:$0xff] }
 0x34f   : > { %4256 = vmatpush.bf16.msrb.mxu3 %v6447_v23  ;;  %4265 = vmatpush.bf16.msra.mxu0 %v6459_v8 }
 0x351   : > { %v3180_v2 = vpop.f32.mrf.mxu1 }
 0x353   : > { %v3191_v62 = vpop.f32.mrf.mxu2  ;;  %v6615_v55 = vpop.eup %6614  ;;  %4257 = vmatpush.bf16.msrb.mxu3 %v6446_v4  ;;  %4266 = vmatpush.bf16.msra.mxu0 %v6458_v52 }
 0x354   : > { %v7518_v12 = vadd.f32 %v3191_v62, %v3179_v5  ;;  %v3544_v14 = vmul.f32 %v6615_v55, %v3508_v1  ;;  %vm3550_vm7 = vweird.f32 %v6615_v55 }
 0x355   : > { %vm3551_vm9 = vmor %vm3549_vm8, %vm3550_vm7 }
 0x356   : > { %v3377_v37 = vrot.slane %v7518_v12, 4  ;;  %v3413_v22 = vmul.f32 %v7518_v12, %v7518_v12  ;;  %v3545_v24 = vmul.f32 %v6615_v55, %v3544_v14  ;;  %v6457_v14 = vld [vmem:[%s7148_s24 + $0x160] sm:$0xff] }
 0x357   : > { %4258 = vmatpush.bf16.msrb.mxu3 %v6445_v47  ;;  %4267 = vmatpush.bf16.msra.mxu0 %v6457_v14 }
 0x358   : > { %v3378_v19 = vadd.f32 %v3377_v37, %v7518_v12  ;;  %v3441_v18 = vrot.slane %v3413_v22, 4  ;;  %v3546_v26 = vmul.f32 0.5, %v3545_v24 }
 0x35a   : > { %v3379_v17 = vrot.slane %v3378_v19, 2  ;;  %v3442_v27 = vadd.f32 %v3441_v18, %v3413_v22  ;;  %v3217_v28 = vpop.f32.mrf.mxu0  ;;  %v3547_v16 = vsub.f32 1.5, %v3546_v26 }
 0x35b   : > { %v3193_v29 = vpop.f32.mrf.mxu2 }
 0x35c   : > { %v3380_v41 = vadd.f32 %v3379_v17, %v3378_v19  ;;  %v3443_v32 = vrot.slane %v3442_v27, 2  ;;  %v3204_v3 = vpop.f32.mrf.mxu3  ;;  %v3548_v33 = vmul.f32 %v6615_v55, %v3547_v16  ;;  %v6456_v17 = vld [vmem:[%s7148_s24 + $0x158] sm:$0xff] }
 0x35d   : > { %v3205_v61 = vadd.f32 %v3204_v3, %v1644_v9  ;;  %4268 = vmatpush.bf16.msra.mxu0 %v6456_v17  ;;  %v3606_v3 = vperm.slane %v7416_v35, 4  ;;  %v6468_v9 = vld [vmem:[%s7148_s24 + $0x1b8] sm:$0xff] }
 0x35e   : > { %v3381_v42 = vrot.slane %v3380_v41, 1  ;;  %v3444_v43 = vadd.f32 %v3443_v32, %v3442_v27  ;;  %v3552_v13 = vsel %vm3551_vm9, %v6615_v55, %v3548_v33  ;;  %4277 = vmatpush.bf16.msra.mxu1 %v6468_v9 }
 0x35f   : > { %v3596_v44 = vmul.f32 %v3552_v13, %v3500_v34  ;;  %v3218_v20 = vadd.f32 %v3217_v28, %v3205_v61  ;;  %v6466_v61 = vld [vmem:[%s7148_s24 + $0x1a8] sm:$0xff] }
 0x360   : > { %v3382_v6 = vadd.f32 %v3381_v42, %v3380_v41  ;;  %v3445_v46 = vrot.slane %v3444_v43, 1 }
 0x361   : > { %v3621_v49 = vmul.f32 %v3605_v39, %v3596_v44  ;;  %v6455_v39 = vld [vmem:[%s7148_s24 + $0x150] sm:$0xff]  ;;  %v3631_v44 = vperm.slane %v7432_v56, 4 }
 0x362   : > { %v7532_v0 = vmul.f32 %v3382_v6, %v7179_v63  ;;  %v3446_v40 = vadd.f32 %v3445_v46, %v3444_v43  ;;  %v3219_v15 = vpop.f32.mrf.mxu0  ;;  %4269 = vmatpush.bf16.msra.mxu0 %v6455_v39  ;;  %4278 = vmatpush.bf16.msra.mxu1 %v6467_v51  ;;  %v3632_v39 = vperm.slane %v7432_v56, 5 }
 0x363   : > { %v3646_v57 = vadd.f32 %v3630_v48, %v3621_v49  ;;  %v6454_v49 = vld [vmem:[%s7148_s24 + $0x148] sm:$0xff] }
 0x364   : > { %v3469_v50 = vmul.f32 %v3446_v40, %v7179_v63  ;;  %v3477_v10 = vmul.f32 %v7532_v0, %v7532_v0  ;;  %v3206_v31 = vpop.f32.mrf.mxu3  ;;  %v3501_v32 = vsub.f32 %v7518_v12, %v7532_v0 }
 0x365   : > { %vm3654_vm10 = vcmp.gt.f32.partialorder %v3646_v57, 0.0  ;;  %v3662_v54 = vmul.f32 0.2, %v3646_v57 }
 0x366   : > { %v3485_v38 = vsub.f32 %v3469_v50, %v3477_v10  ;;  %4270 = vmatpush.bf16.msra.mxu0 %v6454_v49  ;;  %v1645_v10 = vperm.slane %v7538_v53, 6  ;;  %4279 = vmatpush.bf16.msra.mxu1 %v6466_v61  ;;  %v6473_v61 = vld [vmem:[%s7148_s24 + $0x1e0] sm:$0xff] }
 0x367   : > { %v3670_v58 = vsel %vm3654_vm10, %v3646_v57, %v3662_v54  ;;  %v6453_v57 = vld [vmem:[%s7148_s24 + $0x140] sm:$0xff] }
 0x368   : > { %v3493_v59 = vmax.f32 %v3485_v38, 0.0  ;;  %v3679_v21 = vpack.c.bf16 %v3670_v58, %v3670_v58 }
 0x369   : > { %v3230_v25 = vpop.f32.mrf.mxu1 }
 0x36a   : > { %v3509_v60 = vadd.f32 0.8, %v3493_v59  ;;  %4246 = vmatmul.bf16.vlgmr.msrb.gmra.mxu2 %v3679_v21  ;;  %v3231_v45 = vadd.f32 %v3230_v25, %v3218_v20  ;;  %4271 = vmatpush.bf16.msra.mxu0 %v6453_v57 }
 0x36c   : > { %6616 = vrsqrt.f32 %v3509_v60  ;;  %vm3559_vm12 = vweird.f32 %v3509_v60 }
 0x371   : > { %v3232_v1 = vpop.f32.mrf.mxu1 }
 0x372   : > { %v6617_v2 = vpop.eup %6616 }
 0x373   : > { %v3243_v7 = vpop.f32.mrf.mxu2  ;;  %v3554_v62 = vmul.f32 %v6617_v2, %v3509_v60  ;;  %vm3560_vm11 = vweird.f32 %v6617_v2 }
 0x374   : > { %v7545_v5 = vadd.f32 %v3243_v7, %v3231_v45  ;;  %vm3561_vm13 = vmor %vm3559_vm12, %vm3560_vm11  ;;  %v6465_v7 = vld [vmem:[%s7148_s24 + $0x1a0] sm:$0xff] }
 0x375   : > { %v3555_v37 = vmul.f32 %v6617_v2, %v3554_v62  ;;  %4280 = vmatpush.bf16.msra.mxu1 %v6465_v7 }
 0x376   : > { %v3383_v11 = vrot.slane %v7545_v5, 4  ;;  %v3414_v55 = vmul.f32 %v7545_v5, %v7545_v5 }
 0x377   : > { %v3556_v36 = vmul.f32 0.5, %v3555_v37 }
 0x378   : > { %v3384_v22 = vadd.f32 %v3383_v11, %v7545_v5  ;;  %v3447_v24 = vrot.slane %v3414_v55, 4 }
 0x379   : > { %v3557_v27 = vsub.f32 1.5, %v3556_v36 }
 0x37a   : > { %v3385_v19 = vrot.slane %v3384_v22, 2  ;;  %v3448_v18 = vadd.f32 %v3447_v24, %v3414_v55  ;;  %v3269_v26 = vpop.f32.mrf.mxu0 }
 0x37b   : > { %v3245_v28 = vpop.f32.mrf.mxu2  ;;  %v3558_v41 = vmul.f32 %v6617_v2, %v3557_v27 }
 0x37c   : > { %v3386_v16 = vadd.f32 %v3385_v19, %v3384_v22  ;;  %v3449_v29 = vrot.slane %v3448_v18, 2  ;;  %v3256_v30 = vpop.f32.mrf.mxu3  ;;  %v6464_v22 = vld [vmem:[%s7148_s24 + $0x198] sm:$0xff] }
 0x37d   : > { %v3562_v42 = vsel %vm3561_vm13, %v6617_v2, %v3558_v41  ;;  %v3257_v58 = vadd.f32 %v3256_v30, %v1645_v10  ;;  %4281 = vmatpush.bf16.msra.mxu1 %v6464_v22  ;;  %v3607_v41 = vperm.slane %v7416_v35, 5 }
 0x37e   : > { %v3387_v33 = vrot.slane %v3386_v16, 1  ;;  %v3450_v34 = vadd.f32 %v3449_v29, %v3448_v18  ;;  %v3597_v43 = vmul.f32 %v3562_v42, %v3501_v32  ;;  %v6463_v29 = vld [vmem:[%s7148_s24 + $0x190] sm:$0xff] }
 0x37f   : > { %v3270_v21 = vadd.f32 %v3269_v26, %v3257_v58 }
 0x380   : > { %v3388_v13 = vadd.f32 %v3387_v33, %v3386_v16  ;;  %v3451_v23 = vrot.slane %v3450_v34, 1  ;;  %v3622_v6 = vmul.f32 %v3606_v3, %v3597_v43 }
 0x381   : > { %4282 = vmatpush.bf16.msra.mxu1 %v6463_v29 }
 0x382   : > { %v7559_v46 = vmul.f32 %v3388_v13, %v7179_v63  ;;  %v3452_v12 = vadd.f32 %v3451_v23, %v3450_v34  ;;  %v3271_v48 = vpop.f32.mrf.mxu0  ;;  %v3647_v4 = vadd.f32 %v3631_v44, %v3622_v6  ;;  %v6462_v13 = vld [vmem:[%s7148_s24 + $0x188] sm:$0xff] }
 0x384   : > { %v3470_v0 = vmul.f32 %v3452_v12, %v7179_v63  ;;  %v3478_v40 = vmul.f32 %v7559_v46, %v7559_v46  ;;  %v3258_v15 = vpop.f32.mrf.mxu3  ;;  %vm3655_vm14 = vcmp.gt.f32.partialorder %v3647_v4, 0.0  ;;  %v3663_v31 = vmul.f32 0.2, %v3647_v4 }
 0x385   : > { %v3502_v30 = vsub.f32 %v7545_v5, %v7559_v46  ;;  %4283 = vmatpush.bf16.msra.mxu1 %v6462_v13  ;;  %v1646_v15 = vperm.slane %v7538_v53, 7  ;;  %v6474_v53 = vld [vmem:[%s7148_s24 + $0x1e8] sm:$0xff] }
 0x386   : > { %v3486_v50 = vsub.f32 %v3470_v0, %v3478_v40  ;;  %v3671_v25 = vsel %vm3655_vm14, %v3647_v4, %v3663_v31  ;;  %v6461_v0 = vld [vmem:[%s7148_s24 + $0x180] sm:$0xff] }
 0x387   : > { %v3680_v47 = vpack.c.bf16 %v3671_v25, %v3671_v25  ;;  %v6475_v25 = vld [vmem:[%s7148_s24 + $0x1f0] sm:$0xff] }
 0x388   : > { %v3494_v54 = vmax.f32 %v3486_v50, 0.0  ;;  %v6476_v50 = vld [vmem:[%s7148_s24 + $0x1f8] sm:$0xff] }
 0x389   : > { %v3282_v38 = vpop.f32.mrf.mxu1  ;;  %4259 = vmatmul.bf16.vlgmr.msrb.gmra.mxu3 %v3680_v47  ;;  %4284 = vmatpush.bf16.msra.mxu1 %v6461_v0 }
 0x38a   : > { %v3510_v59 = vadd.f32 0.8, %v3494_v54  ;;  %v3283_v8 = vadd.f32 %v3282_v38, %v3270_v21  ;;  %4290 = vmatpush.bf16.msra.mxu2 %v6476_v50 }
 0x38c   : > { %6618 = vrsqrt.f32 %v3510_v59  ;;  %vm3569_vm0 = vweird.f32 %v3510_v59 }
 0x38e   : > { %4291 = vmatpush.bf16.msra.mxu2 %v6475_v25 }
 0x391   : > { %v3284_v60 = vpop.f32.mrf.mxu1 }
 0x392   : > { %v6619_v1 = vpop.eup %6618  ;;  %4292 = vmatpush.bf16.msra.mxu2 %v6474_v53 }
 0x393   : > { %v3295_v20 = vpop.f32.mrf.mxu2  ;;  %v3564_v52 = vmul.f32 %v6619_v1, %v3510_v59  ;;  %vm3570_vm15 = vweird.f32 %v6619_v1 }
 0x394   : > { %v7570_v45 = vadd.f32 %v3295_v20, %v3283_v8  ;;  %vm3571_vm1 = vmor %vm3569_vm0, %vm3570_vm15 }
 0x395   : > { %v3565_v11 = vmul.f32 %v6619_v1, %v3564_v52 }
 0x396   : > { %v3389_v2 = vrot.slane %v7570_v45, 4  ;;  %v3415_v62 = vmul.f32 %v7570_v45, %v7570_v45  ;;  %4293 = vmatpush.bf16.msra.mxu2 %v6473_v61 }
 0x397   : > { %v3566_v37 = vmul.f32 0.5, %v3565_v11 }
 0x398   : > { %v3390_v55 = vadd.f32 %v3389_v2, %v7570_v45  ;;  %v3453_v14 = vrot.slane %v3415_v62, 4 }
 0x399   : > { %v3567_v18 = vsub.f32 1.5, %v3566_v37 }
 0x39a   : > { %v3391_v24 = vrot.slane %v3390_v55, 2  ;;  %v3454_v36 = vadd.f32 %v3453_v14, %v3415_v62  ;;  %v3321_v19 = vpop.f32.mrf.mxu0  ;;  %v6472_v62 = vld [vmem:[%s7148_s24 + $0x1d8] sm:$0xff] }
 0x39b   : > { %v3297_v26 = vpop.f32.mrf.mxu2  ;;  %v3568_v16 = vmul.f32 %v6619_v1, %v3567_v18  ;;  %4294 = vmatpush.bf16.msra.mxu2 %v6472_v62 }
 0x39c   : > { %v3392_v17 = vadd.f32 %v3391_v24, %v3390_v55  ;;  %v3455_v27 = vrot.slane %v3454_v36, 2  ;;  %v3308_v28 = vpop.f32.mrf.mxu3  ;;  %v6593_v24 = vld [vmem:[%s7486_s21] ss:$0 sm:$0xff]  ;;  %v6471_v26 = vld [vmem:[%s7148_s24 + $0x1d0] sm:$0xff] }
 0x39d   : > { %v3572_v33 = vsel %vm3571_vm1, %v6619_v1, %v3568_v16  ;;  %v3309_v54 = vadd.f32 %v3308_v28, %v1646_v15  ;;  %v3608_v28 = vperm.slane %v7416_v35, 6 }
 0x39e   : > { %v3393_v32 = vrot.slane %v3392_v17, 1  ;;  %v3456_v3 = vadd.f32 %v3455_v27, %v3454_v36  ;;  %v3598_v34 = vmul.f32 %v3572_v33, %v3502_v30  ;;  %v3633_v33 = vperm.slane %v7432_v56, 6 }
 0x39f   : > { %v3322_v47 = vadd.f32 %v3321_v19, %v3309_v54  ;;  %4295 = vmatpush.bf16.msra.mxu2 %v6471_v26 }
 0x3a0   : > { %v3394_v42 = vadd.f32 %v3393_v32, %v3392_v17  ;;  %v3457_v43 = vrot.slane %v3456_v3, 1  ;;  %v3623_v23 = vmul.f32 %v3607_v41, %v3598_v34 }
 0x3a2   : > { %v7585_v44 = vmul.f32 %v3394_v42, %v7179_v63  ;;  %v3458_v5 = vadd.f32 %v3457_v43, %v3456_v3  ;;  %v3323_v6 = vpop.f32.mrf.mxu0  ;;  %v3648_v46 = vadd.f32 %v3632_v39, %v3623_v23  ;;  %v6470_v42 = vld [vmem:[%s7148_s24 + $0x1c8] sm:$0xff] }
 0x3a3   : > { %4296 = vmatpush.bf16.msra.mxu2 %v6470_v42 }
 0x3a4   : > { %v3471_v12 = vmul.f32 %v3458_v5, %v7179_v63  ;;  %v3479_v48 = vmul.f32 %v7585_v44, %v7585_v44  ;;  %v3310_v49 = vpop.f32.mrf.mxu3  ;;  %vm3656_vm2 = vcmp.gt.f32.partialorder %v3648_v46, 0.0  ;;  %v3664_v4 = vmul.f32 0.2, %v3648_v46 }
 0x3a5   : > { %v3503_v27 = vsub.f32 %v7570_v45, %v7585_v44  ;;  %v6469_v44 = vld [vmem:[%s7148_s24 + $0x1c0] sm:$0xff] }
 0x3a6   : > { %v3487_v40 = vsub.f32 %v3471_v12, %v3479_v48  ;;  %v3672_v57 = vsel %vm3656_vm2, %v3648_v46, %v3664_v4 }
 0x3a7   : > { %v3681_v38 = vpack.c.bf16 %v3672_v57, %v3672_v57  ;;  %4297 = vmatpush.bf16.msra.mxu2 %v6469_v44 }
 0x3a8   : > { %v3495_v31 = vmax.f32 %v3487_v40, 0.0 }
 0x3a9   : > { %v3334_v10 = vpop.f32.mrf.mxu1  ;;  %4272 = vmatmul.bf16.vlgmr.msra.gmra.mxu0 %v3681_v38 }
 0x3aa   : > { %v3511_v9 = vadd.f32 0.8, %v3495_v31  ;;  %v3335_v58 = vadd.f32 %v3334_v10, %v3322_v47 }
 0x3ac   : > { %6620 = vrsqrt.f32 %v3511_v9  ;;  %vm3579_vm4 = vweird.f32 %v3511_v9 }
 0x3b1   : > { %v3336_v59 = vpop.f32.mrf.mxu1 }
 0x3b2   : > { %v3347_v51 = vpop.f32.mrf.mxu2  ;;  %v6621_v21 = vpop.eup %6620  ;;  %v3609_v59 = vperm.slane %v7416_v35, 7 }
 0x3b3   : > { %v7595_v60 = vadd.f32 %v3347_v51, %v3335_v58  ;;  %v3574_v8 = vmul.f32 %v6621_v21, %v3511_v9  ;;  %vm3580_vm3 = vweird.f32 %v6621_v21 }
 0x3b4   : > { %vm3581_vm5 = vmor %vm3579_vm4, %vm3580_vm3 }
 0x3b5   : > { %v3395_v20 = vrot.slane %v7595_v60, 4  ;;  %v3416_v1 = vmul.f32 %v7595_v60, %v7595_v60  ;;  %v3575_v52 = vmul.f32 %v6621_v21, %v3574_v8 }
 0x3b7   : > { %v3396_v7 = vadd.f32 %v3395_v20, %v7595_v60  ;;  %v3459_v2 = vrot.slane %v3416_v1, 4  ;;  %v3576_v11 = vmul.f32 0.5, %v3575_v52 }
 0x3b9   : > { %v3397_v55 = vrot.slane %v3396_v7, 2  ;;  %v3460_v14 = vadd.f32 %v3459_v2, %v3416_v1  ;;  %v3577_v37 = vsub.f32 1.5, %v3576_v11 }
 0x3ba   : > { %v3349_v22 = vpop.f32.mrf.mxu2  ;;  %v4221_v32 = vpop.f32.mrf.mxu0 }
 0x3bb   : > { %v3398_v36 = vadd.f32 %v3397_v55, %v3396_v7  ;;  %v3461_v19 = vrot.slane %v3460_v14, 2  ;;  %v3578_v17 = vmul.f32 %v6621_v21, %v3577_v37 }
 0x3bc   : > { %v4208_v18 = vpop.f32.mrf.mxu3 }
 0x3bd   : > { %v3399_v16 = vrot.slane %v3398_v36, 1  ;;  %v3462_v29 = vadd.f32 %v3461_v19, %v3460_v14  ;;  %v3582_v30 = vsel %vm3581_vm5, %v6621_v21, %v3578_v17  ;;  %v4209_v41 = vadd.f32 %v6593_v24, %v4208_v18 }
 0x3be   : > { %v3599_v3 = vmul.f32 %v3582_v30, %v3503_v27  ;;  %v3634_v21 = vperm.slane %v7432_v56, 7 }
 0x3bf   : > { %v3400_v34 = vadd.f32 %v3399_v16, %v3398_v36  ;;  %v3463_v39 = vrot.slane %v3462_v29, 1  ;;  %v4222_v43 = vadd.f32 %v4221_v32, %v4209_v41 }
 0x3c0   : > { %v3624_v13 = vmul.f32 %v3608_v28, %v3599_v3 }
 0x3c1   : > { %v3408_v45 = vmul.f32 %v3400_v34, %v7179_v63  ;;  %v3464_v23 = vadd.f32 %v3463_v39, %v3462_v29 }
 0x3c2   : > { %v3649_v5 = vadd.f32 %v3633_v33, %v3624_v13  ;;  %v4223_v0 = vpop.f32.mrf.mxu0 }
 0x3c3   : > { %v3472_v6 = vmul.f32 %v3464_v23, %v7179_v63  ;;  %v3480_v46 = vmul.f32 %v3408_v45, %v3408_v45  ;;  %v3504_v53 = vsub.f32 %v7595_v60, %v3408_v45 }
 0x3c4   : > { %v4210_v12 = vpop.f32.mrf.mxu3  ;;  %vm3657_vm6 = vcmp.gt.f32.partialorder %v3649_v5, 0.0  ;;  %v3665_v49 = vmul.f32 0.2, %v3649_v5 }
 0x3c5   : > { %v3488_v48 = vsub.f32 %v3472_v6, %v3480_v46 }
 0x3c6   : > { %v3673_v15 = vsel %vm3657_vm6, %v3649_v5, %v3665_v49 }
 0x3c7   : > { %v3496_v40 = vmax.f32 %v3488_v48, 0.0  ;;  %v3682_v4 = vpack.c.bf16 %v3673_v15, %v3673_v15 }
 0x3c9   : > { %v3512_v50 = vadd.f32 0.8, %v3496_v40  ;;  %4285 = vmatmul.bf16.vlgmr.msra.gmra.mxu1 %v3682_v4 }
 0x3cb   : > { %6622 = vrsqrt.f32 %v3512_v50  ;;  %v4234_v10 = vpop.f32.mrf.mxu1  ;;  %vm3589_vm8 = vweird.f32 %v3512_v50 }
 0x3cc   : > { %v4235_v31 = vadd.f32 %v4234_v10, %v4222_v43 }
 0x3d1   : > { %v6623_v57 = vpop.eup %6622 }
 0x3d2   : > { %v3584_v38 = vmul.f32 %v6623_v57, %v3512_v50  ;;  %vm3590_vm7 = vweird.f32 %v6623_v57 }
 0x3d3   : > { %v4236_v63 = vpop.f32.mrf.mxu1  ;;  %vm3591_vm9 = vmor %vm3589_vm8, %vm3590_vm7 }
 0x3d4   : > { %v3585_v9 = vmul.f32 %v6623_v57, %v3584_v38 }
 0x3d6   : > { %v3586_v54 = vmul.f32 0.5, %v3585_v9 }
 0x3d8   : > { %v3587_v25 = vsub.f32 1.5, %v3586_v54 }
 0x3da   : > { %v3588_v47 = vmul.f32 %v6623_v57, %v3587_v25 }
 0x3dc   : > { %v3592_v58 = vsel %vm3591_vm9, %v6623_v57, %v3588_v47 }
 0x3dd   : > { %v3600_v51 = vmul.f32 %v3592_v58, %v3504_v53 }
 0x3df   : > { %v3625_v61 = vmul.f32 %v3609_v59, %v3600_v51 }
 0x3e1   : > { %v3650_v8 = vadd.f32 %v3634_v21, %v3625_v61 }
 0x3e3   : > { %vm3658_vm10 = vcmp.gt.f32.partialorder %v3650_v8, 0.0  ;;  %v3666_v20 = vmul.f32 0.2, %v3650_v8 }
 0x3e5   : > { %v3674_v1 = vsel %vm3658_vm10, %v3650_v8, %v3666_v20 }
 0x3e6   : > { %v3683_v52 = vpack.c.bf16 %v3674_v1, %v3674_v1 }
 0x3e8   : > { %4298 = vmatmul.bf16.vlgmr.msra.gmra.mxu2 %v3683_v52 }
 0x3ed   : > { %v4247_v7 = vpop.f32.mrf.mxu2 }
 0x3ee   : > { %v4248_v2 = vadd.f32 %v4247_v7, %v4235_v31 }
 0x3f5   : > { %v4249_v62 = vpop.f32.mrf.mxu2 }
 0x40c   : > { %v4260_v60 = vpop.f32.mrf.mxu3 }
 0x40d   : > { %v4261_v11 = vadd.f32 %v4260_v60, %v4248_v2 }
 0x414   : > { %v4262_v55 = vpop.f32.mrf.mxu3 }
 0x426   : > { %v4273_v35 = vpop.f32.mrf.mxu0 }
 0x427   : > { %v4274_v56 = vadd.f32 %v4273_v35, %v4261_v11 }
 0x42e   : > { %v4275_v14 = vpop.f32.mrf.mxu0 }
 0x446   : > { %v4286_v37 = vpop.f32.mrf.mxu1 }
 0x447   : > { %v4287_v24 = vadd.f32 %v4286_v37, %v4274_v56 }
 0x44e   : > { %v4288_v22 = vpop.f32.mrf.mxu1 }
 0x46b   : > { %v4299_v36 = vpop.f32.mrf.mxu2 }
 0x46c   : > { %v4300_v19 = vadd.f32 %v4299_v36, %v4287_v24 }
 0x46e   : > { %6624 = vtanh.f32 %v4300_v19 }
 0x473   : > { %v4301_v18 = vpop.f32.mrf.mxu2 }
 0x474   : > { %v6625_v26 = vpop.eup %6624 }
 0x475   : > { %v4304_v17 = vpack.c.bf16 %v6625_v26, %v6625_v26 }
 0x477   : > { %4305 = vst [vmem:[%s449_s20] sm:$0xf] %v4304_v17 }
 0x478 PF: > { %p19_p3 = scmp.ge.s32.totalorder %s7037_s15, 9   ;;  %s7666_s27 = smov %s6909_s28 }
 0x479   : > { %s7667_s28 = smov %s6913_s29  ;;  %s7668_s29 = smov %s7048_s18 }
 0x47a   : > { %s7669_s30 = smov %s7037_s15  ;;  %21 = sbr.rel (!%p19_p3) target bundleno = 11 (0xb), region = 126 }
 0x47f   :  { %4325 = vsyncpa [#allocation3], 1 }
 0x480   :  { %4327 = vsyncpa [#allocation3 + $0x1], 1 }
 0x481   :  { %4328 = vsyncpa [#allocation5], 1 }
 0x482   :  { %4329 = vsyncpa [#allocation8], 1 }
 0x483   :  { %4330 = vsyncpa [#allocation11], 1 }

</bundles_post_ra>
